<compile_context>
chip_gen: v6e
topology: v6e:2x2x1
jax: 0.10.0
libtpu: 0.0.40
codegen_flags: <defaults>
</compile_context>

<pallas_src>
import functools

import jax
import jax.numpy as jnp
from jax import lax
from jax.experimental import pallas as pl
from jax.experimental.pallas import tpu as pltpu

EPS = 1e-5
LANE = 128


def _pick_row_tile(h, wpad, row_budget=256):
    """Rows per tile: k*wpad with k | h and (k*wpad) % 8 == 0, <= budget if possible.

    Production would use 512-2048 rows; the small budget keeps >1 tile per image
    at toy shapes so the cross-tile stats-accumulation path is exercised.
    """
    cands = [k * wpad for k in range(1, h + 1)
             if h % k == 0 and (k * wpad) % 8 == 0]
    assert cands, "unsupported H/W/dilation for this demo tiling"
    under = [c for c in cands if c <= row_budget]
    return max(under) if under else min(cands)


@functools.partial(jax.jit, static_argnames=("dilation",))
def conv_bnr(x_nchw, w_oihw, gamma, beta, *, dilation=1):
    """ConvBNR forward: conv(3x3, stride 1, pad=dilation) + batch-stat BN + ReLU."""
    N, Cin, H, W = x_nchw.shape
    Cout, _, K, _ = w_oihw.shape
    d = dilation

    wpad = W + 4 * d                  # extended width (garbage cols masked / sliced off)
    hpad = H + 2 * d + 1              # +1 slack row so every shifted read stays in bounds
    me = H * wpad                     # extended output rows per image
    cout_p = ((Cout + LANE - 1) // LANE) * LANE
    kk = K * K

    tm = _pick_row_tile(H, wpad)      # rows per tile (multiple of wpad and of 8)
    nt = me // tm
    halo = 2 * d * (wpad + 1)         # max tap row offset in the flattened view

    # ---------------- wrapper glue (cheap layout work, plain XLA) ----------------
    x_nhwc = jnp.transpose(x_nchw, (0, 2, 3, 1)).astype(jnp.bfloat16)
    xp = jnp.pad(x_nhwc, ((0, 0), (d, d + 1), (d, 3 * d), (0, 0)))
    xf = xp.reshape(N, hpad * wpad, Cin)
    # Per-tile slabs with a row halo (duplication ~ halo/tm, not 9x im2col).
    x_tiles = jnp.stack(
        [xf[:, t * tm: t * tm + tm + halo, :] for t in range(nt)], axis=1
    ).reshape(N * nt, tm + halo, Cin)

    # Weights: OIHW -> (kh, kw, cin, cout) -> [K*K, Cin, Cout_pad], bf16.
    w_taps = jnp.transpose(w_oihw, (2, 3, 1, 0)).reshape(kk, Cin, Cout)
    w_taps = jnp.pad(w_taps, ((0, 0), (0, 0), (0, cout_p - Cout))).astype(jnp.bfloat16)

    # Row-validity mask (extended-width columns >= W are garbage). tm is a
    # multiple of wpad, so the same mask applies to every tile.
    col = jnp.arange(tm, dtype=jnp.int32) % wpad
    mask = (col < W).astype(jnp.float32).reshape(1, tm)

    gamma_p = jnp.pad(gamma.astype(jnp.float32), (0, cout_p - Cout))
    beta_p = jnp.pad(beta.astype(jnp.float32), (0, cout_p - Cout))

    def _conv_tile(x_tile, w_ref):
        """9 shifted bf16 MXU matmuls, f32 accumulation -> [tm, cout_p] f32."""
        acc = jnp.zeros((tm, cout_p), jnp.float32)
        for kh in range(K):
            for kw in range(K):
                off = kh * d * wpad + kw * d
                acc = acc + jnp.dot(x_tile[off:off + tm, :], w_ref[kh * K + kw],
                                    preferred_element_type=jnp.float32)
        return acc

    conv_flops = 2 * N * nt * tm * Cin * cout_p * kk
    x_bytes = x_tiles.size * 2
    w_bytes = w_taps.size * 2

    # ------- pass 1: conv (recomputed) -> masked per-channel sum / sum-of-squares -------
    def stats_kernel(x_ref, w_ref, m_ref, stats_ref):
        t = pl.program_id(1)
        acc = _conv_tile(x_ref[0], w_ref)                        # [tm, cout_p] f32

        # Masked per-channel reductions on the MXU (mask row-vector matmuls, no
        # XLU cross-sublane reduce).
        m = m_ref[...]                                           # [1, tm] f32
        psum = jnp.dot(m, acc, preferred_element_type=jnp.float32)
        psq = jnp.dot(m, acc * acc, preferred_element_type=jnp.float32)
        upd = jnp.concatenate(
            [psum, psq, jnp.zeros((6, cout_p), jnp.float32)], axis=0)  # [8, cout_p]

        @pl.when(t == 0)
        def _init():
            stats_ref[...] = jnp.zeros_like(stats_ref)

        stats_ref[...] += upd

    stats = pl.pallas_call(
        stats_kernel,
        out_shape=jax.ShapeDtypeStruct((N * 8, cout_p), jnp.float32),
        grid=(N, nt),
        in_specs=[
            pl.BlockSpec((1, tm + halo, Cin), lambda n, t: (n * nt + t, 0, 0)),
            pl.BlockSpec((kk, Cin, cout_p), lambda n, t: (0, 0, 0)),
            pl.BlockSpec((1, tm), lambda n, t: (0, 0)),
        ],
        out_specs=pl.BlockSpec((8, cout_p), lambda n, t: (n, 0)),
        compiler_params=pltpu.CompilerParams(
            dimension_semantics=("parallel", "arbitrary"),
            vmem_limit_bytes=32 * 1024 * 1024),
        cost_estimate=pl.CostEstimate(
            flops=conv_flops, transcendentals=0,
            bytes_accessed=x_bytes + w_bytes + mask.size * 4 + N * 8 * cout_p * 4),
    )(x_tiles, w_taps, mask)

    # ---------- tiny O(Cout) finalize: fold BN affine into one scale / bias ----------
    stats = stats.reshape(N, 8, cout_p)
    s0 = jnp.sum(stats[:, 0, :], axis=0)
    s1 = jnp.sum(stats[:, 1, :], axis=0)
    m_valid = jnp.float32(N * H * W)
    mean = s0 / m_valid
    var = jnp.maximum(s1 / m_valid - mean * mean, 0.0)
    scale_v = gamma_p * lax.rsqrt(var + EPS)
    bias_v = beta_p - mean * scale_v
    scale = scale_v.reshape(1, cout_p)
    bias = bias_v.reshape(1, cout_p)

    # ---- pass 2: conv (recomputed) -> y = conv*scale + bias -> ReLU (lane-dense) ----
    def conv_affine_relu_kernel(x_ref, w_ref, scale_ref, bias_ref, o_ref):
        acc = _conv_tile(x_ref[0], w_ref)                        # [tm, cout_p] f32
        y = acc * scale_ref[...] + bias_ref[...]
        o_ref[...] = jnp.maximum(y, 0.0).astype(o_ref.dtype)

    out_flat = pl.pallas_call(
        conv_affine_relu_kernel,
        out_shape=jax.ShapeDtypeStruct((N * me, cout_p), jnp.float32),
        grid=(N, nt),
        in_specs=[
            pl.BlockSpec((1, tm + halo, Cin), lambda n, t: (n * nt + t, 0, 0)),
            pl.BlockSpec((kk, Cin, cout_p), lambda n, t: (0, 0, 0)),
            pl.BlockSpec((1, cout_p), lambda n, t: (0, 0)),
            pl.BlockSpec((1, cout_p), lambda n, t: (0, 0)),
        ],
        out_specs=pl.BlockSpec((tm, cout_p), lambda n, t: (n * nt + t, 0)),
        compiler_params=pltpu.CompilerParams(
            dimension_semantics=("parallel", "parallel"),
            vmem_limit_bytes=32 * 1024 * 1024),
        cost_estimate=pl.CostEstimate(
            flops=conv_flops, transcendentals=0,
            bytes_accessed=x_bytes + w_bytes + 2 * cout_p * 4 + N * me * cout_p * 4),
    )(x_tiles, w_taps, scale, bias)

    # Drop extended-width garbage columns and channel padding, return NCHW.
    out = out_flat.reshape(N, H, wpad, cout_p)[:, :, :W, :Cout]
    return jnp.transpose(out, (0, 3, 1, 2))


def _reference(x_nchw, w_oihw, gamma, beta, dilation=1):
    """Pure-JAX reference using the same bf16-rounded inputs, f32 accumulation."""
    d = dilation
    xb = x_nchw.astype(jnp.bfloat16).astype(jnp.float32)
    wb = w_oihw.astype(jnp.bfloat16).astype(jnp.float32)
    conv = lax.conv_general_dilated(
        xb, wb, window_strides=(1, 1),
        padding=((d, d), (d, d)), rhs_dilation=(d, d),
        dimension_numbers=("NCHW", "OIHW", "NCHW"),
        precision=lax.Precision.HIGHEST)
    mean = jnp.mean(conv, axis=(0, 2, 3), keepdims=True)
    var = jnp.mean(jnp.square(conv - mean), axis=(0, 2, 3), keepdims=True)
    g = gamma.reshape(1, -1, 1, 1)
    b = beta.reshape(1, -1, 1, 1)
    y = (conv - mean) * lax.rsqrt(var + EPS) * g + b
    return jnp.maximum(y, 0.0)


if __name__ == "__main__":
    key = jax.random.PRNGKey(0)
    k_x, k_w, k_g, k_b = jax.random.split(key, 4)

    N, Cin, Cout, H, W, K = 2, 4, 8, 16, 16, 3
    dilation = 1

    x = jax.random.normal(k_x, (N, Cin, H, W), dtype=jnp.float32)
    w = 0.1 * jax.random.normal(k_w, (Cout, Cin, K, K), dtype=jnp.float32)
    gamma = 1.0 + 0.1 * jax.random.normal(k_g, (Cout,), dtype=jnp.float32)
    beta = 0.1 * jax.random.normal(k_b, (Cout,), dtype=jnp.float32)

    out = conv_bnr(x, w, gamma, beta, dilation=dilation)
    out = jax.block_until_ready(out)

    ref = _reference(x, w, gamma, beta, dilation=dilation)
    assert out.shape == (N, Cout, H, W)
    max_err = float(jnp.max(jnp.abs(out - ref)))
    assert jnp.allclose(out, ref, atol=2e-3, rtol=2e-3), (
        f"mismatch vs reference: max abs err = {max_err}")

    print("KERNEL_OK")
</pallas_src>

<mosaic_0001>
module attributes {stable_mosaic.version = 11 : i64} {
  func.func @stats_kernel(%arg0: i32, %arg1: i32, %arg2: memref<1x202x4xbf16, #tpu.memory_space<vmem>>, %arg3: memref<9x4x128xbf16, #tpu.memory_space<vmem>>, %arg4: memref<1x160xf32, #tpu.memory_space<vmem>>, %arg5: memref<8x128xf32, #tpu.memory_space<vmem>>) attributes {dimension_semantics = [#tpu.dimension_semantics<parallel>, #tpu.dimension_semantics<arbitrary>], iteration_bounds = array<i64: 2, 2>, scalar_prefetch = 0 : i64, scratch_operands = 0 : i64, tpu.core_type = #tpu.core_type<tc>, window_params = [{transform_indices = @transform_0, window_bounds = array<i64: 1, 202, 4>}, {pipeline_mode = #tpu.pipeline_mode<synchronous>, transform_indices = @transform_1, window_bounds = array<i64: 9, 4, 128>}, {pipeline_mode = #tpu.pipeline_mode<synchronous>, transform_indices = @transform_2, window_bounds = array<i64: 1, 160>}, {transform_indices = @transform_3, window_bounds = array<i64: 8, 128>}]} {
    %c0 = arith.constant 0 : index
    %c0_0 = arith.constant 0 : index
    %c0_1 = arith.constant 0 : index
    %0 = vector.load %arg2[%c0, %c0_0, %c0_1] : memref<1x202x4xbf16, #tpu.memory_space<vmem>>, vector<1x202x4xbf16>
    %1 = vector.shape_cast %0 : vector<1x202x4xbf16> to vector<202x4xbf16>
    %cst = arith.constant 0.000000e+00 : f32
    %2 = vector.broadcast %cst : f32 to vector<160x128xf32>
    %3 = vector.extract_strided_slice %1 {offsets = [0, 0], sizes = [160, 4], strides = [1, 1]} : vector<202x4xbf16> to vector<160x4xbf16>
    %c0_2 = arith.constant 0 : index
    %c0_3 = arith.constant 0 : index
    %c0_4 = arith.constant 0 : index
    %4 = vector.load %arg3[%c0_2, %c0_3, %c0_4] : memref<9x4x128xbf16, #tpu.memory_space<vmem>>, vector<1x4x128xbf16>
    %5 = vector.shape_cast %4 : vector<1x4x128xbf16> to vector<4x128xbf16>
    %cst_5 = arith.constant dense<0.000000e+00> : vector<160x128xf32>
    %6 = tpu.matmul %3, %5, %cst_5 {dimension_numbers = #tpu.dot_dimension_numbers<[1], [0], [0], [1], [0, 0, 1, 1], [], []>} : vector<160x4xbf16>, vector<4x128xbf16>, vector<160x128xf32> -> vector<160x128xf32>
    %7 = arith.addf %2, %6 : vector<160x128xf32>
    %8 = vector.extract_strided_slice %1 {offsets = [1, 0], sizes = [160, 4], strides = [1, 1]} : vector<202x4xbf16> to vector<160x4xbf16>
    %c1 = arith.constant 1 : index
    %c0_6 = arith.constant 0 : index
    %c0_7 = arith.constant 0 : index
    %9 = vector.load %arg3[%c1, %c0_6, %c0_7] : memref<9x4x128xbf16, #tpu.memory_space<vmem>>, vector<1x4x128xbf16>
    %10 = vector.shape_cast %9 : vector<1x4x128xbf16> to vector<4x128xbf16>
    %cst_8 = arith.constant dense<0.000000e+00> : vector<160x128xf32>
    %11 = tpu.matmul %8, %10, %cst_8 {dimension_numbers = #tpu.dot_dimension_numbers<[1], [0], [0], [1], [0, 0, 1, 1], [], []>} : vector<160x4xbf16>, vector<4x128xbf16>, vector<160x128xf32> -> vector<160x128xf32>
    %12 = arith.addf %7, %11 : vector<160x128xf32>
    %13 = vector.extract_strided_slice %1 {offsets = [2, 0], sizes = [160, 4], strides = [1, 1]} : vector<202x4xbf16> to vector<160x4xbf16>
    %c2 = arith.constant 2 : index
    %c0_9 = arith.constant 0 : index
    %c0_10 = arith.constant 0 : index
    %14 = vector.load %arg3[%c2, %c0_9, %c0_10] : memref<9x4x128xbf16, #tpu.memory_space<vmem>>, vector<1x4x128xbf16>
    %15 = vector.shape_cast %14 : vector<1x4x128xbf16> to vector<4x128xbf16>
    %cst_11 = arith.constant dense<0.000000e+00> : vector<160x128xf32>
    %16 = tpu.matmul %13, %15, %cst_11 {dimension_numbers = #tpu.dot_dimension_numbers<[1], [0], [0], [1], [0, 0, 1, 1], [], []>} : vector<160x4xbf16>, vector<4x128xbf16>, vector<160x128xf32> -> vector<160x128xf32>
    %17 = arith.addf %12, %16 : vector<160x128xf32>
    %18 = vector.extract_strided_slice %1 {offsets = [20, 0], sizes = [160, 4], strides = [1, 1]} : vector<202x4xbf16> to vector<160x4xbf16>
    %c3 = arith.constant 3 : index
    %c0_12 = arith.constant 0 : index
    %c0_13 = arith.constant 0 : index
    %19 = vector.load %arg3[%c3, %c0_12, %c0_13] : memref<9x4x128xbf16, #tpu.memory_space<vmem>>, vector<1x4x128xbf16>
    %20 = vector.shape_cast %19 : vector<1x4x128xbf16> to vector<4x128xbf16>
    %cst_14 = arith.constant dense<0.000000e+00> : vector<160x128xf32>
    %21 = tpu.matmul %18, %20, %cst_14 {dimension_numbers = #tpu.dot_dimension_numbers<[1], [0], [0], [1], [0, 0, 1, 1], [], []>} : vector<160x4xbf16>, vector<4x128xbf16>, vector<160x128xf32> -> vector<160x128xf32>
    %22 = arith.addf %17, %21 : vector<160x128xf32>
    %23 = vector.extract_strided_slice %1 {offsets = [21, 0], sizes = [160, 4], strides = [1, 1]} : vector<202x4xbf16> to vector<160x4xbf16>
    %c4 = arith.constant 4 : index
    %c0_15 = arith.constant 0 : index
    %c0_16 = arith.constant 0 : index
    %24 = vector.load %arg3[%c4, %c0_15, %c0_16] : memref<9x4x128xbf16, #tpu.memory_space<vmem>>, vector<1x4x128xbf16>
    %25 = vector.shape_cast %24 : vector<1x4x128xbf16> to vector<4x128xbf16>
    %cst_17 = arith.constant dense<0.000000e+00> : vector<160x128xf32>
    %26 = tpu.matmul %23, %25, %cst_17 {dimension_numbers = #tpu.dot_dimension_numbers<[1], [0], [0], [1], [0, 0, 1, 1], [], []>} : vector<160x4xbf16>, vector<4x128xbf16>, vector<160x128xf32> -> vector<160x128xf32>
    %27 = arith.addf %22, %26 : vector<160x128xf32>
    %28 = vector.extract_strided_slice %1 {offsets = [22, 0], sizes = [160, 4], strides = [1, 1]} : vector<202x4xbf16> to vector<160x4xbf16>
    %c5 = arith.constant 5 : index
    %c0_18 = arith.constant 0 : index
    %c0_19 = arith.constant 0 : index
    %29 = vector.load %arg3[%c5, %c0_18, %c0_19] : memref<9x4x128xbf16, #tpu.memory_space<vmem>>, vector<1x4x128xbf16>
    %30 = vector.shape_cast %29 : vector<1x4x128xbf16> to vector<4x128xbf16>
    %cst_20 = arith.constant dense<0.000000e+00> : vector<160x128xf32>
    %31 = tpu.matmul %28, %30, %cst_20 {dimension_numbers = #tpu.dot_dimension_numbers<[1], [0], [0], [1], [0, 0, 1, 1], [], []>} : vector<160x4xbf16>, vector<4x128xbf16>, vector<160x128xf32> -> vector<160x128xf32>
    %32 = arith.addf %27, %31 : vector<160x128xf32>
    %33 = vector.extract_strided_slice %1 {offsets = [40, 0], sizes = [160, 4], strides = [1, 1]} : vector<202x4xbf16> to vector<160x4xbf16>
    %c6 = arith.constant 6 : index
    %c0_21 = arith.constant 0 : index
    %c0_22 = arith.constant 0 : index
    %34 = vector.load %arg3[%c6, %c0_21, %c0_22] : memref<9x4x128xbf16, #tpu.memory_space<vmem>>, vector<1x4x128xbf16>
    %35 = vector.shape_cast %34 : vector<1x4x128xbf16> to vector<4x128xbf16>
    %cst_23 = arith.constant dense<0.000000e+00> : vector<160x128xf32>
    %36 = tpu.matmul %33, %35, %cst_23 {dimension_numbers = #tpu.dot_dimension_numbers<[1], [0], [0], [1], [0, 0, 1, 1], [], []>} : vector<160x4xbf16>, vector<4x128xbf16>, vector<160x128xf32> -> vector<160x128xf32>
    %37 = arith.addf %32, %36 : vector<160x128xf32>
    %38 = vector.extract_strided_slice %1 {offsets = [41, 0], sizes = [160, 4], strides = [1, 1]} : vector<202x4xbf16> to vector<160x4xbf16>
    %c7 = arith.constant 7 : index
    %c0_24 = arith.constant 0 : index
    %c0_25 = arith.constant 0 : index
    %39 = vector.load %arg3[%c7, %c0_24, %c0_25] : memref<9x4x128xbf16, #tpu.memory_space<vmem>>, vector<1x4x128xbf16>
    %40 = vector.shape_cast %39 : vector<1x4x128xbf16> to vector<4x128xbf16>
    %cst_26 = arith.constant dense<0.000000e+00> : vector<160x128xf32>
    %41 = tpu.matmul %38, %40, %cst_26 {dimension_numbers = #tpu.dot_dimension_numbers<[1], [0], [0], [1], [0, 0, 1, 1], [], []>} : vector<160x4xbf16>, vector<4x128xbf16>, vector<160x128xf32> -> vector<160x128xf32>
    %42 = arith.addf %37, %41 : vector<160x128xf32>
    %43 = vector.extract_strided_slice %1 {offsets = [42, 0], sizes = [160, 4], strides = [1, 1]} : vector<202x4xbf16> to vector<160x4xbf16>
    %c8 = arith.constant 8 : index
    %c0_27 = arith.constant 0 : index
    %c0_28 = arith.constant 0 : index
    %44 = vector.load %arg3[%c8, %c0_27, %c0_28] : memref<9x4x128xbf16, #tpu.memory_space<vmem>>, vector<1x4x128xbf16>
    %45 = vector.shape_cast %44 : vector<1x4x128xbf16> to vector<4x128xbf16>
    %cst_29 = arith.constant dense<0.000000e+00> : vector<160x128xf32>
    %46 = tpu.matmul %43, %45, %cst_29 {dimension_numbers = #tpu.dot_dimension_numbers<[1], [0], [0], [1], [0, 0, 1, 1], [], []>} : vector<160x4xbf16>, vector<4x128xbf16>, vector<160x128xf32> -> vector<160x128xf32>
    %47 = arith.addf %42, %46 : vector<160x128xf32>
    %c0_30 = arith.constant 0 : index
    %c0_31 = arith.constant 0 : index
    %48 = vector.load %arg4[%c0_30, %c0_31] : memref<1x160xf32, #tpu.memory_space<vmem>>, vector<1x160xf32>
    %cst_32 = arith.constant dense<0.000000e+00> : vector<1x128xf32>
    %49 = tpu.matmul %48, %47, %cst_32 {dimension_numbers = #tpu.dot_dimension_numbers<[1], [0], [0], [1], [0, 0, 1, 1], [], []>} : vector<1x160xf32>, vector<160x128xf32>, vector<1x128xf32> -> vector<1x128xf32>
    %50 = arith.mulf %47, %47 : vector<160x128xf32>
    %cst_33 = arith.constant dense<0.000000e+00> : vector<1x128xf32>
    %51 = tpu.matmul %48, %50, %cst_33 {dimension_numbers = #tpu.dot_dimension_numbers<[1], [0], [0], [1], [0, 0, 1, 1], [], []>} : vector<1x160xf32>, vector<160x128xf32>, vector<1x128xf32> -> vector<1x128xf32>
    %cst_34 = arith.constant 0.000000e+00 : f32
    %52 = vector.broadcast %cst_34 : f32 to vector<6x128xf32>
    %53 = tpu.concatenate %49, %51, %52 in 0 : vector<1x128xf32>, vector<1x128xf32>, vector<6x128xf32> -> vector<8x128xf32>
    %c0_i32 = arith.constant 0 : i32
    %54 = arith.cmpi eq, %arg1, %c0_i32 : i32
    %55 = arith.extui %54 : i1 to i32
    %c0_i32_35 = arith.constant 0 : i32
    %56 = arith.cmpi ne, %55, %c0_i32_35 : i32
    scf.if %56 {
      %cst_40 = arith.constant 0.000000e+00 : f32
      %60 = vector.broadcast %cst_40 : f32 to vector<8x128xf32>
      %c0_41 = arith.constant 0 : index
      %c0_42 = arith.constant 0 : index
      %61 = vector.load %arg5[%c0_41, %c0_42] : memref<8x128xf32, #tpu.memory_space<vmem>>, vector<8x128xf32>
      tpu.vector_store %arg5[%c0_41, %c0_42], %60 {strides = array<i32>} : memref<8x128xf32, #tpu.memory_space<vmem>>, vector<8x128xf32>,
    } else {
    }
    %c0_36 = arith.constant 0 : index
    %c0_37 = arith.constant 0 : index
    %57 = vector.load %arg5[%c0_36, %c0_37] : memref<8x128xf32, #tpu.memory_space<vmem>>, vector<8x128xf32>
    %58 = arith.addf %57, %53 : vector<8x128xf32>
    %c0_38 = arith.constant 0 : index
    %c0_39 = arith.constant 0 : index
    %59 = vector.load %arg5[%c0_38, %c0_39] : memref<8x128xf32, #tpu.memory_space<vmem>>, vector<8x128xf32>
    tpu.vector_store %arg5[%c0_38, %c0_39], %58 {strides = array<i32>} : memref<8x128xf32, #tpu.memory_space<vmem>>, vector<8x128xf32>,
    return
  }
  func.func @transform_0(%arg0: i32, %arg1: i32) -> (i32, i32, i32) {
    %c2_i32 = arith.constant 2 : i32
    %0 = arith.muli %arg0, %c2_i32 : i32
    %1 = arith.addi %0, %arg1 : i32
    %c0_i32 = arith.constant 0 : i32
    %c0_i32_0 = arith.constant 0 : i32
    %c0_i32_1 = arith.constant 0 : i32
    return %1, %c0_i32, %c0_i32_0 : i32, i32, i32
  }
  func.func @transform_1(%arg0: i32, %arg1: i32) -> (i32, i32, i32) {
    %c0_i32 = arith.constant 0 : i32
    %c0_i32_0 = arith.constant 0 : i32
    %c0_i32_1 = arith.constant 0 : i32
    %c0_i32_2 = arith.constant 0 : i32
    return %c0_i32, %c0_i32_0, %c0_i32_1 : i32, i32, i32
  }
  func.func @transform_2(%arg0: i32, %arg1: i32) -> (i32, i32) {
    %c0_i32 = arith.constant 0 : i32
    %c0_i32_0 = arith.constant 0 : i32
    %c0_i32_1 = arith.constant 0 : i32
    return %c0_i32, %c0_i32_0 : i32, i32
  }
  func.func @transform_3(%arg0: i32, %arg1: i32) -> (i32, i32) {
    %c0_i32 = arith.constant 0 : i32
    %c0_i32_0 = arith.constant 0 : i32
    return %arg0, %c0_i32 : i32, i32
  }
}

module attributes {stable_mosaic.version = 11 : i64} {
  func.func @conv_affine_relu_kernel(%arg0: i32, %arg1: i32, %arg2: memref<1x202x4xbf16, #tpu.memory_space<vmem>>, %arg3: memref<9x4x128xbf16, #tpu.memory_space<vmem>>, %arg4: memref<1x128xf32, #tpu.memory_space<vmem>>, %arg5: memref<1x128xf32, #tpu.memory_space<vmem>>, %arg6: memref<160x128xf32, #tpu.memory_space<vmem>>) attributes {dimension_semantics = [#tpu.dimension_semantics<parallel>, #tpu.dimension_semantics<parallel>], iteration_bounds = array<i64: 2, 2>, scalar_prefetch = 0 : i64, scratch_operands = 0 : i64, tpu.core_type = #tpu.core_type<tc>, window_params = [{transform_indices = @transform_0, window_bounds = array<i64: 1, 202, 4>}, {pipeline_mode = #tpu.pipeline_mode<synchronous>, transform_indices = @transform_1, window_bounds = array<i64: 9, 4, 128>}, {pipeline_mode = #tpu.pipeline_mode<synchronous>, transform_indices = @transform_2, window_bounds = array<i64: 1, 128>}, {pipeline_mode = #tpu.pipeline_mode<synchronous>, transform_indices = @transform_3, window_bounds = array<i64: 1, 128>}, {transform_indices = @transform_4, window_bounds = array<i64: 160, 128>}]} {
    %c0 = arith.constant 0 : index
    %c0_0 = arith.constant 0 : index
    %c0_1 = arith.constant 0 : index
    %0 = vector.load %arg2[%c0, %c0_0, %c0_1] : memref<1x202x4xbf16, #tpu.memory_space<vmem>>, vector<1x202x4xbf16>
    %1 = vector.shape_cast %0 : vector<1x202x4xbf16> to vector<202x4xbf16>
    %cst = arith.constant 0.000000e+00 : f32
    %2 = vector.broadcast %cst : f32 to vector<160x128xf32>
    %3 = vector.extract_strided_slice %1 {offsets = [0, 0], sizes = [160, 4], strides = [1, 1]} : vector<202x4xbf16> to vector<160x4xbf16>
    %c0_2 = arith.constant 0 : index
    %c0_3 = arith.constant 0 : index
    %c0_4 = arith.constant 0 : index
    %4 = vector.load %arg3[%c0_2, %c0_3, %c0_4] : memref<9x4x128xbf16, #tpu.memory_space<vmem>>, vector<1x4x128xbf16>
    %5 = vector.shape_cast %4 : vector<1x4x128xbf16> to vector<4x128xbf16>
    %cst_5 = arith.constant dense<0.000000e+00> : vector<160x128xf32>
    %6 = tpu.matmul %3, %5, %cst_5 {dimension_numbers = #tpu.dot_dimension_numbers<[1], [0], [0], [1], [0, 0, 1, 1], [], []>} : vector<160x4xbf16>, vector<4x128xbf16>, vector<160x128xf32> -> vector<160x128xf32>
    %7 = arith.addf %2, %6 : vector<160x128xf32>
    %8 = vector.extract_strided_slice %1 {offsets = [1, 0], sizes = [160, 4], strides = [1, 1]} : vector<202x4xbf16> to vector<160x4xbf16>
    %c1 = arith.constant 1 : index
    %c0_6 = arith.constant 0 : index
    %c0_7 = arith.constant 0 : index
    %9 = vector.load %arg3[%c1, %c0_6, %c0_7] : memref<9x4x128xbf16, #tpu.memory_space<vmem>>, vector<1x4x128xbf16>
    %10 = vector.shape_cast %9 : vector<1x4x128xbf16> to vector<4x128xbf16>
    %cst_8 = arith.constant dense<0.000000e+00> : vector<160x128xf32>
    %11 = tpu.matmul %8, %10, %cst_8 {dimension_numbers = #tpu.dot_dimension_numbers<[1], [0], [0], [1], [0, 0, 1, 1], [], []>} : vector<160x4xbf16>, vector<4x128xbf16>, vector<160x128xf32> -> vector<160x128xf32>
    %12 = arith.addf %7, %11 : vector<160x128xf32>
    %13 = vector.extract_strided_slice %1 {offsets = [2, 0], sizes = [160, 4], strides = [1, 1]} : vector<202x4xbf16> to vector<160x4xbf16>
    %c2 = arith.constant 2 : index
    %c0_9 = arith.constant 0 : index
    %c0_10 = arith.constant 0 : index
    %14 = vector.load %arg3[%c2, %c0_9, %c0_10] : memref<9x4x128xbf16, #tpu.memory_space<vmem>>, vector<1x4x128xbf16>
    %15 = vector.shape_cast %14 : vector<1x4x128xbf16> to vector<4x128xbf16>
    %cst_11 = arith.constant dense<0.000000e+00> : vector<160x128xf32>
    %16 = tpu.matmul %13, %15, %cst_11 {dimension_numbers = #tpu.dot_dimension_numbers<[1], [0], [0], [1], [0, 0, 1, 1], [], []>} : vector<160x4xbf16>, vector<4x128xbf16>, vector<160x128xf32> -> vector<160x128xf32>
    %17 = arith.addf %12, %16 : vector<160x128xf32>
    %18 = vector.extract_strided_slice %1 {offsets = [20, 0], sizes = [160, 4], strides = [1, 1]} : vector<202x4xbf16> to vector<160x4xbf16>
    %c3 = arith.constant 3 : index
    %c0_12 = arith.constant 0 : index
    %c0_13 = arith.constant 0 : index
    %19 = vector.load %arg3[%c3, %c0_12, %c0_13] : memref<9x4x128xbf16, #tpu.memory_space<vmem>>, vector<1x4x128xbf16>
    %20 = vector.shape_cast %19 : vector<1x4x128xbf16> to vector<4x128xbf16>
    %cst_14 = arith.constant dense<0.000000e+00> : vector<160x128xf32>
    %21 = tpu.matmul %18, %20, %cst_14 {dimension_numbers = #tpu.dot_dimension_numbers<[1], [0], [0], [1], [0, 0, 1, 1], [], []>} : vector<160x4xbf16>, vector<4x128xbf16>, vector<160x128xf32> -> vector<160x128xf32>
    %22 = arith.addf %17, %21 : vector<160x128xf32>
    %23 = vector.extract_strided_slice %1 {offsets = [21, 0], sizes = [160, 4], strides = [1, 1]} : vector<202x4xbf16> to vector<160x4xbf16>
    %c4 = arith.constant 4 : index
    %c0_15 = arith.constant 0 : index
    %c0_16 = arith.constant 0 : index
    %24 = vector.load %arg3[%c4, %c0_15, %c0_16] : memref<9x4x128xbf16, #tpu.memory_space<vmem>>, vector<1x4x128xbf16>
    %25 = vector.shape_cast %24 : vector<1x4x128xbf16> to vector<4x128xbf16>
    %cst_17 = arith.constant dense<0.000000e+00> : vector<160x128xf32>
    %26 = tpu.matmul %23, %25, %cst_17 {dimension_numbers = #tpu.dot_dimension_numbers<[1], [0], [0], [1], [0, 0, 1, 1], [], []>} : vector<160x4xbf16>, vector<4x128xbf16>, vector<160x128xf32> -> vector<160x128xf32>
    %27 = arith.addf %22, %26 : vector<160x128xf32>
    %28 = vector.extract_strided_slice %1 {offsets = [22, 0], sizes = [160, 4], strides = [1, 1]} : vector<202x4xbf16> to vector<160x4xbf16>
    %c5 = arith.constant 5 : index
    %c0_18 = arith.constant 0 : index
    %c0_19 = arith.constant 0 : index
    %29 = vector.load %arg3[%c5, %c0_18, %c0_19] : memref<9x4x128xbf16, #tpu.memory_space<vmem>>, vector<1x4x128xbf16>
    %30 = vector.shape_cast %29 : vector<1x4x128xbf16> to vector<4x128xbf16>
    %cst_20 = arith.constant dense<0.000000e+00> : vector<160x128xf32>
    %31 = tpu.matmul %28, %30, %cst_20 {dimension_numbers = #tpu.dot_dimension_numbers<[1], [0], [0], [1], [0, 0, 1, 1], [], []>} : vector<160x4xbf16>, vector<4x128xbf16>, vector<160x128xf32> -> vector<160x128xf32>
    %32 = arith.addf %27, %31 : vector<160x128xf32>
    %33 = vector.extract_strided_slice %1 {offsets = [40, 0], sizes = [160, 4], strides = [1, 1]} : vector<202x4xbf16> to vector<160x4xbf16>
    %c6 = arith.constant 6 : index
    %c0_21 = arith.constant 0 : index
    %c0_22 = arith.constant 0 : index
    %34 = vector.load %arg3[%c6, %c0_21, %c0_22] : memref<9x4x128xbf16, #tpu.memory_space<vmem>>, vector<1x4x128xbf16>
    %35 = vector.shape_cast %34 : vector<1x4x128xbf16> to vector<4x128xbf16>
    %cst_23 = arith.constant dense<0.000000e+00> : vector<160x128xf32>
    %36 = tpu.matmul %33, %35, %cst_23 {dimension_numbers = #tpu.dot_dimension_numbers<[1], [0], [0], [1], [0, 0, 1, 1], [], []>} : vector<160x4xbf16>, vector<4x128xbf16>, vector<160x128xf32> -> vector<160x128xf32>
    %37 = arith.addf %32, %36 : vector<160x128xf32>
    %38 = vector.extract_strided_slice %1 {offsets = [41, 0], sizes = [160, 4], strides = [1, 1]} : vector<202x4xbf16> to vector<160x4xbf16>
    %c7 = arith.constant 7 : index
    %c0_24 = arith.constant 0 : index
    %c0_25 = arith.constant 0 : index
    %39 = vector.load %arg3[%c7, %c0_24, %c0_25] : memref<9x4x128xbf16, #tpu.memory_space<vmem>>, vector<1x4x128xbf16>
    %40 = vector.shape_cast %39 : vector<1x4x128xbf16> to vector<4x128xbf16>
    %cst_26 = arith.constant dense<0.000000e+00> : vector<160x128xf32>
    %41 = tpu.matmul %38, %40, %cst_26 {dimension_numbers = #tpu.dot_dimension_numbers<[1], [0], [0], [1], [0, 0, 1, 1], [], []>} : vector<160x4xbf16>, vector<4x128xbf16>, vector<160x128xf32> -> vector<160x128xf32>
    %42 = arith.addf %37, %41 : vector<160x128xf32>
    %43 = vector.extract_strided_slice %1 {offsets = [42, 0], sizes = [160, 4], strides = [1, 1]} : vector<202x4xbf16> to vector<160x4xbf16>
    %c8 = arith.constant 8 : index
    %c0_27 = arith.constant 0 : index
    %c0_28 = arith.constant 0 : index
    %44 = vector.load %arg3[%c8, %c0_27, %c0_28] : memref<9x4x128xbf16, #tpu.memory_space<vmem>>, vector<1x4x128xbf16>
    %45 = vector.shape_cast %44 : vector<1x4x128xbf16> to vector<4x128xbf16>
    %cst_29 = arith.constant dense<0.000000e+00> : vector<160x128xf32>
    %46 = tpu.matmul %43, %45, %cst_29 {dimension_numbers = #tpu.dot_dimension_numbers<[1], [0], [0], [1], [0, 0, 1, 1], [], []>} : vector<160x4xbf16>, vector<4x128xbf16>, vector<160x128xf32> -> vector<160x128xf32>
    %47 = arith.addf %42, %46 : vector<160x128xf32>
    %c0_30 = arith.constant 0 : index
    %c0_31 = arith.constant 0 : index
    %48 = vector.load %arg4[%c0_30, %c0_31] : memref<1x128xf32, #tpu.memory_space<vmem>>, vector<1x128xf32>
    %49 = vector.broadcast %48 : vector<1x128xf32> to vector<160x128xf32>
    %50 = arith.mulf %47, %49 : vector<160x128xf32>
    %c0_32 = arith.constant 0 : index
    %c0_33 = arith.constant 0 : index
    %51 = vector.load %arg5[%c0_32, %c0_33] : memref<1x128xf32, #tpu.memory_space<vmem>>, vector<1x128xf32>
    %52 = vector.broadcast %51 : vector<1x128xf32> to vector<160x128xf32>
    %53 = arith.addf %50, %52 : vector<160x128xf32>
    %cst_34 = arith.constant 0.000000e+00 : f32
    %54 = vector.broadcast %cst_34 : f32 to vector<160x128xf32>
    %55 = arith.maximumf %53, %54 : vector<160x128xf32>
    %c0_35 = arith.constant 0 : index
    %c0_36 = arith.constant 0 : index
    %56 = vector.load %arg6[%c0_35, %c0_36] : memref<160x128xf32, #tpu.memory_space<vmem>>, vector<160x128xf32>
    tpu.vector_store %arg6[%c0_35, %c0_36], %55 {strides = array<i32>} : memref<160x128xf32, #tpu.memory_space<vmem>>, vector<160x128xf32>,
    return
  }
  func.func @transform_0(%arg0: i32, %arg1: i32) -> (i32, i32, i32) {
    %c2_i32 = arith.constant 2 : i32
    %0 = arith.muli %arg0, %c2_i32 : i32
    %1 = arith.addi %0, %arg1 : i32
    %c0_i32 = arith.constant 0 : i32
    %c0_i32_0 = arith.constant 0 : i32
    %c0_i32_1 = arith.constant 0 : i32
    return %1, %c0_i32, %c0_i32_0 : i32, i32, i32
  }
  func.func @transform_1(%arg0: i32, %arg1: i32) -> (i32, i32, i32) {
    %c0_i32 = arith.constant 0 : i32
    %c0_i32_0 = arith.constant 0 : i32
    %c0_i32_1 = arith.constant 0 : i32
    %c0_i32_2 = arith.constant 0 : i32
    return %c0_i32, %c0_i32_0, %c0_i32_1 : i32, i32, i32
  }
  func.func @transform_2(%arg0: i32, %arg1: i32) -> (i32, i32) {
    %c0_i32 = arith.constant 0 : i32
    %c0_i32_0 = arith.constant 0 : i32
    %c0_i32_1 = arith.constant 0 : i32
    return %c0_i32, %c0_i32_0 : i32, i32
  }
  func.func @transform_3(%arg0: i32, %arg1: i32) -> (i32, i32) {
    %c0_i32 = arith.constant 0 : i32
    %c0_i32_0 = arith.constant 0 : i32
    %c0_i32_1 = arith.constant 0 : i32
    return %c0_i32, %c0_i32_0 : i32, i32
  }
  func.func @transform_4(%arg0: i32, %arg1: i32) -> (i32, i32) {
    %c2_i32 = arith.constant 2 : i32
    %0 = arith.muli %arg0, %c2_i32 : i32
    %1 = arith.addi %0, %arg1 : i32
    %c0_i32 = arith.constant 0 : i32
    %c0_i32_0 = arith.constant 0 : i32
    return %1, %c0_i32 : i32, i32
  }
}

</mosaic_0001>

<bundles_post_ra>
// kernel: conv_bnr.3
= control target key start
LH: loop header
LB: loop body
LE: loop exit
PB: predicated region body
PF: predicated region fallthrough
CT: control target
= control target key end

     0   :  { %s2847_s15 = smov 0   ;;  %s2849_s16 = smov 0   ;;  %s3924_s0 = inlined_call_operand.vmem [shape: bf16[4,202,4], index: 0, kind: input, shape index: {}]   ;;  %s3925_s1 = inlined_call_operand.vmem [shape: bf16[9,4,128], index: 1, kind: input, shape index: {}]   ;;  %s3926_s2 = inlined_call_operand.vmem [shape: f32[1,128], index: 2, kind: input, shape index: {}]   ;;  %s3927_s3 = inlined_call_operand.vmem [shape: f32[1,128], index: 3, kind: input, shape index: {}]   ;;  %s3928_s4 = inlined_call_operand.vmem [shape: f32[640,128], index: 4, kind: output, shape index: {}]  }
   0x1   :  { %s2851_s17 = smov 0   ;;  %s2853_s18 = smov 0  }
   0x2   :  { %s2855_s19 = smov 0  }
   0x3 LB: > { %s23_s20 = sadd.s32 1, %s2812_s17  ;;  %s26_s21 = sadd.s32 1, %s2816_s18  ;;  %s2820_s19 = sphi %s2855_s19, %s14_s19   ;;  %s2816_s18 = sphi %s2853_s18, %s3997_s18   ;;  %s2812_s17 = sphi %s2851_s17, %s3996_s17   ;;  %s2808_s16 = sphi %s2849_s16, %s3995_s16   ;;  %s2804_s15 = sphi %s2847_s15, %s3994_s15  }
   0x4   : > { %p24_p0 = scmp.ge.s32.totalorder %s23_s20, 2  ;;  %p2277_p1 = scmp.ge.s32.totalorder %s2820_s19, 1 }
   0x5   : > { %p186_p2 = scmp.lt.s32.totalorder %s2820_s19, 5 }
   0x6   : > { %s3999_s20 = smov (%p24_p0, %s23_s20), 0  ;;  %s4001_s21 = smov (!%p24_p0, %s26_s21), %s2816_s18 }
   0x7   : > { %p187_p3 = pnand %p2277_p1, %p186_p2  ;;  %p28_p4 = scmp.ge.s32.totalorder %s4001_s21, 2 }
   0x9   : > { %s4003_s21 = smov (%p28_p4, %s4001_s21), 0  ;;  %190 = sbr.rel (%p187_p3) target bundleno = 418 (0x1a2), region = 36 }
   0xe   : > { %v2282_v0 = vld [vmem:[%s3925_s1 + $0x2] sm:$0x3]  ;;  %vm434_vm0 = vcmask 1041408   ;;  %s2278_s24 = sshll.u32 %s2808_s16, 1  ;;  %v2314_v2 = vld [vmem:[%s3925_s1 + $0x4] sm:$0x3] }
   0xf   : > { %2707 = vmatprep.subr.msk.bf16.mxu0 %vm434_vm0, %v2282_v0  ;;  %2708 = vmatprep.subr.msk.bf16.mxu1 %vm434_vm0, %v2282_v0  ;;  %v436_v1 = vsel %vm434_vm0, %v2282_v0, 0  ;;  %s2883_s25 = sadd.s32 %s2804_s15, %s2278_s24  ;;  %v262_v3 = vld [vmem:[%s3925_s1] sm:$0x3]  ;;  %vm318_vm1 = vsmask.f32 7424  ;;  %vm403_vm2 = vcmask 31744  }
  0x10   : > { %2508 = vmatpush3.bf16.msra.mxu0 %v436_v1  ;;  %2706 = vmatpush3.bf16.msra.mxu1 %v436_v1  ;;  %p218_p5 = scmp.lt.s32.totalorder %s2883_s25, 3  ;;  %v742_v37 = vsel %vm434_vm0, %v2314_v2, 0  ;;  %v572_v38 = vsel %vm434_vm0, %v262_v3, 0  ;;  %v2338_v51 = vld [vmem:[%s3925_s1 + $0x8] sm:$0x3]  ;;  %vm689_vm3 = vcmask 1046528  }
  0x11   : > { %2710 = vmatprep.subr.msk.bf16.mxu0 %vm434_vm0, %v2314_v2  ;;  %2709 = vmatprep.subr.msk.bf16.mxu1 %vm434_vm0, %v262_v3  ;;  %v2325_v57 = vld [vmem:[%s3925_s1 + $0x6] sm:$0x3]  ;;  %vm885_vm4 = vcmask 1045504   ;;  %vm1075_vm5 = vsmask.f32 5376  ;;  %vm1297_vm6 = vcmask 1044480  }
  0x12   : > { %s219_s30 = scalar_select %p218_p5, %s2883_s25, 3 }
  0x13   : > { %s227_s27 = smul.u32 20, %s2883_s25 }
  0x14   : > { %s2717_s5 = smul.u32 104, %s219_s30 }
  0x15   : > { %p228_p6 = scmp.lt.s32.totalorder %s227_s27, 79 }
  0x16   : > { %s2898_s8 = scalar_lea.vmem %s3924_s0, %s2717_s5 }
  0x17   : > { %v2901_v4 = vld [vmem:[%s2898_s8] sm:$0xff]   ;;  %v2904_v5 = vld [vmem:[%s2898_s8 + $0x8] sm:$0xff]   ;;  %v2907_v6 = vld [vmem:[%s2898_s8 + $0x30] sm:$0xf]  ;;  %s4005_s27 = smov (!%p228_p6, %s227_s27), 79 }
  0x18   : > { %v249_v7 = vld [vmem:[%s2898_s8 + $0x34] sm:$0xf]  ;;  %v250_v8 = vld [vmem:[%s2898_s8 + $0x38] sm:$0xf]  ;;  %v320_v9 = vshrl.u32 %v2901_v4, 16  ;;  %v322_v10 = vshll.u32 %v2901_v4, 16 }
  0x19   : > { %v327_v11 = vshll.u32 %v2904_v5, 16  ;;  %v331_v12 = vshrl.u32 %v2904_v5, 16  ;;  %v2916_v13 = vld [vmem:[%s2898_s8 + $0x3c] sm:$0xf]  ;;  %v2919_v14 = vcombine.low %v2907_v6, %v249_v7  ;;  %v240_v16 = vld [vmem:[%s2898_s8 + $0x10] sm:$0xf]  ;;  %v2931_v19 = vcombine.low %v249_v7, %v250_v8 }
  0x1a   : > { %v2922_v15 = vcombine.low %v250_v8, %v2916_v13  ;;  %v2926_v17 = vld [vmem:[%s2898_s8 + $0x14] sm:$0xf]  ;;  %v2929_v18 = vld [vmem:[%s2898_s8 + $0x40] sm:$0xf]  ;;  %v324_v20 = vrot.slane %v322_v10, 1  ;;  %s2281_s5 = sshll.u32 %s4005_s27, 3 }
  0x1b   : > { %v329_v21 = vrot.slane %v327_v11, 1  ;;  %v2936_v22 = vcombine.low %v240_v16, %v2926_v17  ;;  %v2939_v23 = vld [vmem:[%s2898_s8 + $0x44] sm:$0xf]  ;;  %v367_v24 = vshll.u32 %v2919_v14, 16  ;;  %v371_v25 = vshrl.u32 %v2919_v14, 16 }
  0x1c   : > { %v375_v26 = vshll.u32 %v2922_v15, 16  ;;  %v379_v27 = vshrl.u32 %v2922_v15, 16  ;;  %v2946_v28 = vld [vmem:[%s2898_s8 + $0x18] sm:$0xf]  ;;  %v325_v29 = vor.u32 %v324_v20, %v320_v9  ;;  %v2953_v32 = vcombine.low %v2929_v18, %v2939_v23  ;;  %v2956_v33 = vld [vmem:[%s2898_s8 + $0x1c] sm:$0xf] }
  0x1d   : > { %v333_v30 = vor.u32 %v331_v12, %v329_v21  ;;  %v335_v31 = vshll.u32 %v2936_v22, 16  ;;  %v2959_v34 = vld [vmem:[%s2898_s8 + $0x48] sm:$0xf]  ;;  %v2963_v35 = vrot.slane %v367_v24, 1  ;;  %v2970_v39 = vld [vmem:[%s2898_s8 + $0x4c] sm:$0xf]  ;;  %v2978_v43 = vcombine.low %v2946_v28, %v2956_v33 }
  0x1e   : > { %v377_v36 = vrot.slane %v375_v26, 1  ;;  %v330_v40 = vsel %vm318_vm1, %v325_v29, %v329_v21  ;;  %v383_v42 = vshll.u32 %v2953_v32, 16  ;;  %v2981_v44 = vld [vmem:[%s2898_s8 + $0x20] sm:$0xf]  ;;  %v2984_v45 = vld [vmem:[%s2898_s8 + $0x24] sm:$0xf]  ;;  %v2995_v49 = vcombine.low %v2959_v34, %v2970_v39 }
  0x1f   : > { %v337_v41 = vrot.slane %v335_v31, 1  ;;  %2509 = vmatprep.mubr.msk.bf16.mxu0 %vm403_vm2, %v330_v40  ;;  %v373_v46 = vor.u32 %v371_v25, %v2963_v35  ;;  %v339_v48 = vshrl.u32 %v2936_v22, 16  ;;  %v2998_v50 = vld [vmem:[%s2898_s8 + $0x50] sm:$0xf]  ;;  %v343_v54 = vshll.u32 %v2978_v43, 16 }
  0x20   : > { %v381_v47 = vor.u32 %v379_v27, %v377_v36  ;;  %v385_v53 = vrot.slane %v383_v42, 1  ;;  %v387_v55 = vshrl.u32 %v2953_v32, 16  ;;  %v3009_v56 = vld [vmem:[%s2898_s8 + $0x54] sm:$0xf]  ;;  %v3934_v60 = vshll.u32 %v2995_v49, 16 }
  0x21   : > { %v338_v52 = vsel %vm318_vm1, %v333_v30, %v337_v41  ;;  %v378_v58 = vsel %vm318_vm1, %v373_v46, %v377_v36  ;;  %v341_v59 = vor.u32 %v339_v48, %v337_v41  ;;  %v3021_v61 = vcombine.low %v2981_v44, %v2984_v45  ;;  %v3024_v62 = vld [vmem:[%s2898_s8 + $0x28] sm:$0xf]  ;;  %v3027_v63 = vld [vmem:[%s2898_s8 + $0x2c] sm:$0xf] }
  0x22   : > { %2510 = vmatmul.mubr.msk.bf16.vlgmr.msra.gmra.mxu0 %vm403_vm2, %v338_v52  ;;  %2521 = vmatprep.mubr.msk.bf16.mxu1 %vm403_vm2, %v378_v58  ;;  %v386_v0 = vsel %vm318_vm1, %v381_v47, %v385_v53  ;;  %v345_v1 = vrot.slane %v343_v54, 1  ;;  %v389_v2 = vor.u32 %v387_v55, %v385_v53  ;;  %v393_v3 = vrot.slane %v3934_v60, 1 }
  0x23   : > { %2552 = vmatpush3.bf16.msra.mxu0 %v742_v37  ;;  %2522 = vmatmul.mubr.msk.bf16.vlgmr.msra.gmra.mxu1 %vm403_vm2, %v386_v0  ;;  %v347_v7 = vshrl.u32 %v2978_v43, 16  ;;  %v3932_v8 = vshll.u32 %v3021_v61, 16  ;;  %v3042_v9 = vcombine.low %v2998_v50, %v2998_v50  ;;  %v3935_v16 = vshrl.u32 %v2995_v49, 16 }
  0x24   : > { %2712 = vmatprep.subr.msk.bf16.mxu0 %vm434_vm0, %v2338_v51  ;;  %2530 = vmatpush3.bf16.msra.mxu1 %v572_v38  ;;  %v346_v10 = vsel %vm318_vm1, %v341_v59, %v345_v1  ;;  %v3049_v20 = vcombine.low %v2998_v50, %v3009_v56  ;;  %v3053_v21 = vcombine.low %v3024_v62, %v3027_v63  ;;  %v355_v40 = vshrl.u32 %v3021_v61, 16 }
  0x25   : > { %2513 = vmatprep.mubr.msk.bf16.mxu0 %vm403_vm2, %v346_v10  ;;  %v394_v29 = vsel %vm318_vm1, %v389_v2, %v393_v3  ;;  %v349_v30 = vor.u32 %v347_v7, %v345_v1  ;;  %v353_v36 = vrot.slane %v3932_v8, 1  ;;  %2711 = vmatprep.subr.msk.bf16.mxu1 %vm434_vm0, %v2325_v57  ;;  %v397_v37 = vor.u32 %v3935_v16, %v393_v3 }
  0x26   : > { %2525 = vmatprep.mubr.msk.bf16.mxu1 %vm403_vm2, %v394_v29  ;;  %v399_v38 = vshll.u32 %v3042_v9, 16  ;;  %v3929_v41 = vshll.u32 %v3053_v21, 16  ;;  %v3930_v47 = vshrl.u32 %v3053_v21, 16  ;;  %v938_v2 = vsel %vm434_vm0, %v2325_v57, 0 }
  0x27   : > { %v354_v46 = vsel %vm318_vm1, %v349_v30, %v353_v36  ;;  %v357_v53 = vor.u32 %v355_v40, %v353_v36  ;;  %v690_v3 = vrot.slane %v2901_v4, 1  ;;  %v691_v10 = vrot.slane %v2904_v5, 1 }
  0x28   : > { %v401_v52 = vrot.slane %v399_v38, 1  ;;  %v361_v58 = vrot.slane %v3929_v41, 1  ;;  %v3084_v29 = vrot.slane %v327_v11, 3  ;;  %v1095_v30 = vrot.slane %v371_v25, 2 }
  0x29   : > { %v693_v36 = vrot.slane %v2936_v22, 1  ;;  %v1100_v57 = vrot.slane %v375_v26, 3  ;;  %v695_v38 = vrot.slane %v2978_v43, 1  ;;  %v699_v11 = vrot.slane %v3053_v21, 1 }
  0x2a   : > { %2514 = vmatmul.mubr.msk.bf16.gmra.mxu0 %vm403_vm2, %v354_v46  ;;  %v402_v59 = vsel %vm318_vm1, %v397_v37, %v401_v52  ;;  %v362_v0 = vsel %vm318_vm1, %v357_v53, %v361_v58  ;;  %v365_v1 = vor.u32 %v3930_v47, %v361_v58  ;;  %v3092_v37 = vsel %vm434_vm0, %v2338_v51, 0 }
  0x2b   : > { %2526 = vmatmul.mubr.msk.bf16.gmra.mxu1 %vm403_vm2, %v402_v59  ;;  %2517 = vmatprep.mubr.msk.bf16.mxu0 %vm403_vm2, %v362_v0  ;;  %v697_v46 = vrot.slane %v3021_v61, 1  ;;  %v701_v52 = vrot.slane %v2919_v14, 1  ;;  %v705_v53 = vrot.slane %v2953_v32, 1  ;;  %v3106_v51 = vrot.slane %v343_v54, 3 }
  0x2c   : > { %2531 = vmatprep.mubr.msk.bf16.mxu1 %vm403_vm2, %v2901_v4  ;;  %v370_v25 = vsel %vm318_vm1, %v365_v1, %v2963_v35  ;;  %v703_v4 = vrot.slane %v2922_v15, 1  ;;  %v3108_v26 = vrot.slane %v347_v7, 2  ;;  %v692_v58 = vsel %vm689_vm3, %v690_v3, %v691_v10 }
  0x2d   : > { %v707_v59 = vrot.slane %v2995_v49, 1  ;;  %v694_v0 = vsel %vm689_vm3, %v691_v10, %v693_v36  ;;  %v886_v35 = vrot.slane %v2904_v5, 2  ;;  %v3931_v1 = vrot.slane %v2936_v22, 2 }
  0x2e   : > { %v709_v41 = vrot.slane %v3042_v9, 1  ;;  %v696_v47 = vsel %vm689_vm3, %v693_v36, %v695_v38  ;;  %v3119_v54 = vsel %vm689_vm3, %v695_v38, %v697_v46  ;;  %v3122_v7 = vsel %vm689_vm3, %v697_v46, %v699_v11  ;;  %v3138_v36 = vld [vmem:[%s3925_s1 + $0xa] sm:$0x3] }
  0x2f   : > { %v3933_v3 = vrot.slane %v2919_v14, 2  ;;  %v3127_v10 = vsel %vm689_vm3, %v699_v11, %v701_v52  ;;  %v3130_v9 = vsel %vm689_vm3, %v701_v52, %v703_v4  ;;  %v3142_v38 = vrot.slane %v331_v12, 2 }
  0x30   : > { %v3147_v46 = vsel %vm689_vm3, %v705_v53, %v707_v59  ;;  %v1079_v11 = vrot.slane %v339_v48, 2  ;;  %v1080_v52 = vrot.slane %v335_v31, 3  ;;  %v3159_v12 = vsel %vm885_vm4, %v886_v35, %v3931_v1 }
  0x31   : > { %v899_v48 = vrot.slane %v2953_v32, 2  ;;  %v1096_v35 = vrot.slane %v367_v24, 3  ;;  %v1099_v31 = vrot.slane %v379_v27, 2  ;;  %v903_v8 = vrot.slane %v3049_v20, 2 }
  0x32   : > { %2518 = vmatmul.mubr.msk.bf16.gmra.mxu0 %vm403_vm2, %v370_v25  ;;  %v3133_v25 = vsel %vm689_vm3, %v703_v4, %v705_v53  ;;  %v897_v4 = vrot.slane %v2922_v15, 2  ;;  %v3162_v53 = vsel %vm689_vm3, %v707_v59, %v709_v41  ;;  %v901_v41 = vrot.slane %v2995_v49, 2  ;;  %v3178_v59 = vld [vmem:[%s2898_s8 + $0x58] sm:$0xf] }
  0x33   : > { %2553 = vmatprep.mubr.msk.bf16.mxu0 %vm403_vm2, %v692_v58  ;;  %2532 = vmatmul.mubr.msk.bf16.vlgmr.msra.gmra.mxu1 %vm403_vm2, %v2904_v5  ;;  %v3190_v60 = vor.u32 %v1096_v35, %v1095_v30  ;;  %v1103_v16 = vrot.slane %v387_v55, 2  ;;  %v1101_v1 = vor.u32 %v1100_v57, %v1099_v31  ;;  %v3209_v30 = vcombine.low %v3178_v59, %v3178_v59 }
  0x34   : > { %2574 = vmatpush3.bf16.msra.mxu1 %v938_v2  ;;  %2535 = vmatprep.mubr.msk.bf16.mxu1 %vm403_vm2, %v2936_v22  ;;  %v3172_v2 = vsel %vm885_vm4, %v3933_v3, %v897_v4  ;;  %v3183_v58 = vsel %vm885_vm4, %v897_v4, %v899_v48  ;;  %v3188_v3 = vor.u32 %v1080_v52, %v1079_v11  ;;  %v3200_v4 = vld [vmem:[%s3925_s1 + $0xc] sm:$0x3]  ;;  %v1104_v11 = vrot.slane %v383_v42, 3 }
  0x35   : > { %2713 = vmatprep.subr.msk.bf16.mxu1 %vm434_vm0, %v3138_v36  ;;  %3936 = vst [vmem:[#allocation2_spill] sm:$0xff] %v3183_v58  ;;  %v3193_v24 = vsel %vm885_vm4, %v899_v48, %v901_v41  ;;  %v3203_v27 = vsel %vm885_vm4, %v901_v41, %v903_v8  ;;  %v3214_v55 = vrot.slane %v355_v40, 2  ;;  %v3939_v52 = vshrl.u32 %v2995_v49, 16 }
  0x36   : > { %3937 = vst [vmem:[#allocation3_spill] sm:$0xff] %v3193_v24  ;;  %3938 = vst [vmem:[#allocation4_spill] sm:$0xff] %v3203_v27  ;;  %v3940_v57 = vshll.u32 %v2995_v49, 16  ;;  %v1112_v35 = vshrl.u32 %v3049_v20, 16  ;;  %v3225_v42 = vsel %vm1075_vm5, %v3190_v60, %v1101_v1  ;;  %v905_v40 = vrot.slane %v3209_v30, 2 }
  0x37   : > { %v1107_v48 = vrot.slane %v3939_v52, 2  ;;  %3941 = vst [vmem:[#allocation5_spill] sm:$0xff] %v3225_v42  ;;  %v1115_v41 = vshll.u32 %v3049_v20, 16  ;;  %v1121_v24 = vshrl.u32 %v3209_v30, 16 }
  0x38   : > { %v1108_v31 = vrot.slane %v3940_v57, 3  ;;  %v1114_v57 = vrot.slane %v1112_v35, 2 }
  0x39   : > { %v1117_v27 = vrot.slane %v1115_v41, 3  ;;  %v1123_v58 = vrot.slane %v1121_v24, 2 }
  0x3a   : > { %2554 = vmatmul.mubr.msk.bf16.vlgmr.msra.gmra.mxu0 %vm403_vm2, %v694_v0  ;;  %v1105_v0 = vor.u32 %v1104_v11, %v1103_v16  ;;  %v1109_v52 = vor.u32 %v1108_v31, %v1107_v48  ;;  %v3241_v11 = vsel %vm885_vm4, %v903_v8, %v905_v40  ;;  %v1301_v31 = vrot.slane %v2978_v43, 3 }
  0x3b   : > { %2596 = vmatpush3.bf16.msra.mxu0 %v3092_v37  ;;  %2557 = vmatprep.mubr.msk.bf16.mxu0 %vm403_vm2, %v696_v47  ;;  %v1298_v37 = vrot.slane %v2904_v5, 3  ;;  %v1299_v47 = vrot.slane %v2936_v22, 3  ;;  %v1124_v5 = vshll.u32 %v3209_v30, 16  ;;  %v1118_v35 = vor.u32 %v1117_v27, %v1114_v57 }
  0x3c   : > { %2536 = vmatmul.mubr.msk.bf16.gmra.mxu1 %vm403_vm2, %v2978_v43  ;;  %2714 = vmatprep.subr.msk.bf16.mxu0 %vm434_vm0, %v3200_v4  ;;  %v3238_v16 = vsel %vm1075_vm5, %v1101_v1, %v1105_v0  ;;  %v3245_v42 = vsel %vm1075_vm5, %v1105_v0, %v1109_v52  ;;  %v1303_v1 = vrot.slane %v3021_v61, 3  ;;  %v3255_v8 = vcombine.low %v2926_v17, %v2946_v28 }
  0x3d   : > { %2539 = vmatprep.mubr.msk.bf16.mxu1 %vm403_vm2, %v3021_v61  ;;  %v3248_v48 = vsel %vm1297_vm6, %v1298_v37, %v1299_v47  ;;  %v1126_v40 = vrot.slane %v1124_v5, 3  ;;  %v3258_v41 = vsel %vm1297_vm6, %v1299_v47, %v1301_v31  ;;  %v1305_v0 = vrot.slane %v3053_v21, 3 }
  0x3e   : > { %3942 = vst [vmem:[#allocation6_spill] sm:$0xff] %v3248_v48  ;;  %v3263_v37 = vcombine.low %v2956_v33, %v2981_v44  ;;  %v3266_v48 = vsel %vm1075_vm5, %v1109_v52, %v1118_v35  ;;  %v3269_v24 = vsel %vm1297_vm6, %v1301_v31, %v1303_v1  ;;  %v1307_v27 = vrot.slane %v2919_v14, 3 }
  0x3f   : > { %v3274_v17 = vcombine.low %v2984_v45, %v3024_v62  ;;  %v1127_v28 = vor.u32 %v1126_v40, %v1123_v58  ;;  %v3279_v57 = vsel %vm1297_vm6, %v1303_v1, %v1305_v0  ;;  %v1309_v33 = vrot.slane %v2922_v15, 3 }
  0x40   : > { %v3284_v44 = vcombine.low %v3027_v63, %v2907_v6  ;;  %v3289_v52 = vsel %vm1297_vm6, %v1305_v0, %v1307_v27  ;;  %v1311_v45 = vrot.slane %v2953_v32, 3  ;;  %v1313_v62 = vrot.slane %v2995_v49, 3 }
  0x41   : > { %v3300_v6 = vsel %vm1075_vm5, %v1118_v35, %v1127_v28  ;;  %v3303_v63 = vsel %vm1297_vm6, %v1307_v27, %v1309_v33  ;;  %v3308_v58 = vcombine.low %v2939_v23, %v2959_v34  ;;  %v1317_v47 = vrot.slane %v3209_v30, 3 }
  0x42   : > { %2558 = vmatmul.mubr.msk.bf16.gmra.mxu0 %vm403_vm2, %v3119_v54  ;;  %v3295_v54 = vcombine.low %v2916_v13, %v2929_v18  ;;  %v3313_v13 = vsel %vm1297_vm6, %v1309_v33, %v1311_v45  ;;  %v3316_v18 = vsel %vm1297_vm6, %v1311_v45, %v1313_v62  ;;  %v3321_v5 = vcombine.low %v2970_v39, %v2998_v50 }
  0x43   : > { %2561 = vmatprep.mubr.msk.bf16.mxu0 %vm403_vm2, %v3122_v7  ;;  %v1315_v7 = vrot.slane %v3049_v20, 3  ;;  %v3328_v23 = vcombine.low %v3009_v56, %v3178_v59  ;;  %v1672_v34 = vshrl.u32 %v3255_v8, 16  ;;  %v1674_v31 = vshll.u32 %v3255_v8, 16 }
  0x44   : > { %2540 = vmatmul.mubr.msk.bf16.gmra.mxu1 %vm403_vm2, %v3053_v21  ;;  %v1678_v30 = vshll.u32 %v3263_v37, 16  ;;  %v1682_v1 = vshrl.u32 %v3263_v37, 16  ;;  %v1685_v39 = vshll.u32 %v3274_v17, 16  ;;  %v1689_v40 = vshrl.u32 %v3274_v17, 16 }
  0x45   : > { %2543 = vmatprep.mubr.msk.bf16.mxu1 %vm403_vm2, %v2919_v14  ;;  %v3324_v20 = vsel %vm1297_vm6, %v1313_v62, %v1315_v7  ;;  %v3333_v35 = vsel %vm1297_vm6, %v1315_v7, %v1317_v47  ;;  %v1676_v50 = vrot.slane %v1674_v31, 1  ;;  %v1692_v0 = vshll.u32 %v3284_v44, 16 }
  0x46   : > { %3943 = vst [vmem:[#allocation7_spill] sm:$0xff] %v3333_v35  ;;  %v1914_v56 = vrot.slane %v3255_v8, 1  ;;  %v1680_v59 = vrot.slane %v1678_v30, 1  ;;  %v1687_v27 = vrot.slane %v1685_v39, 1  ;;  %v1915_v28 = vrot.slane %v3263_v37, 1 }
  0x47   : > { %v1696_v33 = vshrl.u32 %v3284_v44, 16  ;;  %v1677_v45 = vor.u32 %v1676_v50, %v1672_v34  ;;  %v1694_v62 = vrot.slane %v1692_v0, 1  ;;  %v1699_v7 = vshll.u32 %v2931_v19, 16 }
  0x48   : > { %v1917_v47 = vrot.slane %v3274_v17, 1  ;;  %v1684_v31 = vor.u32 %v1682_v1, %v1680_v59  ;;  %v1691_v35 = vor.u32 %v1689_v40, %v1687_v27  ;;  %v3350_v30 = vsel %vm689_vm3, %v1914_v56, %v1915_v28 }
  0x49   : > { %v1703_v39 = vshrl.u32 %v2931_v19, 16  ;;  %v1698_v34 = vor.u32 %v1696_v33, %v1694_v62  ;;  %v1701_v50 = vrot.slane %v1699_v7, 1  ;;  %v1919_v40 = vrot.slane %v3284_v44, 1 }
  0x4a   : > { %2562 = vmatmul.mubr.msk.bf16.gmra.mxu0 %vm403_vm2, %v3127_v10  ;;  %v3356_v10 = vsel %vm318_vm1, %v1677_v45, %v1680_v59  ;;  %v3359_v0 = vsel %vm689_vm3, %v1915_v28, %v1917_v47  ;;  %v3367_v1 = vsel %vm318_vm1, %v1691_v35, %v1694_v62  ;;  %v1710_v28 = vshrl.u32 %v3295_v54, 16 }
  0x4b   : > { %2565 = vmatprep.mubr.msk.bf16.mxu0 %vm403_vm2, %v3130_v9  ;;  %3944 = vst [vmem:[#allocation8_spill] sm:$0xff] %v3359_v0  ;;  %v3364_v9 = vsel %vm318_vm1, %v1684_v31, %v1687_v27  ;;  %3946 = vst [vmem:[#allocation10_spill] sm:$0xff] %v3367_v1  ;;  %v3372_v56 = vsel %vm318_vm1, %v1698_v34, %v1701_v50  ;;  %v1705_v59 = vor.u32 %v1703_v39, %v1701_v50  ;;  %v3385_v34 = vld [vmem:[%s2898_s8 + $0x5c] sm:$0xff]  }
  0x4c   : > { %2544 = vmatmul.mubr.msk.bf16.gmra.mxu1 %vm403_vm2, %v2922_v15  ;;  %3945 = vst [vmem:[#allocation9_spill] sm:$0xff] %v3364_v9  ;;  %v1706_v15 = vshll.u32 %v3295_v54, 16  ;;  %3947 = vst [vmem:[#allocation11_spill] sm:$0xff] %v3372_v56  ;;  %v3377_v27 = vsel %vm689_vm3, %v1917_v47, %v1919_v40  ;;  %v1921_v35 = vrot.slane %v2931_v19, 1  ;;  %v1717_v45 = vshrl.u32 %v3308_v58, 16 }
  0x4d   : > { %2547 = vmatprep.mubr.msk.bf16.mxu1 %vm403_vm2, %v2953_v32  ;;  %v1713_v32 = vshll.u32 %v3308_v58, 16  ;;  %3948 = vst [vmem:[#allocation12_spill] sm:$0xff] %v3377_v27  ;;  %v1720_v7 = vshll.u32 %v3321_v5, 16  ;;  %v1923_v31 = vrot.slane %v3295_v54, 1  ;;  %v1724_v39 = vshrl.u32 %v3321_v5, 16 }
  0x4e   : > { %v1708_v33 = vrot.slane %v1706_v15, 1  ;;  %v3391_v47 = vsel %vm689_vm3, %v1919_v40, %v1921_v35  ;;  %v1727_v56 = vshll.u32 %v3328_v23, 16  ;;  %v2781_v27 = vld [vmem:[%s2898_s8 + $0x64] ss:$0 sps:$4 sm:$0x11]   ;;  %v1925_v9 = vrot.slane %v3308_v58, 1  ;;  %s3810_s8 = scalar_lea.vmem %s3928_s4, %s2281_s5 }
  0x4f   : > { %v1715_v62 = vrot.slane %v1713_v32, 1  ;;  %v1722_v0 = vrot.slane %v1720_v7, 1  ;;  %v3398_v1 = vsel %vm689_vm3, %v1921_v35, %v1923_v31  ;;  %v1738_v7 = vshrl.u32 %v3385_v34, 16 }
  0x50   : > { %v3388_v50 = vsel %vm318_vm1, %v1705_v59, %v1708_v33  ;;  %v1712_v15 = vor.u32 %v1710_v28, %v1708_v33  ;;  %v1729_v40 = vrot.slane %v1727_v56, 1  ;;  %v1731_v28 = vshrl.u32 %v3328_v23, 16 }
  0x51   : > { %v1719_v32 = vor.u32 %v1717_v45, %v1715_v62  ;;  %v1734_v33 = vshll.u32 %v3385_v34, 16  ;;  %v1726_v35 = vor.u32 %v1724_v39, %v1722_v0  ;;  %v3414_v45 = vsel %vm689_vm3, %v1923_v31, %v1925_v9 }
  0x52   : > { %2566 = vmatmul.mubr.msk.bf16.gmra.mxu0 %vm403_vm2, %v3133_v25  ;;  %v3404_v59 = vsel %vm318_vm1, %v1712_v15, %v1715_v62  ;;  %v1733_v56 = vor.u32 %v1731_v28, %v1729_v40  ;;  %v1742_v15 = vshll.u32 %v2781_v27, 16  ;;  %v1931_v31 = vrot.slane %v3385_v34, 1 }
  0x53   : > { %2569 = vmatprep.mubr.msk.bf16.mxu0 %vm403_vm2, %v3147_v46  ;;  %3949 = vst [vmem:[#allocation13_spill] sm:$0xff] %v3404_v59  ;;  %v3411_v25 = vsel %vm318_vm1, %v1719_v32, %v1722_v0  ;;  %v1927_v46 = vrot.slane %v3321_v5, 1  ;;  %v1736_v62 = vrot.slane %v1734_v33, 1  ;;  %v3421_v59 = vsel %vm318_vm1, %v1726_v35, %v1729_v40 }
  0x54   : > { %2548 = vmatmul.mubr.msk.bf16.gmra.mxu1 %vm403_vm2, %v2995_v49  ;;  %3950 = vst [vmem:[#allocation14_spill] sm:$0xff] %v3421_v59  ;;  %v1929_v0 = vrot.slane %v3328_v23, 1  ;;  %v1933_v28 = vrot.slane %v2781_v27, 1  ;;  %v3952_v33 = vor.u32 %v3084_v29, %v3142_v38  ;;  %v3953_v35 = vshll.u32 %v3021_v61, 16 }
  0x55   : > { %2575 = vmatprep.mubr.msk.bf16.mxu1 %vm403_vm2, %v3159_v12  ;;  %v3424_v49 = vsel %vm689_vm3, %v1925_v9, %v1927_v46  ;;  %v3429_v39 = vsel %vm318_vm1, %v1733_v56, %v1736_v62  ;;  %v1740_v32 = vor.u32 %v1738_v7, %v1736_v62  ;;  %v1744_v12 = vrot.slane %v1742_v15, 1 }
  0x56   : > { %3951 = vst [vmem:[#allocation15_spill] sm:$0xff] %v3424_v49  ;;  %v1082_v40 = vsel %vm1075_vm5, %v3952_v33, %v3188_v3  ;;  %v1088_v9 = vrot.slane %v3953_v35, 3  ;;  %v3439_v59 = vsel %vm689_vm3, %v1927_v46, %v1929_v0  ;;  %v3442_v49 = vsel %vm689_vm3, %v1929_v0, %v1931_v31  ;;  %v2393_v35 = vld [vmem:[%s3925_s1 + $0x10] sm:$0x3] }
  0x57   : > { %v3954_v56 = vrot.slane %v2978_v43, 2  ;;  %v3955_v62 = vrot.slane %v2936_v22, 2  ;;  %v3450_v7 = vsel %vm318_vm1, %v1740_v32, %v1744_v12  ;;  %v3453_v29 = vsel %vm689_vm3, %v1931_v31, %v1933_v28  ;;  %v2381_v31 = vld [vmem:[%s3925_s1 + $0xe] sm:$0x3] }
  0x58   : > { %v1350_v38 = vsel %vm434_vm0, %v3138_v36, 0  ;;  %v3956_v46 = vrot.slane %v3021_v61, 2  ;;  %v1085_v0 = vor.u32 %v3106_v51, %v3108_v26  ;;  %v893_v43 = vrot.slane %v3053_v21, 2 }
  0x59   : > { %v890_v27 = vsel %vm885_vm4, %v3955_v62, %v3954_v56  ;;  %v3957_v15 = vmov %v3954_v56  ;;  %v3958_v51 = vshrl.u32 %v3053_v21, 16  ;;  %v3959_v32 = vshll.u32 %v3053_v21, 16  ;;  %v3963_v56 = vld [vmem:[#allocation5_spill] sm:$0xff]  ;;  %v3964_v62 = vld [vmem:[#allocation3_spill] sm:$0xff] }
  0x5a   : > { %2570 = vmatmul.mubr.msk.bf16.gmra.mxu0 %vm403_vm2, %v3162_v53  ;;  %v892_v22 = vsel %vm885_vm4, %v3957_v15, %v3956_v46  ;;  %v1089_v53 = vor.u32 %v1088_v9, %v3214_v55  ;;  %v1086_v36 = vsel %vm1075_vm5, %v3188_v3, %v1085_v0  ;;  %v1532_v28 = vsel %vm434_vm0, %v3200_v4, 0 }
  0x5b   : > { %2597 = vmatprep.mubr.msk.bf16.mxu0 %vm403_vm2, %v1082_v40  ;;  %v1091_v26 = vrot.slane %v3958_v51, 2  ;;  %v1092_v12 = vrot.slane %v3959_v32, 3  ;;  %v3960_v33 = vmov %v3956_v46  ;;  %v3961_v3 = vrot.slane %v2919_v14, 2  ;;  %v3962_v14 = vld [vmem:[#allocation2_spill] sm:$0xff] }
  0x5c   : > { %2576 = vmatmul.mubr.msk.bf16.vlgmr.msra.gmra.mxu1 %vm403_vm2, %v890_v27  ;;  %v1090_v55 = vsel %vm1075_vm5, %v1085_v0, %v1089_v53  ;;  %v894_v40 = vsel %vm885_vm4, %v3960_v33, %v893_v43 }
  0x5d   : > { %2618 = vmatpush3.bf16.msra.mxu1 %v1350_v38  ;;  %2579 = vmatprep.mubr.msk.bf16.mxu1 %vm403_vm2, %v892_v22  ;;  %v896_v21 = vsel %vm885_vm4, %v893_v43, %v3961_v3  ;;  %v1093_v4 = vor.u32 %v1092_v12, %v1091_v26 }
  0x5e   : > { %2715 = vmatprep.subr.msk.bf16.mxu1 %vm434_vm0, %v2381_v31 }
  0x5f   : > { %v1094_v61 = vsel %vm1075_vm5, %v1089_v53, %v1093_v4  ;;  %v1098_v9 = vsel %vm1075_vm5, %v1093_v4, %v3190_v60  ;;  %v3965_v60 = vld [vmem:[#allocation4_spill] sm:$0xff] }
  0x62   : > { %2598 = vmatmul.mubr.msk.bf16.vlgmr.msra.gmra.mxu0 %vm403_vm2, %v1086_v36 }
  0x63   : > { %2640 = vmatpush3.bf16.msra.mxu0 %v1532_v28  ;;  %2601 = vmatprep.mubr.msk.bf16.mxu0 %vm403_vm2, %v1090_v55 }
  0x64   : > { %2580 = vmatmul.mubr.msk.bf16.gmra.mxu1 %vm403_vm2, %v894_v40  ;;  %2716 = vmatprep.subr.msk.bf16.mxu0 %vm434_vm0, %v2393_v35 }
  0x65   : > { %2583 = vmatprep.mubr.msk.bf16.mxu1 %vm403_vm2, %v896_v21 }
  0x6a   : > { %2602 = vmatmul.mubr.msk.bf16.gmra.mxu0 %vm403_vm2, %v1094_v61 }
  0x6b   : > { %2605 = vmatprep.mubr.msk.bf16.mxu0 %vm403_vm2, %v1098_v9 }
  0x6c   : > { %2584 = vmatmul.mubr.msk.bf16.gmra.mxu1 %vm403_vm2, %v3172_v2  ;;  %v3966_v2 = vld [vmem:[#allocation6_spill] sm:$0xff] }
  0x6d   : > { %2587 = vmatprep.mubr.msk.bf16.mxu1 %vm403_vm2, %v3962_v14 }
  0x72   : > { %2606 = vmatmul.mubr.msk.bf16.gmra.mxu0 %vm403_vm2, %v3963_v56 }
  0x73   : > { %2609 = vmatprep.mubr.msk.bf16.mxu0 %vm403_vm2, %v3238_v16  ;;  %v1777_v16 = vsel %vm434_vm0, %v2381_v31, 0 }
  0x74   : > { %2588 = vmatmul.mubr.msk.bf16.gmra.mxu1 %vm403_vm2, %v3964_v62 }
  0x75   : > { %2591 = vmatprep.mubr.msk.bf16.mxu1 %vm403_vm2, %v3965_v60 }
  0x7a   : > { %2610 = vmatmul.mubr.msk.bf16.gmra.mxu0 %vm403_vm2, %v3245_v42  ;;  %v1966_v42 = vsel %vm434_vm0, %v2393_v35, 0 }
  0x7b   : > { %2613 = vmatprep.mubr.msk.bf16.mxu0 %vm403_vm2, %v3266_v48  ;;  %v3969_v48 = vld [vmem:[#allocation10_spill] sm:$0xff] }
  0x7c   : > { %2592 = vmatmul.mubr.msk.bf16.gmra.mxu1 %vm403_vm2, %v3241_v11  ;;  %v3968_v11 = vld [vmem:[#allocation9_spill] sm:$0xff] }
  0x7d   : > { %2619 = vmatprep.mubr.msk.bf16.mxu1 %vm403_vm2, %v3966_v2 }
  0x82   : > { %2614 = vmatmul.mubr.msk.bf16.gmra.mxu0 %vm403_vm2, %v3300_v6 }
  0x83   : > { %2641 = vmatprep.mubr.msk.bf16.mxu0 %vm403_vm2, %v3255_v8  ;;  %v3970_v8 = vld [vmem:[#allocation8_spill] sm:$0xff] }
  0x84   : > { %2620 = vmatmul.mubr.msk.bf16.vlgmr.msra.gmra.mxu1 %vm403_vm2, %v3258_v41  ;;  %v3971_v41 = vld [vmem:[#allocation12_spill] sm:$0xff] }
  0x85   : > { %2662 = vmatpush3.bf16.msra.mxu1 %v1777_v16  ;;  %2623 = vmatprep.mubr.msk.bf16.mxu1 %vm403_vm2, %v3269_v24  ;;  %v3973_v24 = vld [vmem:[#allocation13_spill] sm:$0xff] }
  0x8a   : > { %2642 = vmatmul.mubr.msk.bf16.vlgmr.msra.gmra.mxu0 %vm403_vm2, %v3263_v37  ;;  %v3972_v37 = vld [vmem:[#allocation11_spill] sm:$0xff] }
  0x8b   : > { %2684 = vmatpush3.bf16.msra.mxu0 %v1966_v42  ;;  %2645 = vmatprep.mubr.msk.bf16.mxu0 %vm403_vm2, %v3274_v17  ;;  %v3974_v17 = vld [vmem:[#allocation15_spill] sm:$0xff] }
  0x8c   : > { %2624 = vmatmul.mubr.msk.bf16.gmra.mxu1 %vm403_vm2, %v3279_v57  ;;  %v3975_v57 = vld [vmem:[#allocation14_spill] sm:$0xff] }
  0x8d   : > { %2627 = vmatprep.mubr.msk.bf16.mxu1 %vm403_vm2, %v3289_v52 }
  0x92   : > { %2646 = vmatmul.mubr.msk.bf16.gmra.mxu0 %vm403_vm2, %v3284_v44 }
  0x93   : > { %2649 = vmatprep.mubr.msk.bf16.mxu0 %vm403_vm2, %v2931_v19  ;;  %v3967_v19 = vld [vmem:[#allocation7_spill] sm:$0xff] }
  0x94   : > { %2628 = vmatmul.mubr.msk.bf16.gmra.mxu1 %vm403_vm2, %v3303_v63 }
  0x95   : > { %2631 = vmatprep.mubr.msk.bf16.mxu1 %vm403_vm2, %v3313_v13 }
  0x9a   : > { %2650 = vmatmul.mubr.msk.bf16.gmra.mxu0 %vm403_vm2, %v3295_v54 }
  0x9b   : > { %2653 = vmatprep.mubr.msk.bf16.mxu0 %vm403_vm2, %v3308_v58 }
  0x9c   : > { %2632 = vmatmul.mubr.msk.bf16.gmra.mxu1 %vm403_vm2, %v3316_v18 }
  0x9d   : > { %2635 = vmatprep.mubr.msk.bf16.mxu1 %vm403_vm2, %v3324_v20 }
  0xa2   : > { %2654 = vmatmul.mubr.msk.bf16.gmra.mxu0 %vm403_vm2, %v3321_v5 }
  0xa3   : > { %2657 = vmatprep.mubr.msk.bf16.mxu0 %vm403_vm2, %v3328_v23 }
  0xa4   : > { %2636 = vmatmul.mubr.msk.bf16.gmra.mxu1 %vm403_vm2, %v3967_v19 }
  0xa5   : > { %2663 = vmatprep.mubr.msk.bf16.mxu1 %vm403_vm2, %v3356_v10 }
  0xaa   : > { %2658 = vmatmul.mubr.msk.bf16.gmra.mxu0 %vm403_vm2, %v3385_v34 }
  0xab   : > { %2685 = vmatprep.mubr.msk.bf16.mxu0 %vm403_vm2, %v3350_v30 }
  0xac   : > { %2664 = vmatmul.mubr.msk.bf16.vlgmr.msra.gmra.mxu1 %vm403_vm2, %v3968_v11 }
  0xad   : > { %2667 = vmatprep.mubr.msk.bf16.mxu1 %vm403_vm2, %v3969_v48 }
  0xb2   : > { %2686 = vmatmul.mubr.msk.bf16.vlgmr.msra.gmra.mxu0 %vm403_vm2, %v3970_v8 }
  0xb3   : > { %2689 = vmatprep.mubr.msk.bf16.mxu0 %vm403_vm2, %v3971_v41 }
  0xb4   : > { %2668 = vmatmul.mubr.msk.bf16.gmra.mxu1 %vm403_vm2, %v3972_v37 }
  0xb5   : > { %2671 = vmatprep.mubr.msk.bf16.mxu1 %vm403_vm2, %v3388_v50 }
  0xba   : > { %2690 = vmatmul.mubr.msk.bf16.gmra.mxu0 %vm403_vm2, %v3391_v47 }
  0xbb   : > { %2693 = vmatprep.mubr.msk.bf16.mxu0 %vm403_vm2, %v3398_v1 }
  0xbc   : > { %2672 = vmatmul.mubr.msk.bf16.gmra.mxu1 %vm403_vm2, %v3973_v24 }
  0xbd   : > { %2675 = vmatprep.mubr.msk.bf16.mxu1 %vm403_vm2, %v3411_v25 }
  0xc2   : > { %2694 = vmatmul.mubr.msk.bf16.gmra.mxu0 %vm403_vm2, %v3414_v45 }
  0xc3   : > { %2697 = vmatprep.mubr.msk.bf16.mxu0 %vm403_vm2, %v3974_v17 }
  0xc4   : > { %2676 = vmatmul.mubr.msk.bf16.gmra.mxu1 %vm403_vm2, %v3975_v57 }
  0xc5   : > { %2679 = vmatprep.mubr.msk.bf16.mxu1 %vm403_vm2, %v3429_v39 }
  0xca   : > { %2698 = vmatmul.mubr.msk.bf16.gmra.mxu0 %vm403_vm2, %v3439_v59 }
  0xcb   : > { %2701 = vmatprep.mubr.msk.bf16.mxu0 %vm403_vm2, %v3442_v49 }
  0xcc   : > { %2680 = vmatmul.mubr.msk.bf16.gmra.mxu1 %vm403_vm2, %v3450_v7 }
  0xd2   : > { %2702 = vmatmul.mubr.msk.bf16.gmra.mxu0 %vm403_vm2, %v3453_v29 }
  0xe2   : > { %v2511_v44 = vpop.f32.mrf.mxu0 }
  0xe3   : > { %v3605_v52 = vpop.f32.mrf.mxu1 }
  0xe4   : > { %v472_v54 = vpop.f32.mrf.mxu0 }
  0xe5   : > { %v3607_v6 = vpop.f32.mrf.mxu1 }
  0xe6   : > { %v2512_v63 = vpop.f32.mrf.mxu0 }
  0xe7   : > { %v3609_v58 = vpop.f32.mrf.mxu1 }
  0xe8   : > { %v475_v13 = vpop.f32.mrf.mxu0 }
  0xe9   : > { %v3611_v18 = vpop.f32.mrf.mxu1 }
  0xea   : > { %v2515_v5 = vpop.f32.mrf.mxu0 }
  0xeb   : > { %v3613_v20 = vpop.f32.mrf.mxu1 }
  0xec   : > { %v488_v23 = vpop.f32.mrf.mxu0 }
  0xed   : > { %v3615_v30 = vpop.f32.mrf.mxu1 }
  0xee   : > { %v2516_v10 = vpop.f32.mrf.mxu0 }
  0xef   : > { %v3617_v1 = vpop.f32.mrf.mxu1 }
  0xf0   : > { %v491_v34 = vpop.f32.mrf.mxu0 }
  0xf1   : > { %v3619_v50 = vpop.f32.mrf.mxu1 }
  0xf2   : > { %v2519_v47 = vpop.f32.mrf.mxu0 }
  0xf3   : > { %v2533_v59 = vpop.f32.mrf.mxu1 }
  0xf4   : > { %v504_v25 = vpop.f32.mrf.mxu0  ;;  %v617_v45 = vadd.f32 %v2533_v59, %v2511_v44 }
  0xf5   : > { %v608_v49 = vpop.f32.mrf.mxu1 }
  0xf6   : > { %v2520_v39 = vpop.f32.mrf.mxu0  ;;  %v609_v27 = vadd.f32 %v608_v49, %v472_v54 }
  0xf7   : > { %v2534_v7 = vpop.f32.mrf.mxu1 }
  0xf8   : > { %v507_v29 = vpop.f32.mrf.mxu0  ;;  %v620_v38 = vadd.f32 %v2534_v7, %v2512_v63 }
  0xf9   : > { %v611_v46 = vpop.f32.mrf.mxu1 }
  0xfa   : > { %v2555_v15 = vpop.f32.mrf.mxu0  ;;  %v612_v22 = vadd.f32 %v611_v46, %v475_v13 }
  0xfb   : > { %v3621_v0 = vadd.f32 %v2555_v15, %v617_v45 }
  0xfc   : > { %v2537_v31 = vpop.f32.mrf.mxu1  ;;  %v778_v53 = vpop.f32.mrf.mxu0 }
  0xfd   : > { %v633_v43 = vadd.f32 %v2537_v31, %v2515_v5  ;;  %v3623_v36 = vadd.f32 %v778_v53, %v609_v27 }
  0xfe   : > { %v624_v51 = vpop.f32.mrf.mxu1  ;;  %v2556_v26 = vpop.f32.mrf.mxu0 }
  0xff   : > { %v625_v32 = vadd.f32 %v624_v51, %v488_v23  ;;  %v3625_v12 = vadd.f32 %v2556_v26, %v620_v38 }
 0x100   : > { %v2538_v28 = vpop.f32.mrf.mxu1  ;;  %v781_v55 = vpop.f32.mrf.mxu0 }
 0x101   : > { %v636_v33 = vadd.f32 %v2538_v28, %v2516_v10  ;;  %v3627_v40 = vadd.f32 %v781_v55, %v612_v22 }
 0x102   : > { %v627_v35 = vpop.f32.mrf.mxu1  ;;  %v2559_v3 = vpop.f32.mrf.mxu0 }
 0x103   : > { %v628_v21 = vadd.f32 %v627_v35, %v491_v34  ;;  %v3629_v4 = vadd.f32 %v2559_v3, %v633_v43 }
 0x104   : > { %v2541_v61 = vpop.f32.mrf.mxu1  ;;  %v794_v9 = vpop.f32.mrf.mxu0 }
 0x105   : > { %v649_v14 = vadd.f32 %v2541_v61, %v2519_v47  ;;  %v3631_v56 = vadd.f32 %v794_v9, %v625_v32 }
 0x106   : > { %v640_v62 = vpop.f32.mrf.mxu1  ;;  %v2560_v60 = vpop.f32.mrf.mxu0 }
 0x107   : > { %v641_v2 = vadd.f32 %v640_v62, %v504_v25  ;;  %v3633_v16 = vadd.f32 %v2560_v60, %v636_v33 }
 0x108   : > { %v2542_v42 = vpop.f32.mrf.mxu1  ;;  %v797_v19 = vpop.f32.mrf.mxu0 }
 0x109   : > { %v652_v11 = vadd.f32 %v2542_v42, %v2520_v39  ;;  %v3635_v48 = vadd.f32 %v797_v19, %v628_v21 }
 0x10a   : > { %v643_v8 = vpop.f32.mrf.mxu1  ;;  %v2563_v41 = vpop.f32.mrf.mxu0 }
 0x10b   : > { %v644_v37 = vadd.f32 %v643_v8, %v507_v29  ;;  %v3637_v24 = vadd.f32 %v2563_v41, %v649_v14 }
 0x10c   : > { %v2545_v17 = vpop.f32.mrf.mxu1  ;;  %v810_v57 = vpop.f32.mrf.mxu0 }
 0x10d   : > { %v665_v44 = vadd.f32 %v2545_v17, %v3605_v52  ;;  %v3640_v54 = vadd.f32 %v810_v57, %v641_v2 }
 0x10e   : > { %v656_v63 = vpop.f32.mrf.mxu1  ;;  %v2564_v13 = vpop.f32.mrf.mxu0 }
 0x10f   : > { %v657_v5 = vadd.f32 %v656_v63, %v3607_v6  ;;  %v3643_v23 = vadd.f32 %v2564_v13, %v652_v11 }
 0x110   : > { %v2546_v10 = vpop.f32.mrf.mxu1  ;;  %v813_v34 = vpop.f32.mrf.mxu0 }
 0x111   : > { %v668_v47 = vadd.f32 %v2546_v10, %v3609_v58  ;;  %v3646_v59 = vadd.f32 %v813_v34, %v644_v37 }
 0x112   : > { %v659_v25 = vpop.f32.mrf.mxu1  ;;  %v2567_v45 = vpop.f32.mrf.mxu0 }
 0x113   : > { %v660_v49 = vadd.f32 %v659_v25, %v3611_v18  ;;  %v3649_v39 = vadd.f32 %v2567_v45, %v665_v44 }
 0x114   : > { %v2549_v52 = vpop.f32.mrf.mxu1  ;;  %v826_v27 = vpop.f32.mrf.mxu0 }
 0x115   : > { %v681_v7 = vadd.f32 %v2549_v52, %v3613_v20  ;;  %v3652_v29 = vadd.f32 %v826_v27, %v657_v5 }
 0x116   : > { %v672_v6 = vpop.f32.mrf.mxu1  ;;  %v2568_v38 = vpop.f32.mrf.mxu0 }
 0x117   : > { %v673_v46 = vadd.f32 %v672_v6, %v3615_v30  ;;  %v3655_v15 = vadd.f32 %v2568_v38, %v668_v47 }
 0x118   : > { %v2550_v58 = vpop.f32.mrf.mxu1  ;;  %v829_v22 = vpop.f32.mrf.mxu0 }
 0x119   : > { %v684_v31 = vadd.f32 %v2550_v58, %v3617_v1  ;;  %v3658_v53 = vadd.f32 %v829_v22, %v660_v49 }
 0x11a   : > { %v675_v18 = vpop.f32.mrf.mxu1  ;;  %v2571_v43 = vpop.f32.mrf.mxu0 }
 0x11b   : > { %v676_v51 = vadd.f32 %v675_v18, %v3619_v50  ;;  %v3661_v26 = vadd.f32 %v2571_v43, %v681_v7 }
 0x11c   : > { %v2577_v20 = vpop.f32.mrf.mxu1  ;;  %v842_v32 = vpop.f32.mrf.mxu0 }
 0x11d   : > { %v1055_v28 = vadd.f32 %v2577_v20, %v3621_v0  ;;  %v3664_v55 = vadd.f32 %v842_v32, %v673_v46 }
 0x11e   : > { %v974_v30 = vpop.f32.mrf.mxu1  ;;  %v2572_v33 = vpop.f32.mrf.mxu0 }
 0x11f   : > { %v1053_v35 = vadd.f32 %v974_v30, %v3623_v36  ;;  %v3667_v3 = vadd.f32 %v2572_v33, %v684_v31 }
 0x120   : > { %v2578_v1 = vpop.f32.mrf.mxu1  ;;  %v845_v21 = vpop.f32.mrf.mxu0 }
 0x121   : > { %v1056_v61 = vadd.f32 %v2578_v1, %v3625_v12  ;;  %v3670_v9 = vadd.f32 %v845_v21, %v676_v51 }
 0x122   : > { %v977_v50 = vpop.f32.mrf.mxu1  ;;  %v2599_v14 = vpop.f32.mrf.mxu0 }
 0x123   : > { %v1054_v62 = vadd.f32 %v977_v50, %v3627_v40  ;;  %v3673_v60 = vadd.f32 %v2599_v14, %v1055_v28 }
 0x124   : > { %v2581_v0 = vpop.f32.mrf.mxu1  ;;  %v1196_v2 = vpop.f32.mrf.mxu0 }
 0x125   : > { %v1059_v42 = vadd.f32 %v2581_v0, %v3629_v4  ;;  %v3676_v19 = vadd.f32 %v1196_v2, %v1053_v35 }
 0x126   : > { %v990_v36 = vpop.f32.mrf.mxu1  ;;  %v2600_v11 = vpop.f32.mrf.mxu0 }
 0x127   : > { %v1057_v8 = vadd.f32 %v990_v36, %v3631_v56  ;;  %v3679_v41 = vadd.f32 %v2600_v11, %v1056_v61 }
 0x128   : > { %v2582_v12 = vpop.f32.mrf.mxu1  ;;  %v1199_v37 = vpop.f32.mrf.mxu0 }
 0x129   : > { %v1060_v17 = vadd.f32 %v2582_v12, %v3633_v16  ;;  %v3682_v57 = vadd.f32 %v1199_v37, %v1054_v62 }
 0x12a   : > { %v993_v40 = vpop.f32.mrf.mxu1  ;;  %v2603_v44 = vpop.f32.mrf.mxu0 }
 0x12b   : > { %v1058_v63 = vadd.f32 %v993_v40, %v3635_v48  ;;  %v3685_v13 = vadd.f32 %v2603_v44, %v1059_v42 }
 0x12c   : > { %v2585_v4 = vpop.f32.mrf.mxu1  ;;  %v1212_v5 = vpop.f32.mrf.mxu0 }
 0x12d   : > { %v1063_v10 = vadd.f32 %v2585_v4, %v3637_v24  ;;  %v3688_v34 = vadd.f32 %v1212_v5, %v1057_v8 }
 0x12e   : > { %v1006_v56 = vpop.f32.mrf.mxu1  ;;  %v2604_v47 = vpop.f32.mrf.mxu0 }
 0x12f   : > { %v1061_v25 = vadd.f32 %v1006_v56, %v3640_v54  ;;  %v3691_v45 = vadd.f32 %v2604_v47, %v1060_v17 }
 0x130   : > { %v2586_v16 = vpop.f32.mrf.mxu1  ;;  %v1215_v49 = vpop.f32.mrf.mxu0 }
 0x131   : > { %v1064_v52 = vadd.f32 %v2586_v16, %v3643_v23  ;;  %v3694_v27 = vadd.f32 %v1215_v49, %v1058_v63 }
 0x132   : > { %v1009_v48 = vpop.f32.mrf.mxu1  ;;  %v2607_v7 = vpop.f32.mrf.mxu0 }
 0x133   : > { %v1062_v6 = vadd.f32 %v1009_v48, %v3646_v59  ;;  %v3697_v38 = vadd.f32 %v2607_v7, %v1063_v10 }
 0x134   : > { %v2589_v24 = vpop.f32.mrf.mxu1  ;;  %v1228_v46 = vpop.f32.mrf.mxu0 }
 0x135   : > { %v1067_v58 = vadd.f32 %v2589_v24, %v3649_v39  ;;  %v3700_v22 = vadd.f32 %v1228_v46, %v1061_v25 }
 0x136   : > { %v1022_v54 = vpop.f32.mrf.mxu1  ;;  %v2608_v31 = vpop.f32.mrf.mxu0 }
 0x137   : > { %v1065_v18 = vadd.f32 %v1022_v54, %v3652_v29  ;;  %v3703_v43 = vadd.f32 %v2608_v31, %v1064_v52 }
 0x138   : > { %v2590_v23 = vpop.f32.mrf.mxu1  ;;  %v1231_v51 = vpop.f32.mrf.mxu0 }
 0x139   : > { %v1068_v20 = vadd.f32 %v2590_v23, %v3655_v15  ;;  %v3706_v32 = vadd.f32 %v1231_v51, %v1062_v6 }
 0x13a   : > { %v1025_v59 = vpop.f32.mrf.mxu1  ;;  %v2611_v28 = vpop.f32.mrf.mxu0 }
 0x13b   : > { %v1066_v30 = vadd.f32 %v1025_v59, %v3658_v53  ;;  %v3709_v33 = vadd.f32 %v2611_v28, %v1067_v58 }
 0x13c   : > { %v2593_v39 = vpop.f32.mrf.mxu1  ;;  %v1244_v35 = vpop.f32.mrf.mxu0 }
 0x13d   : > { %v1071_v1 = vadd.f32 %v2593_v39, %v3661_v26  ;;  %v3712_v21 = vadd.f32 %v1244_v35, %v1065_v18 }
 0x13e   : > { %v1038_v29 = vpop.f32.mrf.mxu1  ;;  %v2612_v61 = vpop.f32.mrf.mxu0 }
 0x13f   : > { %v1069_v50 = vadd.f32 %v1038_v29, %v3664_v55  ;;  %v3715_v14 = vadd.f32 %v2612_v61, %v1068_v20 }
 0x140   : > { %v2594_v15 = vpop.f32.mrf.mxu1  ;;  %v1247_v62 = vpop.f32.mrf.mxu0 }
 0x141   : > { %v1072_v0 = vadd.f32 %v2594_v15, %v3667_v3  ;;  %v3718_v2 = vadd.f32 %v1247_v62, %v1066_v30 }
 0x142   : > { %v1041_v53 = vpop.f32.mrf.mxu1  ;;  %v2615_v42 = vpop.f32.mrf.mxu0 }
 0x143   : > { %v1070_v36 = vadd.f32 %v1041_v53, %v3670_v9  ;;  %v3721_v11 = vadd.f32 %v2615_v42, %v1071_v1 }
 0x144   : > { %v2621_v26 = vpop.f32.mrf.mxu1  ;;  %v1260_v8 = vpop.f32.mrf.mxu0 }
 0x145   : > { %v3723_v12 = vadd.f32 %v1260_v8, %v1069_v50  ;;  %v1467_v42 = vadd.f32 %v2621_v26, %v3673_v60  ;;  %v3792_v60 = vld [vmem:[%s3926_s2] ss:$0 sm:$0xff] }
 0x146   : > { %v1386_v37 = vpop.f32.mrf.mxu1  ;;  %v2616_v55 = vpop.f32.mrf.mxu0 }
 0x147   : > { %v3725_v17 = vadd.f32 %v2616_v55, %v1072_v0  ;;  %v1465_v55 = vadd.f32 %v1386_v37, %v3676_v19 }
 0x148   : > { %v2622_v40 = vpop.f32.mrf.mxu1  ;;  %v1263_v44 = vpop.f32.mrf.mxu0 }
 0x149   : > { %3976 = vst [vmem:[#allocation2_spill] sm:$0xff] %v3725_v17  ;;  %v3727_v63 = vadd.f32 %v1263_v44, %v1070_v36  ;;  %v1468_v17 = vadd.f32 %v2622_v40, %v3679_v41  ;;  %v3798_v41 = vld [vmem:[%s3927_s3] ss:$0 sm:$0xff] }
 0x14a   : > { %v1389_v3 = vpop.f32.mrf.mxu1  ;;  %v2643_v4 = vpop.f32.mrf.mxu0 }
 0x14b   : > { %3977 = vst [vmem:[#allocation5_spill] sm:$0xff] %v3727_v63  ;;  %v1649_v44 = vadd.f32 %v2643_v4, %v1467_v42  ;;  %v1466_v19 = vadd.f32 %v1389_v3, %v3682_v57 }
 0x14c   : > { %v2625_v5 = vpop.f32.mrf.mxu1  ;;  %v1568_v10 = vpop.f32.mrf.mxu0 }
 0x14d   : > { %v1471_v4 = vadd.f32 %v2625_v5, %v3685_v13 }
 0x14e   : > { %v1402_v56 = vpop.f32.mrf.mxu1  ;;  %v2644_v9 = vpop.f32.mrf.mxu0 }
 0x14f   : > { %v1650_v26 = vadd.f32 %v2644_v9, %v1468_v17  ;;  %v1469_v17 = vadd.f32 %v1402_v56, %v3688_v34 }
 0x150   : > { %v3729_v47 = vpop.f32.mrf.mxu1  ;;  %v1571_v25 = vpop.f32.mrf.mxu0 }
 0x151   : > { %v1648_v9 = vadd.f32 %v1571_v25, %v1466_v19 }
 0x152   : > { %v3731_v16 = vpop.f32.mrf.mxu1  ;;  %v2647_v49 = vpop.f32.mrf.mxu0 }
 0x153   : > { %v1653_v57 = vadd.f32 %v2647_v49, %v1471_v4 }
 0x154   : > { %v3733_v52 = vpop.f32.mrf.mxu1  ;;  %v1584_v48 = vpop.f32.mrf.mxu0 }
 0x155   : > { %v1651_v13 = vadd.f32 %v1584_v48, %v1469_v17 }
 0x156   : > { %v3735_v7 = vpop.f32.mrf.mxu1  ;;  %v3737_v6 = vpop.f32.mrf.mxu0 }
 0x158   : > { %v3739_v24 = vpop.f32.mrf.mxu1  ;;  %v3741_v46 = vpop.f32.mrf.mxu0 }
 0x15a   : > { %v3743_v58 = vpop.f32.mrf.mxu1  ;;  %v3745_v54 = vpop.f32.mrf.mxu0 }
 0x15c   : > { %v3747_v31 = vpop.f32.mrf.mxu1  ;;  %v3749_v18 = vpop.f32.mrf.mxu0 }
 0x15e   : > { %v3751_v23 = vpop.f32.mrf.mxu1  ;;  %v3753_v51 = vpop.f32.mrf.mxu0 }
 0x160   : > { %v3755_v20 = vpop.f32.mrf.mxu1  ;;  %v3757_v59 = vpop.f32.mrf.mxu0 }
 0x162   : > { %v3759_v28 = vpop.f32.mrf.mxu1  ;;  %v3761_v30 = vpop.f32.mrf.mxu0 }
 0x164   : > { %v3763_v39 = vpop.f32.mrf.mxu1  ;;  %v3765_v35 = vpop.f32.mrf.mxu0 }
 0x166   : > { %v3767_v1 = vpop.f32.mrf.mxu1  ;;  %v3769_v29 = vpop.f32.mrf.mxu0 }
 0x167   : > { %3978 = vst [vmem:[#allocation3_spill] sm:$0xff] %v3767_v1 }
 0x168   : > { %v3771_v61 = vpop.f32.mrf.mxu1  ;;  %v3773_v50 = vpop.f32.mrf.mxu0 }
 0x169   : > { %3979 = vst [vmem:[#allocation4_spill] sm:$0xff] %v3771_v61  ;;  %3980 = vst [vmem:[#allocation6_spill] sm:$0xff] %v3773_v50 }
 0x16a   : > { %v3776_v15 = vpop.f32.mrf.mxu1  ;;  %v3778_v62 = vpop.f32.mrf.mxu0 }
 0x16b   : > { %3981 = vst [vmem:[#allocation7_spill] sm:$0xff] %v3776_v15  ;;  %3982 = vst [vmem:[#allocation9_spill] sm:$0xff] %v3778_v62  ;;  %v1647_v15 = vadd.f32 %v1568_v10, %v1465_v55  ;;  %v1472_v55 = vadd.f32 %v3729_v47, %v3691_v45 }
 0x16c   : > { %v2665_v0 = vpop.f32.mrf.mxu1  ;;  %v3780_v53 = vpop.f32.mrf.mxu0 }
 0x16d   : > { %3983 = vst [vmem:[#allocation10_spill] sm:$0xff] %v3780_v53  ;;  %v1894_v50 = vadd.f32 %v2665_v0, %v1649_v44 }
 0x16e   : > { %v1813_v36 = vpop.f32.mrf.mxu1  ;;  %v3783_v8 = vpop.f32.mrf.mxu0 }
 0x16f   : > { %3984 = vst [vmem:[#allocation8_spill] sm:$0xff] %v3783_v8  ;;  %v1892_v8 = vadd.f32 %v1813_v36, %v1647_v15 }
 0x170   : > { %v2666_v63 = vpop.f32.mrf.mxu1  ;;  %v3786_v61 = vpop.f32.mrf.mxu0 }
 0x171   : > { %v1895_v10 = vadd.f32 %v2666_v63, %v1650_v26 }
 0x172   : > { %v1816_v62 = vpop.f32.mrf.mxu1  ;;  %v2687_v1 = vpop.f32.mrf.mxu0 }
 0x173   : > { %v2083_v53 = vadd.f32 %v2687_v1, %v1894_v50  ;;  %v1893_v63 = vadd.f32 %v1816_v62, %v1648_v9 }
 0x174   : > { %v2669_v37 = vpop.f32.mrf.mxu1  ;;  %v2002_v40 = vpop.f32.mrf.mxu0 }
 0x175   : > { %v2110_v0 = vmul.f32 %v3792_v60, %v2083_v53  ;;  %v2081_v42 = vadd.f32 %v2002_v40, %v1892_v8  ;;  %v1898_v56 = vadd.f32 %v2669_v37, %v1653_v57  ;;  %v1654_v8 = vadd.f32 %v3737_v6, %v1472_v55 }
 0x176   : > { %v1829_v1 = vpop.f32.mrf.mxu1  ;;  %v2688_v50 = vpop.f32.mrf.mxu0  ;;  %v1470_v37 = vadd.f32 %v3731_v16, %v3694_v27  ;;  %v1475_v40 = vadd.f32 %v3733_v52, %v3697_v38 }
 0x177   : > { %v2137_v3 = vadd.f32 %v3798_v41, %v2110_v0  ;;  %v2108_v15 = vmul.f32 %v3792_v60, %v2081_v42  ;;  %v2084_v36 = vadd.f32 %v2688_v50, %v1895_v10  ;;  %v1896_v62 = vadd.f32 %v1829_v1, %v1651_v13 }
 0x178   : > { %v2670_v34 = vpop.f32.mrf.mxu1  ;;  %v2005_v5 = vpop.f32.mrf.mxu0  ;;  %v1473_v1 = vadd.f32 %v3735_v7, %v3700_v22  ;;  %v1652_v50 = vadd.f32 %v3741_v46, %v1470_v37  ;;  %v1657_v38 = vadd.f32 %v3745_v54, %v1475_v40  ;;  %v1477_v40 = vadd.f32 %v3751_v23, %v3712_v21 }
 0x179   : > { %v2157_v25 = vmax.f32 %v2137_v3, 0.0  ;;  %v2135_v49 = vadd.f32 %v3798_v41, %v2108_v15  ;;  %v2111_v53 = vmul.f32 %v3792_v60, %v2084_v36  ;;  %v2082_v47 = vadd.f32 %v2005_v5, %v1893_v63 }
 0x17a   : > { %v1832_v45 = vpop.f32.mrf.mxu1  ;;  %v2691_v48 = vpop.f32.mrf.mxu0  ;;  %v1899_v0 = vadd.f32 %v2670_v34, %v1654_v8  ;;  %v1476_v36 = vadd.f32 %v3739_v24, %v3703_v43  ;;  %v1655_v22 = vadd.f32 %v3749_v18, %v1473_v1  ;;  %v1659_v21 = vadd.f32 %v3765_v35, %v1477_v40  ;;  %v3991_v40 = vld [vmem:[#allocation5_spill] sm:$0xff] }
 0x17b   : > { %2177 = vst [vmem:[%s3810_s8 + $0x10] sm:$0xff] %v2157_v25  ;;  %v2155_v44 = vmax.f32 %v2135_v49, 0.0  ;;  %v2138_v26 = vadd.f32 %v3798_v41, %v2111_v53  ;;  %v2087_v19 = vadd.f32 %v2691_v48, %v1898_v56  ;;  %v2109_v4 = vmul.f32 %v3792_v60, %v2082_v47 }
 0x17c   : > { %v2673_v10 = vpop.f32.mrf.mxu1  ;;  %v2018_v6 = vpop.f32.mrf.mxu0  ;;  %v1897_v7 = vadd.f32 %v1832_v45, %v1652_v50  ;;  %v1658_v56 = vadd.f32 %v3753_v51, %v1476_v36  ;;  %v1474_v45 = vadd.f32 %v3743_v58, %v3706_v32  ;;  %v1479_v47 = vadd.f32 %v3747_v31, %v3709_v33 }
 0x17d   : > { %2175 = vst [vmem:[%s3810_s8] sm:$0xff] %v2155_v44  ;;  %v2158_v42 = vmax.f32 %v2138_v26, 0.0  ;;  %v2114_v17 = vmul.f32 %v3792_v60, %v2087_v19  ;;  %v2085_v9 = vadd.f32 %v2018_v6, %v1896_v62  ;;  %v2136_v27 = vadd.f32 %v3798_v41, %v2109_v4 }
 0x17e   : > { %v1845_v16 = vpop.f32.mrf.mxu1  ;;  %v2692_v57 = vpop.f32.mrf.mxu0  ;;  %v1902_v63 = vadd.f32 %v2673_v10, %v1657_v38  ;;  %v1656_v4 = vadd.f32 %v3757_v59, %v1474_v45  ;;  %v1661_v33 = vadd.f32 %v3761_v30, %v1479_v47  ;;  %v1483_v36 = vadd.f32 %v3763_v39, %v3721_v11  ;;  %v3987_v11 = vld [vmem:[#allocation9_spill] sm:$0xff] }
 0x17f   : > { %2178 = vst [vmem:[%s3810_s8 + $0x18] sm:$0xff] %v2158_v42  ;;  %v2141_v52 = vadd.f32 %v3798_v41, %v2114_v17  ;;  %v2112_v3 = vmul.f32 %v3792_v60, %v2085_v9  ;;  %v2088_v15 = vadd.f32 %v2692_v57, %v1899_v0  ;;  %v2156_v46 = vmax.f32 %v2136_v27, 0.0 }
 0x180   : > { %v2674_v55 = vpop.f32.mrf.mxu1  ;;  %v2021_v13 = vpop.f32.mrf.mxu0  ;;  %v1900_v43 = vadd.f32 %v1845_v16, %v1655_v22  ;;  %v1480_v42 = vadd.f32 %v3755_v20, %v3715_v14  ;;  %v1665_v39 = vadd.f32 %v3987_v11, %v1483_v36 }
 0x181   : > { %v2161_v34 = vmax.f32 %v2141_v52, 0.0  ;;  %v2139_v54 = vadd.f32 %v3798_v41, %v2112_v3  ;;  %v2115_v5 = vmul.f32 %v3792_v60, %v2088_v15  ;;  %2176 = vst [vmem:[%s3810_s8 + $0x8] sm:$0xff] %v2156_v46  ;;  %v2086_v49 = vadd.f32 %v2021_v13, %v1897_v7 }
 0x182   : > { %v1848_v25 = vpop.f32.mrf.mxu1  ;;  %v2695_v53 = vpop.f32.mrf.mxu0  ;;  %v1903_v44 = vadd.f32 %v2674_v55, %v1658_v56  ;;  %v1662_v16 = vadd.f32 %v3769_v29, %v1480_v42  ;;  %v1478_v15 = vadd.f32 %v3759_v28, %v3718_v2 }
 0x183   : > { %2181 = vst [vmem:[%s3810_s8 + $0x30] sm:$0xff] %v2161_v34  ;;  %v2159_v24 = vmax.f32 %v2139_v54, 0.0  ;;  %v2142_v18 = vadd.f32 %v3798_v41, %v2115_v5  ;;  %v2091_v8 = vadd.f32 %v2695_v53, %v1902_v63  ;;  %v2113_v48 = vmul.f32 %v3792_v60, %v2086_v49  ;;  %v3985_v34 = vld [vmem:[#allocation3_spill] sm:$0xff]  ;;  %v3986_v5 = vld [vmem:[#allocation6_spill] sm:$0xff] }
 0x184   : > { %v2677_v51 = vpop.f32.mrf.mxu1  ;;  %v2034_v62 = vpop.f32.mrf.mxu0  ;;  %v1901_v23 = vadd.f32 %v1848_v25, %v1656_v4  ;;  %v1481_v54 = vadd.f32 %v3985_v34, %v3723_v12  ;;  %v1660_v56 = vadd.f32 %v3986_v5, %v1478_v15  ;;  %v3990_v12 = vld [vmem:[#allocation10_spill] sm:$0xff]  ;;  %v3992_v4 = vld [vmem:[#allocation7_spill] sm:$0xff] }
 0x185   : > { %2179 = vst [vmem:[%s3810_s8 + $0x20] sm:$0xff] %v2159_v24  ;;  %v2162_v26 = vmax.f32 %v2142_v18, 0.0  ;;  %v2118_v19 = vmul.f32 %v3792_v60, %v2091_v8  ;;  %v2089_v37 = vadd.f32 %v2034_v62, %v1900_v43  ;;  %v2140_v32 = vadd.f32 %v3798_v41, %v2113_v48  ;;  %v3988_v24 = vld [vmem:[#allocation2_spill] sm:$0xff]  ;;  %v3989_v18 = vld [vmem:[#allocation4_spill] sm:$0xff] }
 0x186   : > { %v1861_v58 = vpop.f32.mrf.mxu1  ;;  %v2696_v10 = vpop.f32.mrf.mxu0  ;;  %v1906_v1 = vadd.f32 %v2677_v51, %v1661_v33  ;;  %v1484_v8 = vadd.f32 %v3989_v18, %v3988_v24  ;;  %v1663_v45 = vadd.f32 %v3990_v12, %v1481_v54 }
 0x187   : > { %2182 = vst [vmem:[%s3810_s8 + $0x38] sm:$0xff] %v2162_v26  ;;  %v2145_v31 = vadd.f32 %v3798_v41, %v2118_v19  ;;  %v2116_v6 = vmul.f32 %v3792_v60, %v2089_v37  ;;  %v2092_v0 = vadd.f32 %v2696_v10, %v1903_v44  ;;  %v2160_v59 = vmax.f32 %v2140_v32, 0.0 }
 0x188   : > { %v2678_v17 = vpop.f32.mrf.mxu1  ;;  %v2037_v9 = vpop.f32.mrf.mxu0  ;;  %v1904_v14 = vadd.f32 %v1861_v58, %v1659_v21  ;;  %v1482_v32 = vadd.f32 %v3992_v4, %v3991_v40  ;;  %v3993_v58 = vld [vmem:[#allocation8_spill] sm:$0xff] }
 0x189   : > { %v2165_v50 = vmax.f32 %v2145_v31, 0.0  ;;  %v2143_v30 = vadd.f32 %v3798_v41, %v2116_v6  ;;  %v2119_v27 = vmul.f32 %v3792_v60, %v2092_v0  ;;  %2180 = vst [vmem:[%s3810_s8 + $0x28] sm:$0xff] %v2160_v59  ;;  %v2090_v38 = vadd.f32 %v2037_v9, %v1901_v23 }
 0x18a   : > { %v1864_v57 = vpop.f32.mrf.mxu1  ;;  %v2699_v52 = vpop.f32.mrf.mxu0  ;;  %v1907_v46 = vadd.f32 %v2678_v17, %v1662_v16  ;;  %v1666_v10 = vadd.f32 %v3993_v58, %v1484_v8  ;;  %v1664_v23 = vadd.f32 %v3786_v61, %v1482_v32 }
 0x18b   : > { %2185 = vst [vmem:[%s3810_s8 + $0x50] sm:$0xff] %v2165_v50  ;;  %v2163_v20 = vmax.f32 %v2143_v30, 0.0  ;;  %v2146_v35 = vadd.f32 %v3798_v41, %v2119_v27  ;;  %v2095_v3 = vadd.f32 %v2699_v52, %v1906_v1  ;;  %v2117_v22 = vmul.f32 %v3792_v60, %v2090_v38 }
 0x18c   : > { %v2681_v29 = vpop.f32.mrf.mxu1  ;;  %v2050_v7 = vpop.f32.mrf.mxu0  ;;  %v1905_v47 = vadd.f32 %v1864_v57, %v1660_v56 }
 0x18d   : > { %2183 = vst [vmem:[%s3810_s8 + $0x40] sm:$0xff] %v2163_v20  ;;  %v2166_v55 = vmax.f32 %v2146_v35, 0.0  ;;  %v2122_v13 = vmul.f32 %v3792_v60, %v2095_v3  ;;  %v2093_v63 = vadd.f32 %v2050_v7, %v1904_v14  ;;  %v2144_v2 = vadd.f32 %v3798_v41, %v2117_v22 }
 0x18e   : > { %v1877_v28 = vpop.f32.mrf.mxu1  ;;  %v2700_v25 = vpop.f32.mrf.mxu0  ;;  %v1910_v44 = vadd.f32 %v2681_v29, %v1665_v39 }
 0x18f   : > { %2186 = vst [vmem:[%s3810_s8 + $0x58] sm:$0xff] %v2166_v55  ;;  %v2149_v49 = vadd.f32 %v3798_v41, %v2122_v13  ;;  %v2120_v53 = vmul.f32 %v3792_v60, %v2093_v63  ;;  %v2096_v43 = vadd.f32 %v2700_v25, %v1907_v46  ;;  %v2164_v48 = vmax.f32 %v2144_v2, 0.0 }
 0x190   : > { %v2682_v51 = vpop.f32.mrf.mxu1  ;;  %v2053_v62 = vpop.f32.mrf.mxu0  ;;  %v1908_v6 = vadd.f32 %v1877_v28, %v1663_v45 }
 0x191   : > { %v2169_v26 = vmax.f32 %v2149_v49, 0.0  ;;  %v2147_v19 = vadd.f32 %v3798_v41, %v2120_v53  ;;  %v2123_v37 = vmul.f32 %v3792_v60, %v2096_v43  ;;  %2184 = vst [vmem:[%s3810_s8 + $0x48] sm:$0xff] %v2164_v48  ;;  %v2094_v33 = vadd.f32 %v2053_v62, %v1905_v47 }
 0x192   : > { %v2703_v31 = vpop.f32.mrf.mxu0  ;;  %v1880_v59 = vpop.f32.mrf.mxu1  ;;  %v1911_v1 = vadd.f32 %v2682_v51, %v1666_v10 }
 0x193   : > { %2189 = vst [vmem:[%s3810_s8 + $0x70] sm:$0xff] %v2169_v26  ;;  %v2167_v0 = vmax.f32 %v2147_v19, 0.0  ;;  %v2150_v42 = vadd.f32 %v3798_v41, %v2123_v37  ;;  %v2099_v21 = vadd.f32 %v2703_v31, %v1910_v44  ;;  %v2121_v17 = vmul.f32 %v3792_v60, %v2094_v33 }
 0x194   : > { %v2066_v9 = vpop.f32.mrf.mxu0  ;;  %v1909_v38 = vadd.f32 %v1880_v59, %v1664_v23 }
 0x195   : > { %2187 = vst [vmem:[%s3810_s8 + $0x60] sm:$0xff] %v2167_v0  ;;  %v2170_v50 = vmax.f32 %v2150_v42, 0.0  ;;  %v2126_v30 = vmul.f32 %v3792_v60, %v2099_v21  ;;  %v2097_v27 = vadd.f32 %v2066_v9, %v1908_v6  ;;  %v2148_v16 = vadd.f32 %v3798_v41, %v2121_v17 }
 0x196   : > { %v2704_v57 = vpop.f32.mrf.mxu0 }
 0x197   : > { %2190 = vst [vmem:[%s3810_s8 + $0x78] sm:$0xff] %v2170_v50  ;;  %v2153_v61 = vadd.f32 %v3798_v41, %v2126_v30  ;;  %v2124_v52 = vmul.f32 %v3792_v60, %v2097_v27  ;;  %v2100_v14 = vadd.f32 %v2704_v57, %v1911_v1  ;;  %v2168_v20 = vmax.f32 %v2148_v16, 0.0 }
 0x198   : > { %v2069_v35 = vpop.f32.mrf.mxu0 }
 0x199   : > { %v2173_v3 = vmax.f32 %v2153_v61, 0.0  ;;  %v2151_v15 = vadd.f32 %v3798_v41, %v2124_v52  ;;  %v2127_v36 = vmul.f32 %v3792_v60, %v2100_v14  ;;  %v2098_v22 = vadd.f32 %v2069_v35, %v1909_v38  ;;  %2188 = vst [vmem:[%s3810_s8 + $0x68] sm:$0xff] %v2168_v20 }
 0x19b   : > { %2193 = vst [vmem:[%s3810_s8 + $0x90] sm:$0xff] %v2173_v3  ;;  %v2171_v29 = vmax.f32 %v2151_v15, 0.0  ;;  %v2154_v7 = vadd.f32 %v3798_v41, %v2127_v36  ;;  %v2125_v46 = vmul.f32 %v3792_v60, %v2098_v22 }
 0x19d   : > { %2191 = vst [vmem:[%s3810_s8 + $0x80] sm:$0xff] %v2171_v29  ;;  %v2174_v55 = vmax.f32 %v2154_v7, 0.0  ;;  %v2152_v13 = vadd.f32 %v3798_v41, %v2125_v46 }
 0x19f   : > { %2194 = vst [vmem:[%s3810_s8 + $0x98] sm:$0xff] %v2174_v55  ;;  %v2172_v63 = vmax.f32 %v2152_v13, 0.0 }
 0x1a1   : > { %2192 = vst [vmem:[%s3810_s8 + $0x88] sm:$0xff] %v2172_v63 }
 0x1a2 PF: > { %s14_s19 = sadd.s32 1, %s2820_s19   ;;  %s3994_s15 = smov %s2812_s17 }
 0x1a3   : > { %p11_p7 = scmp.ge.s32.totalorder %s14_s19, 6   ;;  %s3995_s16 = smov %s2816_s18 }
 0x1a4   : > { %s3996_s17 = smov %s3999_s20  ;;  %s3997_s18 = smov %s4003_s21 }
 0x1a5   :  { %13 = sbr.rel (!%p11_p7) target bundleno = 3 (0x3), region = 74 }

// kernel: conv_bnr.2
= control target key start
LH: loop header
LB: loop body
LE: loop exit
PB: predicated region body
PF: predicated region fallthrough
CT: control target
= control target key end

     0   :  { %s2888_s12 = smov 0   ;;  %s2890_s13 = smov 0   ;;  %s3975_s0 = inlined_call_operand.vmem [shape: bf16[4,202,4], index: 0, kind: input, shape index: {}]   ;;  %s3976_s1 = inlined_call_operand.vmem [shape: bf16[9,4,128], index: 1, kind: input, shape index: {}]   ;;  %s3977_s2 = inlined_call_operand.vmem [shape: f32[1,160], index: 2, kind: input, shape index: {}]   ;;  %s3978_s3 = inlined_call_operand.vmem [shape: f32[16,128], index: 3, kind: output, shape index: {}]  }
   0x1   :  { %s2892_s14 = smov 0   ;;  %s2894_s15 = smov 0  }
   0x2   :  { %s2896_s16 = smov 0  }
   0x3 LB: > { %s22_s17 = sadd.s32 1, %s2856_s14  ;;  %s25_s18 = sadd.s32 1, %s2860_s15  ;;  %s2864_s16 = sphi %s2896_s16, %s13_s16   ;;  %s2860_s15 = sphi %s2894_s15, %s4071_s15   ;;  %s2856_s14 = sphi %s2892_s14, %s4070_s14   ;;  %s2852_s13 = sphi %s2890_s13, %s4069_s13   ;;  %s2848_s12 = sphi %s2888_s12, %s4068_s12  }
   0x4   : > { %p23_p0 = scmp.ge.s32.totalorder %s22_s17, 2  ;;  %p2319_p1 = scmp.ge.s32.totalorder %s2864_s16, 1 }
   0x5   : > { %p157_p2 = scmp.lt.s32.totalorder %s2864_s16, 5 }
   0x6   : > { %s4073_s17 = smov (%p23_p0, %s22_s17), 0  ;;  %s4075_s18 = smov (!%p23_p0, %s25_s18), %s2860_s15 }
   0x7   : > { %p158_p3 = pnand %p2319_p1, %p157_p2  ;;  %p27_p4 = scmp.ge.s32.totalorder %s4075_s18, 2 }
   0x9   : > { %s4077_s18 = smov (%p27_p4, %s4075_s18), 0  ;;  %161 = sbr.rel (%p158_p3) target bundleno = 650 (0x28a), region = 32 }
   0xe   : > { %p191_p5 = scmp.lt.s32.totalorder %s2852_s13, 1  ;;  %v2323_v0 = vld [vmem:[%s3976_s1 + $0x2] sm:$0x3]  ;;  %vm394_vm0 = vcmask 1041408   ;;  %s2320_s21 = sshll.u32 %s2852_s13, 1  ;;  %vm363_vm1 = vcmask 31744  }
   0xf   : > { %2749 = vmatprep.subr.msk.bf16.mxu0 %vm394_vm0, %v2323_v0  ;;  %2750 = vmatprep.subr.msk.bf16.mxu1 %vm394_vm0, %v2323_v0  ;;  %v396_v1 = vsel %vm394_vm0, %v2323_v0, 0  ;;  %s183_s22 = sadd.s32 %s2848_s12, %s2320_s21  ;;  %v2355_v2 = vld [vmem:[%s3976_s1 + $0x4] sm:$0x3]  ;;  %v222_v3 = vld [vmem:[%s3976_s1] sm:$0x3]  ;;  %vm649_vm3 = vcmask 1046528  }
  0x10   : > { %s4079_s13 = smov (!%p191_p5, %s2852_s13), 1  ;;  %2550 = vmatpush3.bf16.msra.mxu0 %v396_v1  ;;  %2748 = vmatpush3.bf16.msra.mxu1 %v396_v1  ;;  %p184_p6 = scmp.lt.s32.totalorder %s183_s22, 3  ;;  %vm278_vm2 = vsmask.f32 7424  ;;  %v702_v37 = vsel %vm394_vm0, %v2355_v2, 0  ;;  %v532_v39 = vsel %vm394_vm0, %v222_v3, 0 }
  0x11   : > { %2752 = vmatprep.subr.msk.bf16.mxu0 %vm394_vm0, %v2355_v2  ;;  %2751 = vmatprep.subr.msk.bf16.mxu1 %vm394_vm0, %v222_v3  ;;  %s2322_s27 = sshll.u32 %s4079_s13, 3  ;;  %v2379_v51 = vld [vmem:[%s3976_s1 + $0x8] sm:$0x3]  ;;  %v2366_v57 = vld [vmem:[%s3976_s1 + $0x6] sm:$0x3]  ;;  %vm845_vm4 = vcmask 1045504  }
  0x12   : > { %s2938_s30 = scalar_lea.vmem %s3978_s3, %s2322_s27  ;;  %s4081_s22 = smov (!%p184_p6, %s183_s22), 3  ;;  %vm1035_vm5 = vsmask.f32 5376  ;;  %vm1257_vm6 = vcmask 1044480   ;;  %vm2072_vm7 = vcmask 261120   ;;  %vm2238_vm8 = vcmask 1040384  }
  0x13   : > { %s2759_s4 = smul.u32 104, %s4081_s22  ;;  %p2447_p7 = scmp.ne.s32.totalorder %s2848_s12, 0 }
  0x15   : > { %s2943_s7 = scalar_lea.vmem %s3975_s0, %s2759_s4 }
  0x16   : > { %v2946_v4 = vld [vmem:[%s2943_s7] sm:$0xff]   ;;  %v2949_v5 = vld [vmem:[%s2943_s7 + $0x8] sm:$0xff]   ;;  %v2952_v6 = vld [vmem:[%s2943_s7 + $0x30] sm:$0xf] }
  0x17   : > { %v209_v7 = vld [vmem:[%s2943_s7 + $0x34] sm:$0xf]  ;;  %v210_v8 = vld [vmem:[%s2943_s7 + $0x38] sm:$0xf]  ;;  %v280_v9 = vshrl.u32 %v2946_v4, 16  ;;  %v282_v10 = vshll.u32 %v2946_v4, 16 }
  0x18   : > { %v287_v11 = vshll.u32 %v2949_v5, 16  ;;  %v291_v12 = vshrl.u32 %v2949_v5, 16  ;;  %v2961_v13 = vld [vmem:[%s2943_s7 + $0x3c] sm:$0xf]  ;;  %v2964_v14 = vcombine.low %v2952_v6, %v209_v7  ;;  %v200_v16 = vld [vmem:[%s2943_s7 + $0x10] sm:$0xf]  ;;  %v2976_v19 = vcombine.low %v209_v7, %v210_v8 }
  0x19   : > { %v2967_v15 = vcombine.low %v210_v8, %v2961_v13  ;;  %v2971_v17 = vld [vmem:[%s2943_s7 + $0x14] sm:$0xf]  ;;  %v2974_v18 = vld [vmem:[%s2943_s7 + $0x40] sm:$0xf]  ;;  %v284_v20 = vrot.slane %v282_v10, 1 }
  0x1a   : > { %v289_v21 = vrot.slane %v287_v11, 1  ;;  %v2981_v22 = vcombine.low %v200_v16, %v2971_v17  ;;  %v2984_v23 = vld [vmem:[%s2943_s7 + $0x44] sm:$0xf]  ;;  %v327_v24 = vshll.u32 %v2964_v14, 16  ;;  %v331_v25 = vshrl.u32 %v2964_v14, 16 }
  0x1b   : > { %v335_v26 = vshll.u32 %v2967_v15, 16  ;;  %v339_v27 = vshrl.u32 %v2967_v15, 16  ;;  %v2991_v28 = vld [vmem:[%s2943_s7 + $0x18] sm:$0xf]  ;;  %v285_v29 = vor.u32 %v284_v20, %v280_v9  ;;  %v2998_v32 = vcombine.low %v2974_v18, %v2984_v23  ;;  %v3001_v33 = vld [vmem:[%s2943_s7 + $0x1c] sm:$0xf] }
  0x1c   : > { %v293_v30 = vor.u32 %v291_v12, %v289_v21  ;;  %v295_v31 = vshll.u32 %v2981_v22, 16  ;;  %v3004_v34 = vld [vmem:[%s2943_s7 + $0x48] sm:$0xf]  ;;  %v3008_v35 = vrot.slane %v327_v24, 1  ;;  %v3014_v38 = vld [vmem:[%s2943_s7 + $0x4c] sm:$0xf]  ;;  %v3023_v43 = vcombine.low %v2991_v28, %v3001_v33 }
  0x1d   : > { %v337_v36 = vrot.slane %v335_v26, 1  ;;  %v290_v40 = vsel %vm278_vm2, %v285_v29, %v289_v21  ;;  %v343_v42 = vshll.u32 %v2998_v32, 16  ;;  %v3026_v44 = vld [vmem:[%s2943_s7 + $0x20] sm:$0xf]  ;;  %v3029_v45 = vld [vmem:[%s2943_s7 + $0x24] sm:$0xf]  ;;  %v3040_v49 = vcombine.low %v3004_v34, %v3014_v38 }
  0x1e   : > { %v297_v41 = vrot.slane %v295_v31, 1  ;;  %2551 = vmatprep.mubr.msk.bf16.mxu0 %vm363_vm1, %v290_v40  ;;  %v333_v46 = vor.u32 %v331_v25, %v3008_v35  ;;  %v299_v48 = vshrl.u32 %v2981_v22, 16  ;;  %v3043_v50 = vld [vmem:[%s2943_s7 + $0x50] sm:$0xf]  ;;  %v303_v54 = vshll.u32 %v3023_v43, 16 }
  0x1f   : > { %v341_v47 = vor.u32 %v339_v27, %v337_v36  ;;  %v345_v53 = vrot.slane %v343_v42, 1  ;;  %v347_v55 = vshrl.u32 %v2998_v32, 16  ;;  %v3054_v56 = vld [vmem:[%s2943_s7 + $0x54] sm:$0xf]  ;;  %v3984_v60 = vshll.u32 %v3040_v49, 16 }
  0x20   : > { %v298_v52 = vsel %vm278_vm2, %v293_v30, %v297_v41  ;;  %v338_v58 = vsel %vm278_vm2, %v333_v46, %v337_v36  ;;  %v301_v59 = vor.u32 %v299_v48, %v297_v41  ;;  %v3066_v61 = vcombine.low %v3026_v44, %v3029_v45  ;;  %v3069_v62 = vld [vmem:[%s2943_s7 + $0x28] sm:$0xf]  ;;  %v3072_v63 = vld [vmem:[%s2943_s7 + $0x2c] sm:$0xf] }
  0x21   : > { %2552 = vmatmul.mubr.msk.bf16.vlgmr.msra.gmra.mxu0 %vm363_vm1, %v298_v52  ;;  %2563 = vmatprep.mubr.msk.bf16.mxu1 %vm363_vm1, %v338_v58  ;;  %v346_v0 = vsel %vm278_vm2, %v341_v47, %v345_v53  ;;  %v305_v1 = vrot.slane %v303_v54, 1  ;;  %v349_v2 = vor.u32 %v347_v55, %v345_v53  ;;  %v353_v3 = vrot.slane %v3984_v60, 1 }
  0x22   : > { %2594 = vmatpush3.bf16.msra.mxu0 %v702_v37  ;;  %2564 = vmatmul.mubr.msk.bf16.vlgmr.msra.gmra.mxu1 %vm363_vm1, %v346_v0  ;;  %v307_v7 = vshrl.u32 %v3023_v43, 16  ;;  %v3982_v8 = vshll.u32 %v3066_v61, 16  ;;  %v3087_v9 = vcombine.low %v3043_v50, %v3043_v50  ;;  %v3985_v16 = vshrl.u32 %v3040_v49, 16 }
  0x23   : > { %2754 = vmatprep.subr.msk.bf16.mxu0 %vm394_vm0, %v2379_v51  ;;  %v306_v10 = vsel %vm278_vm2, %v301_v59, %v305_v1  ;;  %2572 = vmatpush3.bf16.msra.mxu1 %v532_v39  ;;  %v3094_v20 = vcombine.low %v3043_v50, %v3054_v56  ;;  %v3098_v21 = vcombine.low %v3069_v62, %v3072_v63  ;;  %v315_v40 = vshrl.u32 %v3066_v61, 16 }
  0x24   : > { %2555 = vmatprep.mubr.msk.bf16.mxu0 %vm363_vm1, %v306_v10  ;;  %v354_v29 = vsel %vm278_vm2, %v349_v2, %v353_v3  ;;  %v309_v30 = vor.u32 %v307_v7, %v305_v1  ;;  %v313_v36 = vrot.slane %v3982_v8, 1  ;;  %2753 = vmatprep.subr.msk.bf16.mxu1 %vm394_vm0, %v2366_v57  ;;  %v357_v37 = vor.u32 %v3985_v16, %v353_v3 }
  0x25   : > { %2567 = vmatprep.mubr.msk.bf16.mxu1 %vm363_vm1, %v354_v29  ;;  %v359_v39 = vshll.u32 %v3087_v9, 16  ;;  %v3979_v41 = vshll.u32 %v3098_v21, 16  ;;  %v3980_v47 = vshrl.u32 %v3098_v21, 16  ;;  %v650_v2 = vrot.slane %v2946_v4, 1 }
  0x26   : > { %v314_v46 = vsel %vm278_vm2, %v309_v30, %v313_v36  ;;  %v317_v53 = vor.u32 %v315_v40, %v313_v36  ;;  %v651_v3 = vrot.slane %v2949_v5, 1  ;;  %v898_v10 = vsel %vm394_vm0, %v2366_v57, 0 }
  0x27   : > { %v361_v52 = vrot.slane %v359_v39, 1  ;;  %v321_v58 = vrot.slane %v3979_v41, 1  ;;  %v3129_v29 = vrot.slane %v287_v11, 3  ;;  %v1055_v30 = vrot.slane %v331_v25, 2 }
  0x28   : > { %v653_v36 = vrot.slane %v2981_v22, 1  ;;  %v1060_v39 = vrot.slane %v335_v26, 3  ;;  %v655_v57 = vrot.slane %v3023_v43, 1  ;;  %v659_v11 = vrot.slane %v3098_v21, 1 }
  0x29   : > { %2556 = vmatmul.mubr.msk.bf16.gmra.mxu0 %vm363_vm1, %v314_v46  ;;  %v362_v59 = vsel %vm278_vm2, %v357_v37, %v361_v52  ;;  %v322_v0 = vsel %vm278_vm2, %v317_v53, %v321_v58  ;;  %v325_v1 = vor.u32 %v3980_v47, %v321_v58  ;;  %v3137_v37 = vsel %vm394_vm0, %v2379_v51, 0 }
  0x2a   : > { %2568 = vmatmul.mubr.msk.bf16.gmra.mxu1 %vm363_vm1, %v362_v59  ;;  %2559 = vmatprep.mubr.msk.bf16.mxu0 %vm363_vm1, %v322_v0  ;;  %v657_v46 = vrot.slane %v3066_v61, 1  ;;  %v661_v52 = vrot.slane %v2964_v14, 1  ;;  %v665_v53 = vrot.slane %v2998_v32, 1  ;;  %v3151_v51 = vrot.slane %v303_v54, 3 }
  0x2b   : > { %2573 = vmatprep.mubr.msk.bf16.mxu1 %vm363_vm1, %v2946_v4  ;;  %v330_v25 = vsel %vm278_vm2, %v325_v1, %v3008_v35  ;;  %v663_v4 = vrot.slane %v2967_v15, 1  ;;  %v3153_v26 = vrot.slane %v307_v7, 2  ;;  %v652_v58 = vsel %vm649_vm3, %v650_v2, %v651_v3 }
  0x2c   : > { %v667_v59 = vrot.slane %v3040_v49, 1  ;;  %v654_v0 = vsel %vm649_vm3, %v651_v3, %v653_v36  ;;  %v846_v35 = vrot.slane %v2949_v5, 2  ;;  %v3981_v1 = vrot.slane %v2981_v22, 2 }
  0x2d   : > { %v669_v41 = vrot.slane %v3087_v9, 1  ;;  %v656_v47 = vsel %vm649_vm3, %v653_v36, %v655_v57  ;;  %v3164_v54 = vsel %vm649_vm3, %v655_v57, %v657_v46  ;;  %v3167_v7 = vsel %vm649_vm3, %v657_v46, %v659_v11  ;;  %v3183_v36 = vld [vmem:[%s3976_s1 + $0xa] sm:$0x3] }
  0x2e   : > { %v3983_v2 = vrot.slane %v2964_v14, 2  ;;  %v3172_v3 = vsel %vm649_vm3, %v659_v11, %v661_v52  ;;  %v3175_v9 = vsel %vm649_vm3, %v661_v52, %v663_v4  ;;  %v3187_v57 = vrot.slane %v291_v12, 2 }
  0x2f   : > { %v3192_v46 = vsel %vm649_vm3, %v665_v53, %v667_v59  ;;  %v1039_v11 = vrot.slane %v299_v48, 2  ;;  %v1040_v52 = vrot.slane %v295_v31, 3  ;;  %v3204_v12 = vsel %vm845_vm4, %v846_v35, %v3981_v1 }
  0x30   : > { %v859_v48 = vrot.slane %v2998_v32, 2  ;;  %v1056_v35 = vrot.slane %v327_v24, 3  ;;  %v1059_v31 = vrot.slane %v339_v27, 2  ;;  %v863_v8 = vrot.slane %v3094_v20, 2 }
  0x31   : > { %2560 = vmatmul.mubr.msk.bf16.gmra.mxu0 %vm363_vm1, %v330_v25  ;;  %v3178_v25 = vsel %vm649_vm3, %v663_v4, %v665_v53  ;;  %v857_v4 = vrot.slane %v2967_v15, 2  ;;  %v3207_v53 = vsel %vm649_vm3, %v667_v59, %v669_v41  ;;  %v861_v41 = vrot.slane %v3040_v49, 2  ;;  %v3223_v59 = vld [vmem:[%s2943_s7 + $0x58] sm:$0xf] }
  0x32   : > { %2595 = vmatprep.mubr.msk.bf16.mxu0 %vm363_vm1, %v652_v58  ;;  %2574 = vmatmul.mubr.msk.bf16.vlgmr.msra.gmra.mxu1 %vm363_vm1, %v2949_v5  ;;  %v3235_v60 = vor.u32 %v1056_v35, %v1055_v30  ;;  %v1063_v16 = vrot.slane %v347_v55, 2  ;;  %v1061_v1 = vor.u32 %v1060_v39, %v1059_v31  ;;  %v3254_v30 = vcombine.low %v3223_v59, %v3223_v59 }
  0x33   : > { %2577 = vmatprep.mubr.msk.bf16.mxu1 %vm363_vm1, %v2981_v22  ;;  %2616 = vmatpush3.bf16.msra.mxu1 %v898_v10  ;;  %v3217_v10 = vsel %vm845_vm4, %v3983_v2, %v857_v4  ;;  %v3228_v58 = vsel %vm845_vm4, %v857_v4, %v859_v48  ;;  %v3233_v2 = vor.u32 %v1040_v52, %v1039_v11  ;;  %v3245_v4 = vld [vmem:[%s3976_s1 + $0xc] sm:$0x3]  ;;  %v1064_v11 = vrot.slane %v343_v42, 3 }
  0x34   : > { %2755 = vmatprep.subr.msk.bf16.mxu1 %vm394_vm0, %v3183_v36  ;;  %3989 = vst [vmem:[#allocation2_spill] sm:$0xff] %v3228_v58  ;;  %v3238_v24 = vsel %vm845_vm4, %v859_v48, %v861_v41  ;;  %v3248_v27 = vsel %vm845_vm4, %v861_v41, %v863_v8  ;;  %v3259_v55 = vrot.slane %v315_v40, 2  ;;  %v3992_v52 = vshrl.u32 %v3040_v49, 16 }
  0x35   : > { %3990 = vst [vmem:[#allocation3_spill] sm:$0xff] %v3238_v24  ;;  %3991 = vst [vmem:[#allocation4_spill] sm:$0xff] %v3248_v27  ;;  %v3993_v39 = vshll.u32 %v3040_v49, 16  ;;  %v1072_v35 = vshrl.u32 %v3094_v20, 16  ;;  %v3270_v42 = vsel %vm1035_vm5, %v3235_v60, %v1061_v1  ;;  %v865_v40 = vrot.slane %v3254_v30, 2 }
  0x36   : > { %v1067_v48 = vrot.slane %v3992_v52, 2  ;;  %3994 = vst [vmem:[#allocation5_spill] sm:$0xff] %v3270_v42  ;;  %v1075_v41 = vshll.u32 %v3094_v20, 16  ;;  %v1081_v24 = vshrl.u32 %v3254_v30, 16 }
  0x37   : > { %v1068_v31 = vrot.slane %v3993_v39, 3  ;;  %v1074_v39 = vrot.slane %v1072_v35, 2 }
  0x38   : > { %v1077_v27 = vrot.slane %v1075_v41, 3  ;;  %v1083_v58 = vrot.slane %v1081_v24, 2 }
  0x39   : > { %2596 = vmatmul.mubr.msk.bf16.vlgmr.msra.gmra.mxu0 %vm363_vm1, %v654_v0  ;;  %v1065_v0 = vor.u32 %v1064_v11, %v1063_v16  ;;  %v1069_v52 = vor.u32 %v1068_v31, %v1067_v48  ;;  %v3286_v11 = vsel %vm845_vm4, %v863_v8, %v865_v40  ;;  %v1261_v31 = vrot.slane %v3023_v43, 3 }
  0x3a   : > { %2638 = vmatpush3.bf16.msra.mxu0 %v3137_v37  ;;  %2599 = vmatprep.mubr.msk.bf16.mxu0 %vm363_vm1, %v656_v47  ;;  %v1258_v37 = vrot.slane %v2949_v5, 3  ;;  %v1259_v47 = vrot.slane %v2981_v22, 3  ;;  %v1084_v5 = vshll.u32 %v3254_v30, 16  ;;  %v1078_v35 = vor.u32 %v1077_v27, %v1074_v39 }
  0x3b   : > { %2578 = vmatmul.mubr.msk.bf16.gmra.mxu1 %vm363_vm1, %v3023_v43  ;;  %2756 = vmatprep.subr.msk.bf16.mxu0 %vm394_vm0, %v3245_v4  ;;  %v3283_v16 = vsel %vm1035_vm5, %v1061_v1, %v1065_v0  ;;  %v3290_v42 = vsel %vm1035_vm5, %v1065_v0, %v1069_v52  ;;  %v1263_v1 = vrot.slane %v3066_v61, 3  ;;  %v3300_v8 = vcombine.low %v2971_v17, %v2991_v28 }
  0x3c   : > { %2581 = vmatprep.mubr.msk.bf16.mxu1 %vm363_vm1, %v3066_v61  ;;  %v3293_v48 = vsel %vm1257_vm6, %v1258_v37, %v1259_v47  ;;  %v1086_v40 = vrot.slane %v1084_v5, 3  ;;  %v3303_v41 = vsel %vm1257_vm6, %v1259_v47, %v1261_v31  ;;  %v1265_v0 = vrot.slane %v3098_v21, 3 }
  0x3d   : > { %3995 = vst [vmem:[#allocation6_spill] sm:$0xff] %v3293_v48  ;;  %v3308_v37 = vcombine.low %v3001_v33, %v3026_v44  ;;  %v3311_v48 = vsel %vm1035_vm5, %v1069_v52, %v1078_v35  ;;  %v3314_v24 = vsel %vm1257_vm6, %v1261_v31, %v1263_v1  ;;  %v1267_v27 = vrot.slane %v2964_v14, 3 }
  0x3e   : > { %v3319_v17 = vcombine.low %v3029_v45, %v3069_v62  ;;  %v1087_v28 = vor.u32 %v1086_v40, %v1083_v58  ;;  %v3324_v39 = vsel %vm1257_vm6, %v1263_v1, %v1265_v0  ;;  %v1269_v33 = vrot.slane %v2967_v15, 3 }
  0x3f   : > { %v3329_v44 = vcombine.low %v3072_v63, %v2952_v6  ;;  %v3334_v52 = vsel %vm1257_vm6, %v1265_v0, %v1267_v27  ;;  %v1271_v45 = vrot.slane %v2998_v32, 3  ;;  %v1273_v62 = vrot.slane %v3040_v49, 3 }
  0x40   : > { %v3345_v6 = vsel %vm1035_vm5, %v1078_v35, %v1087_v28  ;;  %v3348_v63 = vsel %vm1257_vm6, %v1267_v27, %v1269_v33  ;;  %v3353_v58 = vcombine.low %v2984_v23, %v3004_v34  ;;  %v1277_v47 = vrot.slane %v3254_v30, 3 }
  0x41   : > { %2600 = vmatmul.mubr.msk.bf16.gmra.mxu0 %vm363_vm1, %v3164_v54  ;;  %v3340_v54 = vcombine.low %v2961_v13, %v2974_v18  ;;  %v3358_v13 = vsel %vm1257_vm6, %v1269_v33, %v1271_v45  ;;  %v3361_v18 = vsel %vm1257_vm6, %v1271_v45, %v1273_v62  ;;  %v3366_v5 = vcombine.low %v3014_v38, %v3043_v50 }
  0x42   : > { %2603 = vmatprep.mubr.msk.bf16.mxu0 %vm363_vm1, %v3167_v7  ;;  %v1275_v7 = vrot.slane %v3094_v20, 3  ;;  %v3373_v23 = vcombine.low %v3054_v56, %v3223_v59  ;;  %v1632_v34 = vshrl.u32 %v3300_v8, 16  ;;  %v1634_v31 = vshll.u32 %v3300_v8, 16 }
  0x43   : > { %2582 = vmatmul.mubr.msk.bf16.gmra.mxu1 %vm363_vm1, %v3098_v21  ;;  %v1638_v30 = vshll.u32 %v3308_v37, 16  ;;  %v1642_v1 = vshrl.u32 %v3308_v37, 16  ;;  %v1645_v38 = vshll.u32 %v3319_v17, 16  ;;  %v1649_v40 = vshrl.u32 %v3319_v17, 16 }
  0x44   : > { %2585 = vmatprep.mubr.msk.bf16.mxu1 %vm363_vm1, %v2964_v14  ;;  %v3369_v20 = vsel %vm1257_vm6, %v1273_v62, %v1275_v7  ;;  %v3378_v35 = vsel %vm1257_vm6, %v1275_v7, %v1277_v47  ;;  %v1636_v50 = vrot.slane %v1634_v31, 1  ;;  %v1652_v0 = vshll.u32 %v3329_v44, 16 }
  0x45   : > { %3996 = vst [vmem:[#allocation7_spill] sm:$0xff] %v3378_v35  ;;  %v1874_v56 = vrot.slane %v3300_v8, 1  ;;  %v1640_v59 = vrot.slane %v1638_v30, 1  ;;  %v1647_v27 = vrot.slane %v1645_v38, 1  ;;  %v1875_v28 = vrot.slane %v3308_v37, 1 }
  0x46   : > { %v1656_v33 = vshrl.u32 %v3329_v44, 16  ;;  %v1637_v45 = vor.u32 %v1636_v50, %v1632_v34  ;;  %v1654_v62 = vrot.slane %v1652_v0, 1  ;;  %v1659_v7 = vshll.u32 %v2976_v19, 16 }
  0x47   : > { %v1877_v47 = vrot.slane %v3319_v17, 1  ;;  %v1644_v31 = vor.u32 %v1642_v1, %v1640_v59  ;;  %v1651_v35 = vor.u32 %v1649_v40, %v1647_v27  ;;  %v3395_v30 = vsel %vm649_vm3, %v1874_v56, %v1875_v28 }
  0x48   : > { %v1663_v38 = vshrl.u32 %v2976_v19, 16  ;;  %v1658_v34 = vor.u32 %v1656_v33, %v1654_v62  ;;  %v1661_v50 = vrot.slane %v1659_v7, 1  ;;  %v1879_v40 = vrot.slane %v3329_v44, 1 }
  0x49   : > { %2604 = vmatmul.mubr.msk.bf16.gmra.mxu0 %vm363_vm1, %v3172_v3  ;;  %v3401_v3 = vsel %vm278_vm2, %v1637_v45, %v1640_v59  ;;  %v3404_v0 = vsel %vm649_vm3, %v1875_v28, %v1877_v47  ;;  %v3412_v1 = vsel %vm278_vm2, %v1651_v35, %v1654_v62  ;;  %v1670_v28 = vshrl.u32 %v3340_v54, 16 }
  0x4a   : > { %2607 = vmatprep.mubr.msk.bf16.mxu0 %vm363_vm1, %v3175_v9  ;;  %3997 = vst [vmem:[#allocation8_spill] sm:$0xff] %v3404_v0  ;;  %v3409_v9 = vsel %vm278_vm2, %v1644_v31, %v1647_v27  ;;  %3999 = vst [vmem:[#allocation10_spill] sm:$0xff] %v3412_v1  ;;  %v3417_v56 = vsel %vm278_vm2, %v1658_v34, %v1661_v50  ;;  %v1665_v59 = vor.u32 %v1663_v38, %v1661_v50  ;;  %v3430_v34 = vld [vmem:[%s2943_s7 + $0x5c] sm:$0xff]  }
  0x4b   : > { %2586 = vmatmul.mubr.msk.bf16.gmra.mxu1 %vm363_vm1, %v2967_v15  ;;  %3998 = vst [vmem:[#allocation9_spill] sm:$0xff] %v3409_v9  ;;  %v1666_v15 = vshll.u32 %v3340_v54, 16  ;;  %4000 = vst [vmem:[#allocation11_spill] sm:$0xff] %v3417_v56  ;;  %v3422_v27 = vsel %vm649_vm3, %v1877_v47, %v1879_v40  ;;  %v1881_v35 = vrot.slane %v2976_v19, 1  ;;  %v1677_v45 = vshrl.u32 %v3353_v58, 16 }
  0x4c   : > { %2589 = vmatprep.mubr.msk.bf16.mxu1 %vm363_vm1, %v2998_v32  ;;  %v1673_v32 = vshll.u32 %v3353_v58, 16  ;;  %4001 = vst [vmem:[#allocation12_spill] sm:$0xff] %v3422_v27  ;;  %v1680_v7 = vshll.u32 %v3366_v5, 16  ;;  %v1883_v31 = vrot.slane %v3340_v54, 1  ;;  %v1684_v38 = vshrl.u32 %v3366_v5, 16 }
  0x4d   : > { %v1668_v33 = vrot.slane %v1666_v15, 1  ;;  %v3436_v47 = vsel %vm649_vm3, %v1879_v40, %v1881_v35  ;;  %v1687_v56 = vshll.u32 %v3373_v23, 16  ;;  %v2825_v27 = vld [vmem:[%s2943_s7 + $0x64] ss:$0 sps:$4 sm:$0x11]   ;;  %v1885_v9 = vrot.slane %v3353_v58, 1 }
  0x4e   : > { %v1675_v62 = vrot.slane %v1673_v32, 1  ;;  %v1682_v0 = vrot.slane %v1680_v7, 1  ;;  %v3443_v1 = vsel %vm649_vm3, %v1881_v35, %v1883_v31  ;;  %v1698_v7 = vshrl.u32 %v3430_v34, 16 }
  0x4f   : > { %v3433_v50 = vsel %vm278_vm2, %v1665_v59, %v1668_v33  ;;  %v1672_v15 = vor.u32 %v1670_v28, %v1668_v33  ;;  %v1689_v40 = vrot.slane %v1687_v56, 1  ;;  %v1691_v28 = vshrl.u32 %v3373_v23, 16 }
  0x50   : > { %v1679_v32 = vor.u32 %v1677_v45, %v1675_v62  ;;  %v1694_v33 = vshll.u32 %v3430_v34, 16  ;;  %v1686_v35 = vor.u32 %v1684_v38, %v1682_v0  ;;  %v3459_v45 = vsel %vm649_vm3, %v1883_v31, %v1885_v9 }
  0x51   : > { %2608 = vmatmul.mubr.msk.bf16.gmra.mxu0 %vm363_vm1, %v3178_v25  ;;  %v3449_v59 = vsel %vm278_vm2, %v1672_v15, %v1675_v62  ;;  %v1693_v56 = vor.u32 %v1691_v28, %v1689_v40  ;;  %v1702_v15 = vshll.u32 %v2825_v27, 16  ;;  %v1891_v31 = vrot.slane %v3430_v34, 1 }
  0x52   : > { %2611 = vmatprep.mubr.msk.bf16.mxu0 %vm363_vm1, %v3192_v46  ;;  %4002 = vst [vmem:[#allocation13_spill] sm:$0xff] %v3449_v59  ;;  %v3456_v25 = vsel %vm278_vm2, %v1679_v32, %v1682_v0  ;;  %v1887_v46 = vrot.slane %v3366_v5, 1  ;;  %v1696_v62 = vrot.slane %v1694_v33, 1  ;;  %v3466_v59 = vsel %vm278_vm2, %v1686_v35, %v1689_v40 }
  0x53   : > { %2590 = vmatmul.mubr.msk.bf16.gmra.mxu1 %vm363_vm1, %v3040_v49  ;;  %4003 = vst [vmem:[#allocation14_spill] sm:$0xff] %v3466_v59  ;;  %v1889_v0 = vrot.slane %v3373_v23, 1  ;;  %v1893_v28 = vrot.slane %v2825_v27, 1  ;;  %v4005_v33 = vor.u32 %v3129_v29, %v3187_v57  ;;  %v4006_v35 = vshll.u32 %v3066_v61, 16 }
  0x54   : > { %2617 = vmatprep.mubr.msk.bf16.mxu1 %vm363_vm1, %v3204_v12  ;;  %v3469_v49 = vsel %vm649_vm3, %v1885_v9, %v1887_v46  ;;  %v3474_v38 = vsel %vm278_vm2, %v1693_v56, %v1696_v62  ;;  %v1700_v32 = vor.u32 %v1698_v7, %v1696_v62  ;;  %v1704_v12 = vrot.slane %v1702_v15, 1 }
  0x55   : > { %4004 = vst [vmem:[#allocation15_spill] sm:$0xff] %v3469_v49  ;;  %v1042_v40 = vsel %vm1035_vm5, %v4005_v33, %v3233_v2  ;;  %v1048_v9 = vrot.slane %v4006_v35, 3  ;;  %v3484_v59 = vsel %vm649_vm3, %v1887_v46, %v1889_v0  ;;  %v3487_v49 = vsel %vm649_vm3, %v1889_v0, %v1891_v31  ;;  %v2434_v35 = vld [vmem:[%s3976_s1 + $0x10] sm:$0x3] }
  0x56   : > { %v4007_v56 = vrot.slane %v3023_v43, 2  ;;  %v4008_v62 = vrot.slane %v2981_v22, 2  ;;  %v3495_v7 = vsel %vm278_vm2, %v1700_v32, %v1704_v12  ;;  %v3498_v29 = vsel %vm649_vm3, %v1891_v31, %v1893_v28  ;;  %v2422_v31 = vld [vmem:[%s3976_s1 + $0xe] sm:$0x3] }
  0x57   : > { %v4009_v57 = vrot.slane %v3066_v61, 2  ;;  %v1310_v22 = vsel %vm394_vm0, %v3183_v36, 0  ;;  %v1045_v0 = vor.u32 %v3151_v51, %v3153_v26  ;;  %v853_v43 = vrot.slane %v3098_v21, 2 }
  0x58   : > { %v850_v27 = vsel %vm845_vm4, %v4008_v62, %v4007_v56  ;;  %v4010_v46 = vmov %v4007_v56  ;;  %v4011_v51 = vshrl.u32 %v3098_v21, 16  ;;  %v4012_v32 = vshll.u32 %v3098_v21, 16  ;;  %v4016_v56 = vld [vmem:[#allocation5_spill] sm:$0xff]  ;;  %v4017_v62 = vld [vmem:[#allocation3_spill] sm:$0xff] }
  0x59   : > { %2612 = vmatmul.mubr.msk.bf16.gmra.mxu0 %vm363_vm1, %v3207_v53  ;;  %v852_v15 = vsel %vm845_vm4, %v4010_v46, %v4009_v57  ;;  %v1049_v53 = vor.u32 %v1048_v9, %v3259_v55  ;;  %v1046_v36 = vsel %vm1035_vm5, %v3233_v2, %v1045_v0  ;;  %v1492_v28 = vsel %vm394_vm0, %v3245_v4, 0 }
  0x5a   : > { %2639 = vmatprep.mubr.msk.bf16.mxu0 %vm363_vm1, %v1042_v40  ;;  %v1051_v26 = vrot.slane %v4011_v51, 2  ;;  %v1052_v12 = vrot.slane %v4012_v32, 3  ;;  %v4013_v33 = vmov %v4009_v57  ;;  %v4014_v2 = vrot.slane %v2964_v14, 2  ;;  %v4015_v14 = vld [vmem:[#allocation2_spill] sm:$0xff] }
  0x5b   : > { %2618 = vmatmul.mubr.msk.bf16.vlgmr.msra.gmra.mxu1 %vm363_vm1, %v850_v27  ;;  %v1050_v55 = vsel %vm1035_vm5, %v1045_v0, %v1049_v53  ;;  %v854_v40 = vsel %vm845_vm4, %v4013_v33, %v853_v43 }
  0x5c   : > { %2621 = vmatprep.mubr.msk.bf16.mxu1 %vm363_vm1, %v852_v15  ;;  %2660 = vmatpush3.bf16.msra.mxu1 %v1310_v22  ;;  %v856_v21 = vsel %vm845_vm4, %v853_v43, %v4014_v2  ;;  %v1053_v4 = vor.u32 %v1052_v12, %v1051_v26 }
  0x5d   : > { %2757 = vmatprep.subr.msk.bf16.mxu1 %vm394_vm0, %v2422_v31 }
  0x5e   : > { %v1054_v61 = vsel %vm1035_vm5, %v1049_v53, %v1053_v4  ;;  %v1058_v9 = vsel %vm1035_vm5, %v1053_v4, %v3235_v60  ;;  %v4018_v60 = vld [vmem:[#allocation4_spill] sm:$0xff] }
  0x61   : > { %2640 = vmatmul.mubr.msk.bf16.vlgmr.msra.gmra.mxu0 %vm363_vm1, %v1046_v36 }
  0x62   : > { %2682 = vmatpush3.bf16.msra.mxu0 %v1492_v28  ;;  %2643 = vmatprep.mubr.msk.bf16.mxu0 %vm363_vm1, %v1050_v55 }
  0x63   : > { %2622 = vmatmul.mubr.msk.bf16.gmra.mxu1 %vm363_vm1, %v854_v40  ;;  %2758 = vmatprep.subr.msk.bf16.mxu0 %vm394_vm0, %v2434_v35 }
  0x64   : > { %2625 = vmatprep.mubr.msk.bf16.mxu1 %vm363_vm1, %v856_v21 }
  0x69   : > { %2644 = vmatmul.mubr.msk.bf16.gmra.mxu0 %vm363_vm1, %v1054_v61 }
  0x6a   : > { %2647 = vmatprep.mubr.msk.bf16.mxu0 %vm363_vm1, %v1058_v9 }
  0x6b   : > { %2626 = vmatmul.mubr.msk.bf16.gmra.mxu1 %vm363_vm1, %v3217_v10  ;;  %v4019_v10 = vld [vmem:[#allocation6_spill] sm:$0xff] }
  0x6c   : > { %2629 = vmatprep.mubr.msk.bf16.mxu1 %vm363_vm1, %v4015_v14 }
  0x71   : > { %2648 = vmatmul.mubr.msk.bf16.gmra.mxu0 %vm363_vm1, %v4016_v56 }
  0x72   : > { %2651 = vmatprep.mubr.msk.bf16.mxu0 %vm363_vm1, %v3283_v16  ;;  %v1737_v16 = vsel %vm394_vm0, %v2422_v31, 0 }
  0x73   : > { %2630 = vmatmul.mubr.msk.bf16.gmra.mxu1 %vm363_vm1, %v4017_v62 }
  0x74   : > { %2633 = vmatprep.mubr.msk.bf16.mxu1 %vm363_vm1, %v4018_v60 }
  0x79   : > { %2652 = vmatmul.mubr.msk.bf16.gmra.mxu0 %vm363_vm1, %v3290_v42  ;;  %v1926_v42 = vsel %vm394_vm0, %v2434_v35, 0 }
  0x7a   : > { %2655 = vmatprep.mubr.msk.bf16.mxu0 %vm363_vm1, %v3311_v48  ;;  %v4022_v48 = vld [vmem:[#allocation10_spill] sm:$0xff] }
  0x7b   : > { %2634 = vmatmul.mubr.msk.bf16.gmra.mxu1 %vm363_vm1, %v3286_v11  ;;  %v4021_v11 = vld [vmem:[#allocation9_spill] sm:$0xff] }
  0x7c   : > { %2661 = vmatprep.mubr.msk.bf16.mxu1 %vm363_vm1, %v4019_v10 }
  0x81   : > { %2656 = vmatmul.mubr.msk.bf16.gmra.mxu0 %vm363_vm1, %v3345_v6 }
  0x82   : > { %2683 = vmatprep.mubr.msk.bf16.mxu0 %vm363_vm1, %v3300_v8  ;;  %v4023_v8 = vld [vmem:[#allocation8_spill] sm:$0xff] }
  0x83   : > { %2662 = vmatmul.mubr.msk.bf16.vlgmr.msra.gmra.mxu1 %vm363_vm1, %v3303_v41  ;;  %v4024_v41 = vld [vmem:[#allocation12_spill] sm:$0xff] }
  0x84   : > { %2665 = vmatprep.mubr.msk.bf16.mxu1 %vm363_vm1, %v3314_v24  ;;  %2704 = vmatpush3.bf16.msra.mxu1 %v1737_v16  ;;  %v4026_v24 = vld [vmem:[#allocation13_spill] sm:$0xff] }
  0x89   : > { %2684 = vmatmul.mubr.msk.bf16.vlgmr.msra.gmra.mxu0 %vm363_vm1, %v3308_v37  ;;  %v4025_v37 = vld [vmem:[#allocation11_spill] sm:$0xff] }
  0x8a   : > { %2726 = vmatpush3.bf16.msra.mxu0 %v1926_v42  ;;  %2687 = vmatprep.mubr.msk.bf16.mxu0 %vm363_vm1, %v3319_v17  ;;  %v4027_v17 = vld [vmem:[#allocation15_spill] sm:$0xff] }
  0x8b   : > { %2666 = vmatmul.mubr.msk.bf16.gmra.mxu1 %vm363_vm1, %v3324_v39  ;;  %v4028_v39 = vld [vmem:[#allocation14_spill] sm:$0xff] }
  0x8c   : > { %2669 = vmatprep.mubr.msk.bf16.mxu1 %vm363_vm1, %v3334_v52 }
  0x91   : > { %2688 = vmatmul.mubr.msk.bf16.gmra.mxu0 %vm363_vm1, %v3329_v44 }
  0x92   : > { %2691 = vmatprep.mubr.msk.bf16.mxu0 %vm363_vm1, %v2976_v19  ;;  %v4020_v19 = vld [vmem:[#allocation7_spill] sm:$0xff] }
  0x93   : > { %2670 = vmatmul.mubr.msk.bf16.gmra.mxu1 %vm363_vm1, %v3348_v63 }
  0x94   : > { %2673 = vmatprep.mubr.msk.bf16.mxu1 %vm363_vm1, %v3358_v13 }
  0x99   : > { %2692 = vmatmul.mubr.msk.bf16.gmra.mxu0 %vm363_vm1, %v3340_v54 }
  0x9a   : > { %2695 = vmatprep.mubr.msk.bf16.mxu0 %vm363_vm1, %v3353_v58 }
  0x9b   : > { %2674 = vmatmul.mubr.msk.bf16.gmra.mxu1 %vm363_vm1, %v3361_v18 }
  0x9c   : > { %2677 = vmatprep.mubr.msk.bf16.mxu1 %vm363_vm1, %v3369_v20 }
  0xa1   : > { %2696 = vmatmul.mubr.msk.bf16.gmra.mxu0 %vm363_vm1, %v3366_v5 }
  0xa2   : > { %2699 = vmatprep.mubr.msk.bf16.mxu0 %vm363_vm1, %v3373_v23 }
  0xa3   : > { %2678 = vmatmul.mubr.msk.bf16.gmra.mxu1 %vm363_vm1, %v4020_v19 }
  0xa4   : > { %2705 = vmatprep.mubr.msk.bf16.mxu1 %vm363_vm1, %v3401_v3 }
  0xa9   : > { %2700 = vmatmul.mubr.msk.bf16.gmra.mxu0 %vm363_vm1, %v3430_v34 }
  0xaa   : > { %2727 = vmatprep.mubr.msk.bf16.mxu0 %vm363_vm1, %v3395_v30 }
  0xab   : > { %2706 = vmatmul.mubr.msk.bf16.vlgmr.msra.gmra.mxu1 %vm363_vm1, %v4021_v11 }
  0xac   : > { %2709 = vmatprep.mubr.msk.bf16.mxu1 %vm363_vm1, %v4022_v48 }
  0xb1   : > { %2728 = vmatmul.mubr.msk.bf16.vlgmr.msra.gmra.mxu0 %vm363_vm1, %v4023_v8 }
  0xb2   : > { %2731 = vmatprep.mubr.msk.bf16.mxu0 %vm363_vm1, %v4024_v41 }
  0xb3   : > { %2710 = vmatmul.mubr.msk.bf16.gmra.mxu1 %vm363_vm1, %v4025_v37 }
  0xb4   : > { %2713 = vmatprep.mubr.msk.bf16.mxu1 %vm363_vm1, %v3433_v50 }
  0xb9   : > { %2732 = vmatmul.mubr.msk.bf16.gmra.mxu0 %vm363_vm1, %v3436_v47 }
  0xba   : > { %2735 = vmatprep.mubr.msk.bf16.mxu0 %vm363_vm1, %v3443_v1 }
  0xbb   : > { %2714 = vmatmul.mubr.msk.bf16.gmra.mxu1 %vm363_vm1, %v4026_v24 }
  0xbc   : > { %2717 = vmatprep.mubr.msk.bf16.mxu1 %vm363_vm1, %v3456_v25 }
  0xc1   : > { %2736 = vmatmul.mubr.msk.bf16.gmra.mxu0 %vm363_vm1, %v3459_v45 }
  0xc2   : > { %2739 = vmatprep.mubr.msk.bf16.mxu0 %vm363_vm1, %v4027_v17 }
  0xc3   : > { %2718 = vmatmul.mubr.msk.bf16.gmra.mxu1 %vm363_vm1, %v4028_v39 }
  0xc4   : > { %2721 = vmatprep.mubr.msk.bf16.mxu1 %vm363_vm1, %v3474_v38 }
  0xc9   : > { %2740 = vmatmul.mubr.msk.bf16.gmra.mxu0 %vm363_vm1, %v3484_v59 }
  0xca   : > { %2743 = vmatprep.mubr.msk.bf16.mxu0 %vm363_vm1, %v3487_v49 }
  0xcb   : > { %2722 = vmatmul.mubr.msk.bf16.gmra.mxu1 %vm363_vm1, %v3495_v7 }
  0xd1   : > { %2744 = vmatmul.mubr.msk.bf16.gmra.mxu0 %vm363_vm1, %v3498_v29 }
  0xe1   : > { %v2553_v44 = vpop.f32.mrf.mxu0 }
  0xe2   : > { %v3650_v52 = vpop.f32.mrf.mxu1 }
  0xe3   : > { %v432_v54 = vpop.f32.mrf.mxu0 }
  0xe4   : > { %v3652_v6 = vpop.f32.mrf.mxu1 }
  0xe5   : > { %v2554_v63 = vpop.f32.mrf.mxu0 }
  0xe6   : > { %v3654_v58 = vpop.f32.mrf.mxu1 }
  0xe7   : > { %v435_v13 = vpop.f32.mrf.mxu0 }
  0xe8   : > { %v3656_v18 = vpop.f32.mrf.mxu1 }
  0xe9   : > { %v2557_v5 = vpop.f32.mrf.mxu0 }
  0xea   : > { %v3658_v20 = vpop.f32.mrf.mxu1 }
  0xeb   : > { %v448_v23 = vpop.f32.mrf.mxu0 }
  0xec   : > { %v3660_v30 = vpop.f32.mrf.mxu1 }
  0xed   : > { %v2558_v3 = vpop.f32.mrf.mxu0 }
  0xee   : > { %v3662_v1 = vpop.f32.mrf.mxu1 }
  0xef   : > { %v451_v34 = vpop.f32.mrf.mxu0 }
  0xf0   : > { %v3664_v50 = vpop.f32.mrf.mxu1 }
  0xf1   : > { %v2561_v47 = vpop.f32.mrf.mxu0 }
  0xf2   : > { %v2575_v59 = vpop.f32.mrf.mxu1 }
  0xf3   : > { %v464_v25 = vpop.f32.mrf.mxu0  ;;  %v577_v45 = vadd.f32 %v2575_v59, %v2553_v44 }
  0xf4   : > { %v568_v49 = vpop.f32.mrf.mxu1 }
  0xf5   : > { %v2562_v38 = vpop.f32.mrf.mxu0  ;;  %v569_v27 = vadd.f32 %v568_v49, %v432_v54 }
  0xf6   : > { %v2576_v7 = vpop.f32.mrf.mxu1 }
  0xf7   : > { %v467_v29 = vpop.f32.mrf.mxu0  ;;  %v580_v57 = vadd.f32 %v2576_v7, %v2554_v63 }
  0xf8   : > { %v571_v46 = vpop.f32.mrf.mxu1 }
  0xf9   : > { %v2597_v15 = vpop.f32.mrf.mxu0  ;;  %v572_v22 = vadd.f32 %v571_v46, %v435_v13 }
  0xfa   : > { %v3666_v0 = vadd.f32 %v2597_v15, %v577_v45 }
  0xfb   : > { %v2579_v31 = vpop.f32.mrf.mxu1  ;;  %v738_v53 = vpop.f32.mrf.mxu0 }
  0xfc   : > { %v593_v43 = vadd.f32 %v2579_v31, %v2557_v5  ;;  %v3668_v36 = vadd.f32 %v738_v53, %v569_v27 }
  0xfd   : > { %v584_v51 = vpop.f32.mrf.mxu1  ;;  %v2598_v26 = vpop.f32.mrf.mxu0 }
  0xfe   : > { %v585_v32 = vadd.f32 %v584_v51, %v448_v23  ;;  %v3670_v12 = vadd.f32 %v2598_v26, %v580_v57 }
  0xff   : > { %v2580_v28 = vpop.f32.mrf.mxu1  ;;  %v741_v55 = vpop.f32.mrf.mxu0 }
 0x100   : > { %v596_v33 = vadd.f32 %v2580_v28, %v2558_v3  ;;  %v3672_v40 = vadd.f32 %v741_v55, %v572_v22 }
 0x101   : > { %v587_v35 = vpop.f32.mrf.mxu1  ;;  %v2601_v2 = vpop.f32.mrf.mxu0 }
 0x102   : > { %v588_v21 = vadd.f32 %v587_v35, %v451_v34  ;;  %v3674_v4 = vadd.f32 %v2601_v2, %v593_v43 }
 0x103   : > { %v2583_v61 = vpop.f32.mrf.mxu1  ;;  %v754_v9 = vpop.f32.mrf.mxu0 }
 0x104   : > { %v609_v14 = vadd.f32 %v2583_v61, %v2561_v47  ;;  %v3676_v56 = vadd.f32 %v754_v9, %v585_v32 }
 0x105   : > { %v600_v62 = vpop.f32.mrf.mxu1  ;;  %v2602_v60 = vpop.f32.mrf.mxu0 }
 0x106   : > { %v601_v10 = vadd.f32 %v600_v62, %v464_v25  ;;  %v3678_v16 = vadd.f32 %v2602_v60, %v596_v33  ;;  %v3986_v25 = vmov 0.0  }
 0x107   : > { %v2584_v42 = vpop.f32.mrf.mxu1  ;;  %v757_v19 = vpop.f32.mrf.mxu0  ;;  %2075 = vmatprep.subr.mxu1 %v3986_v25  ;;  %2165 = vmatprep.subr.mxu0 %v3986_v25 }
 0x108   : > { %v612_v11 = vadd.f32 %v2584_v42, %v2562_v38  ;;  %v3680_v48 = vadd.f32 %v757_v19, %v588_v21 }
 0x109   : > { %v603_v8 = vpop.f32.mrf.mxu1  ;;  %v2605_v41 = vpop.f32.mrf.mxu0 }
 0x10a   : > { %v604_v37 = vadd.f32 %v603_v8, %v467_v29  ;;  %v3682_v24 = vadd.f32 %v2605_v41, %v609_v14 }
 0x10b   : > { %v2587_v17 = vpop.f32.mrf.mxu1  ;;  %v770_v39 = vpop.f32.mrf.mxu0 }
 0x10c   : > { %v625_v44 = vadd.f32 %v2587_v17, %v3650_v52  ;;  %v3685_v54 = vadd.f32 %v770_v39, %v601_v10 }
 0x10d   : > { %v616_v63 = vpop.f32.mrf.mxu1  ;;  %v2606_v13 = vpop.f32.mrf.mxu0 }
 0x10e   : > { %v617_v5 = vadd.f32 %v616_v63, %v3652_v6  ;;  %v3688_v23 = vadd.f32 %v2606_v13, %v612_v11 }
 0x10f   : > { %v2588_v3 = vpop.f32.mrf.mxu1  ;;  %v773_v34 = vpop.f32.mrf.mxu0 }
 0x110   : > { %v628_v47 = vadd.f32 %v2588_v3, %v3654_v58  ;;  %v3691_v59 = vadd.f32 %v773_v34, %v604_v37 }
 0x111   : > { %v619_v52 = vpop.f32.mrf.mxu1  ;;  %v2609_v45 = vpop.f32.mrf.mxu0 }
 0x112   : > { %v620_v49 = vadd.f32 %v619_v52, %v3656_v18  ;;  %v3696_v38 = vadd.f32 %v2609_v45, %v625_v44 }
 0x113   : > { %v2591_v6 = vpop.f32.mrf.mxu1  ;;  %v786_v27 = vpop.f32.mrf.mxu0 }
 0x114   : > { %v641_v7 = vadd.f32 %v2591_v6, %v3658_v20  ;;  %v3699_v29 = vadd.f32 %v786_v27, %v617_v5 }
 0x115   : > { %v632_v58 = vpop.f32.mrf.mxu1  ;;  %v2610_v57 = vpop.f32.mrf.mxu0 }
 0x116   : > { %v633_v46 = vadd.f32 %v632_v58, %v3660_v30  ;;  %v3702_v15 = vadd.f32 %v2610_v57, %v628_v47  ;;  %v2063_v57 = vlaneseq }
 0x117   : > { %v2592_v22 = vpop.f32.mrf.mxu1  ;;  %v789_v31 = vpop.f32.mrf.mxu0 }
 0x118   : > { %v644_v53 = vadd.f32 %v2592_v22, %v3662_v1  ;;  %v3705_v43 = vadd.f32 %v789_v31, %v620_v49 }
 0x119   : > { %v635_v18 = vpop.f32.mrf.mxu1  ;;  %v2613_v51 = vpop.f32.mrf.mxu0 }
 0x11a   : > { %v636_v26 = vadd.f32 %v635_v18, %v3664_v50  ;;  %v3708_v32 = vadd.f32 %v2613_v51, %v641_v7 }
 0x11b   : > { %v2619_v20 = vpop.f32.mrf.mxu1  ;;  %v802_v28 = vpop.f32.mrf.mxu0 }
 0x11c   : > { %v1015_v55 = vadd.f32 %v2619_v20, %v3666_v0  ;;  %v3711_v33 = vadd.f32 %v802_v28, %v633_v46 }
 0x11d   : > { %v934_v30 = vpop.f32.mrf.mxu1  ;;  %v2614_v35 = vpop.f32.mrf.mxu0 }
 0x11e   : > { %v1013_v2 = vadd.f32 %v934_v30, %v3668_v36  ;;  %v3714_v21 = vadd.f32 %v2614_v35, %v644_v53  ;;  %v2064_v53 = vshrl.u32 %v2063_v57, 7 }
 0x11f   : > { %v2620_v1 = vpop.f32.mrf.mxu1  ;;  %v805_v61 = vpop.f32.mrf.mxu0 }
 0x120   : > { %v1016_v9 = vadd.f32 %v2620_v1, %v3670_v12  ;;  %v3717_v14 = vadd.f32 %v805_v61, %v636_v26  ;;  %v2069_v20 = vsub.s32 1, %v2064_v53 }
 0x121   : > { %v937_v50 = vpop.f32.mrf.mxu1  ;;  %v2641_v62 = vpop.f32.mrf.mxu0 }
 0x122   : > { %v1014_v60 = vadd.f32 %v937_v50, %v3672_v40  ;;  %v3720_v10 = vadd.f32 %v2641_v62, %v1015_v55  ;;  %v2065_v55 = vsub.s32 0, %v2064_v53 }
 0x123   : > { %v2623_v0 = vpop.f32.mrf.mxu1  ;;  %v1156_v42 = vpop.f32.mrf.mxu0 }
 0x124   : > { %v1019_v19 = vadd.f32 %v2623_v0, %v3674_v4  ;;  %v3723_v11 = vadd.f32 %v1156_v42, %v1013_v2 }
 0x125   : > { %v950_v36 = vpop.f32.mrf.mxu1  ;;  %v2642_v8 = vpop.f32.mrf.mxu0 }
 0x126   : > { %v1017_v41 = vadd.f32 %v950_v36, %v3676_v56  ;;  %v3726_v37 = vadd.f32 %v2642_v8, %v1016_v9 }
 0x127   : > { %v2624_v12 = vpop.f32.mrf.mxu1  ;;  %v1159_v17 = vpop.f32.mrf.mxu0 }
 0x128   : > { %v1020_v39 = vadd.f32 %v2624_v12, %v3678_v16  ;;  %v3729_v44 = vadd.f32 %v1159_v17, %v1014_v60 }
 0x129   : > { %v953_v40 = vpop.f32.mrf.mxu1  ;;  %v2645_v63 = vpop.f32.mrf.mxu0 }
 0x12a   : > { %v1018_v13 = vadd.f32 %v953_v40, %v3680_v48  ;;  %v3732_v5 = vadd.f32 %v2645_v63, %v1019_v19 }
 0x12b   : > { %v2627_v4 = vpop.f32.mrf.mxu1  ;;  %v1172_v3 = vpop.f32.mrf.mxu0 }
 0x12c   : > { %v1023_v34 = vadd.f32 %v2627_v4, %v3682_v24  ;;  %v3735_v47 = vadd.f32 %v1172_v3, %v1017_v41 }
 0x12d   : > { %v966_v56 = vpop.f32.mrf.mxu1  ;;  %v2646_v52 = vpop.f32.mrf.mxu0 }
 0x12e   : > { %v1021_v45 = vadd.f32 %v966_v56, %v3685_v54  ;;  %v3738_v49 = vadd.f32 %v2646_v52, %v1020_v39 }
 0x12f   : > { %v2628_v16 = vpop.f32.mrf.mxu1  ;;  %v1175_v6 = vpop.f32.mrf.mxu0 }
 0x130   : > { %v1024_v27 = vadd.f32 %v2628_v16, %v3688_v23  ;;  %v3741_v7 = vadd.f32 %v1175_v6, %v1018_v13 }
 0x131   : > { %v969_v48 = vpop.f32.mrf.mxu1  ;;  %v2649_v58 = vpop.f32.mrf.mxu0 }
 0x132   : > { %v1022_v46 = vadd.f32 %v969_v48, %v3691_v59  ;;  %v3744_v24 = vadd.f32 %v2649_v58, %v1023_v34  ;;  %v2061_v59 = vld [vmem:[%s3977_s2] sm:$0x3] }
 0x133   : > { %v2631_v22 = vpop.f32.mrf.mxu1  ;;  %v1188_v31 = vpop.f32.mrf.mxu0  ;;  %v2070_v2 = vrot.slane %v2061_v59, %v2069_v20  ;;  %v3758_v61 = vrot.slane %v2061_v59, %v2065_v55 }
 0x134   : > { %v1027_v54 = vadd.f32 %v2631_v22, %v3696_v38  ;;  %v3747_v18 = vadd.f32 %v1188_v31, %v1021_v45 }
 0x135   : > { %v982_v51 = vpop.f32.mrf.mxu1  ;;  %v2650_v26 = vpop.f32.mrf.mxu0  ;;  %4029 = vst [vmem:[#allocation2_spill] sm:$0xff] %v3758_v61  ;;  %2446 = vmatprep.mubr.msk.f32.mxu0 %vm2072_vm7, %v2070_v2  ;;  %2445 = vmatprep.mubr.msk.f32.mxu1 %vm2072_vm7, %v2070_v2 }
 0x136   : > { %v1025_v23 = vadd.f32 %v982_v51, %v3699_v29  ;;  %v3750_v28 = vadd.f32 %v2650_v26, %v1024_v27 }
 0x137   : > { %v2632_v30 = vpop.f32.mrf.mxu1  ;;  %v1191_v35 = vpop.f32.mrf.mxu0 }
 0x138   : > { %v1028_v1 = vadd.f32 %v2632_v30, %v3702_v15  ;;  %v3756_v38 = vadd.f32 %v1191_v35, %v1022_v46 }
 0x139   : > { %v985_v9 = vpop.f32.mrf.mxu1  ;;  %v2653_v50 = vpop.f32.mrf.mxu0 }
 0x13a   : > { %v1026_v29 = vadd.f32 %v985_v9, %v3705_v43  ;;  %v3761_v62 = vadd.f32 %v2653_v50, %v1027_v54 }
 0x13b   : > { %v2635_v60 = vpop.f32.mrf.mxu1  ;;  %v1204_v0 = vpop.f32.mrf.mxu0 }
 0x13c   : > { %v1031_v42 = vadd.f32 %v2635_v60, %v3708_v32  ;;  %v3764_v19 = vadd.f32 %v1204_v0, %v1025_v23 }
 0x13d   : > { %v998_v15 = vpop.f32.mrf.mxu1  ;;  %v2654_v36 = vpop.f32.mrf.mxu0 }
 0x13e   : > { %v1029_v8 = vadd.f32 %v998_v15, %v3711_v33  ;;  %v3767_v41 = vadd.f32 %v2654_v36, %v1028_v1 }
 0x13f   : > { %v2636_v12 = vpop.f32.mrf.mxu1  ;;  %v1207_v17 = vpop.f32.mrf.mxu0 }
 0x140   : > { %v1032_v39 = vadd.f32 %v2636_v12, %v3714_v21  ;;  %v3770_v40 = vadd.f32 %v1207_v17, %v1026_v29 }
 0x141   : > { %v1001_v43 = vpop.f32.mrf.mxu1  ;;  %v2657_v63 = vpop.f32.mrf.mxu0 }
 0x142   : > { %v1030_v13 = vadd.f32 %v1001_v43, %v3717_v14  ;;  %v1253_v4 = vadd.f32 %v2657_v63, %v1031_v42 }
 0x143   : > { %v2663_v32 = vpop.f32.mrf.mxu1  ;;  %v1220_v3 = vpop.f32.mrf.mxu0 }
 0x144   : > { %v1427_v34 = vadd.f32 %v2663_v32, %v3720_v10  ;;  %v1251_v56 = vadd.f32 %v1220_v3, %v1029_v8 }
 0x145   : > { %v1346_v52 = vpop.f32.mrf.mxu1  ;;  %v2658_v33 = vpop.f32.mrf.mxu0 }
 0x146   : > { %v1425_v45 = vadd.f32 %v1346_v52, %v3723_v11  ;;  %v3775_v16 = vadd.f32 %v2658_v33, %v1032_v39 }
 0x147   : > { %v2664_v6 = vpop.f32.mrf.mxu1  ;;  %v1223_v21 = vpop.f32.mrf.mxu0 }
 0x148   : > { %4030 = vst [vmem:[#allocation5_spill] sm:$0xff] %v3775_v16  ;;  %v1428_v27 = vadd.f32 %v2664_v6, %v3726_v37  ;;  %v3778_v48 = vadd.f32 %v1223_v21, %v1030_v13 }
 0x149   : > { %v1349_v58 = vpop.f32.mrf.mxu1  ;;  %v2685_v14 = vpop.f32.mrf.mxu0 }
 0x14a   : > { %4031 = vst [vmem:[#allocation3_spill] sm:$0xff] %v3778_v48  ;;  %v1426_v57 = vadd.f32 %v1349_v58, %v3729_v44  ;;  %v3781_v46 = vadd.f32 %v2685_v14, %v1427_v34 }
 0x14b   : > { %v2667_v10 = vpop.f32.mrf.mxu1  ;;  %v1528_v22 = vpop.f32.mrf.mxu0 }
 0x14c   : > { %4032 = vst [vmem:[#allocation4_spill] sm:$0xff] %v3781_v46  ;;  %v1431_v31 = vadd.f32 %v2667_v10, %v3732_v5  ;;  %v3784_v53 = vadd.f32 %v1528_v22, %v1425_v45 }
 0x14d   : > { %v1362_v11 = vpop.f32.mrf.mxu1  ;;  %v2686_v54 = vpop.f32.mrf.mxu0 }
 0x14e   : > { %4033 = vst [vmem:[#allocation6_spill] sm:$0xff] %v3784_v53  ;;  %v1429_v51 = vadd.f32 %v1362_v11, %v3735_v47  ;;  %v3787_v26 = vadd.f32 %v2686_v54, %v1428_v27 }
 0x14f   : > { %v2668_v37 = vpop.f32.mrf.mxu1  ;;  %v1531_v20 = vpop.f32.mrf.mxu0 }
 0x150   : > { %v1432_v23 = vadd.f32 %v2668_v37, %v3738_v49  ;;  %v3790_v59 = vadd.f32 %v1531_v20, %v1426_v57 }
 0x151   : > { %v1365_v44 = vpop.f32.mrf.mxu1  ;;  %v2689_v55 = vpop.f32.mrf.mxu0 }
 0x152   : > { %4034 = vst [vmem:[#allocation7_spill] sm:$0xff] %v3790_v59  ;;  %v1430_v30 = vadd.f32 %v1365_v44, %v3741_v7  ;;  %v3793_v35 = vadd.f32 %v2689_v55, %v1431_v31 }
 0x153   : > { %v3795_v5 = vpop.f32.mrf.mxu1  ;;  %v1544_v2 = vpop.f32.mrf.mxu0 }
 0x154   : > { %v3797_v1 = vadd.f32 %v1544_v2, %v1429_v51 }
 0x155   : > { %v3799_v47 = vpop.f32.mrf.mxu1  ;;  %v2690_v9 = vpop.f32.mrf.mxu0 }
 0x156   : > { %v3801_v50 = vadd.f32 %v2690_v9, %v1432_v23 }
 0x157   : > { %v3803_v29 = vpop.f32.mrf.mxu1  ;;  %v1547_v49 = vpop.f32.mrf.mxu0 }
 0x158   : > { %v3805_v60 = vadd.f32 %v1547_v49, %v1430_v30 }
 0x159   : > { %v3807_v0 = vpop.f32.mrf.mxu1  ;;  %v3809_v7 = vpop.f32.mrf.mxu0 }
 0x15b   : > { %v2675_v42 = vpop.f32.mrf.mxu1  ;;  %v3811_v15 = vpop.f32.mrf.mxu0 }
 0x15d   : > { %v1394_v36 = vpop.f32.mrf.mxu1  ;;  %v3813_v8 = vpop.f32.mrf.mxu0 }
 0x15f   : > { %v2676_v12 = vpop.f32.mrf.mxu1  ;;  %v3815_v17 = vpop.f32.mrf.mxu0 }
 0x161   : > { %v1397_v39 = vpop.f32.mrf.mxu1  ;;  %v2697_v43 = vpop.f32.mrf.mxu0 }
 0x163   : > { %v2679_v63 = vpop.f32.mrf.mxu1  ;;  %v1576_v13 = vpop.f32.mrf.mxu0 }
 0x164   : > { %v1443_v32 = vadd.f32 %v2679_v63, %v1253_v4 }
 0x165   : > { %v1410_v3 = vpop.f32.mrf.mxu1  ;;  %v2698_v34 = vpop.f32.mrf.mxu0 }
 0x166   : > { %v1441_v52 = vadd.f32 %v1410_v3, %v1251_v56 }
 0x167   : > { %v3817_v33 = vpop.f32.mrf.mxu1  ;;  %v1579_v45 = vpop.f32.mrf.mxu0 }
 0x168   : > { %4035 = vst [vmem:[#allocation9_spill] sm:$0xff] %v3817_v33 }
 0x169   : > { %v3819_v6 = vpop.f32.mrf.mxu1  ;;  %v2701_v21 = vpop.f32.mrf.mxu0 }
 0x16a   : > { %4036 = vst [vmem:[#allocation10_spill] sm:$0xff] %v3819_v6  ;;  %v3821_v27 = vadd.f32 %v2701_v21, %v1443_v32  ;;  %v1440_v6 = vadd.f32 %v2676_v12, %v3767_v41 }
 0x16b   : > { %v3823_v58 = vpop.f32.mrf.mxu1  ;;  %v1592_v14 = vpop.f32.mrf.mxu0 }
 0x16c   : > { %4037 = vst [vmem:[#allocation8_spill] sm:$0xff] %v3821_v27  ;;  %4038 = vst [vmem:[#allocation12_spill] sm:$0xff] %v3823_v58  ;;  %v3825_v57 = vadd.f32 %v1592_v14, %v1441_v52 }
 0x16d   : > { %v3827_v10 = vpop.f32.mrf.mxu1  ;;  %v3829_v22 = vpop.f32.mrf.mxu0 }
 0x16e   : > { %4039 = vst [vmem:[#allocation11_spill] sm:$0xff] %v3825_v57  ;;  %4040 = vst [vmem:[#allocation13_spill] sm:$0xff] %v3827_v10  ;;  %v1622_v10 = vadd.f32 %v2698_v34, %v1440_v6 }
 0x16f   : > { %4041 = vst [vmem:[#allocation15_spill] sm:$0xff] %v3829_v22  ;;  %v3831_v4 = vpop.f32.mrf.mxu1  ;;  %v3833_v56 = vpop.f32.mrf.mxu0 }
 0x170   : > { %4042 = vst [vmem:[#allocation14_spill] sm:$0xff] %v3833_v56 }
 0x171   : > { %v3835_v31 = vpop.f32.mrf.mxu1  ;;  %v3837_v11 = vpop.f32.mrf.mxu0 }
 0x172   : > { %4043 = vst [vmem:[#allocation16_spill] sm:$0xff] %v3835_v31  ;;  %4044 = vst [vmem:[#allocation17_spill] sm:$0xff] %v3837_v11  ;;  %v1437_v31 = vadd.f32 %v1394_v36, %v3764_v19  ;;  %v1434_v36 = vadd.f32 %v3807_v0, %v3756_v38 }
 0x173   : > { %v3839_v54 = vpop.f32.mrf.mxu1  ;;  %v3841_v51 = vpop.f32.mrf.mxu0 }
 0x174   : > { %4045 = vst [vmem:[#allocation18_spill] sm:$0xff] %v3841_v51  ;;  %v1439_v51 = vadd.f32 %v2675_v42, %v3761_v62  ;;  %v1619_v46 = vadd.f32 %v1576_v13, %v1437_v31 }
 0x175   : > { %v3843_v37 = vpop.f32.mrf.mxu1  ;;  %v3845_v20 = vpop.f32.mrf.mxu0 }
 0x176   : > { %4046 = vst [vmem:[#allocation19_spill] sm:$0xff] %v3845_v20  ;;  %v1621_v22 = vadd.f32 %v2697_v43, %v1439_v51  ;;  %v1436_v20 = vadd.f32 %v3803_v29, %v3750_v28  ;;  %v4048_v29 = vmov 0.0   ;;  %v4050_v51 = vld [vmem:[#allocation12_spill] sm:$0xff] }
 0x177   : > { %v3847_v23 = vpop.f32.mrf.mxu1  ;;  %v3849_v44 = vpop.f32.mrf.mxu0 }
 0x178   : > { %4047 = vst [vmem:[#allocation20_spill] sm:$0xff] %v3849_v44  ;;  %v1438_v44 = vadd.f32 %v1397_v39, %v3770_v40  ;;  %v1435_v40 = vadd.f32 %v3795_v5, %v3744_v24  ;;  %v1618_v39 = vadd.f32 %v3813_v8, %v1436_v20  ;;  %v1433_v24 = vadd.f32 %v3799_v47, %v3747_v18 }
 0x179   : > { %v3851_v55 = vpop.f32.mrf.mxu1  ;;  %v3853_v30 = vpop.f32.mrf.mxu0 }
 0x17a   : > { %v1620_v59 = vadd.f32 %v1579_v45, %v1438_v44  ;;  %v1617_v28 = vadd.f32 %v3809_v7, %v1435_v40  ;;  %v1615_v5 = vadd.f32 %v3811_v15, %v1433_v24  ;;  %v1859_v15 = vadd.f32 %v3847_v23, %v3801_v50  ;;  %v4064_v24 = vld [vmem:[#allocation14_spill] sm:$0xff] }
 0x17b   : > { %v2715_v2 = vpop.f32.mrf.mxu1  ;;  %v3855_v9 = vpop.f32.mrf.mxu0  ;;  %v1858_v45 = vadd.f32 %v3839_v54, %v3793_v35  ;;  %v1856_v35 = vadd.f32 %v3843_v37, %v3797_v1  ;;  %v4049_v1 = vld [vmem:[#allocation4_spill] sm:$0xff] }
 0x17c   : > { %v1854_v37 = vadd.f32 %v4050_v51, %v4049_v1 }
 0x17d   : > { %v3857_v49 = vpop.f32.mrf.mxu1  ;;  %v3859_v63 = vpop.f32.mrf.mxu0  ;;  %v2047_v50 = vadd.f32 %v3853_v30, %v1858_v45  ;;  %v4051_v20 = vld [vmem:[#allocation19_spill] sm:$0xff] }
 0x17e   : > { %v1860_v47 = vadd.f32 %v3857_v49, %v1615_v5  ;;  %v2048_v6 = vadd.f32 %v3859_v63, %v1859_v15  ;;  %v4056_v63 = vld [vmem:[#allocation17_spill] sm:$0xff] }
 0x17f   : > { %v2716_v32 = vpop.f32.mrf.mxu1  ;;  %v3861_v3 = vpop.f32.mrf.mxu0  ;;  %v2151_v31 = vmul.f32 %v2047_v50, %v2047_v50 }
 0x181   : > { %v1808_v52 = vpop.f32.mrf.mxu1  ;;  %v2737_v21 = vpop.f32.mrf.mxu0 }
 0x183   : > { %v2719_v14 = vpop.f32.mrf.mxu1  ;;  %v3863_v25 = vpop.f32.mrf.mxu0 }
 0x184   : > { %v1866_v33 = vadd.f32 %v2719_v14, %v1621_v22 }
 0x185   : > { %v1821_v61 = vpop.f32.mrf.mxu1  ;;  %v2738_v57 = vpop.f32.mrf.mxu0 }
 0x186   : > { %v1864_v43 = vadd.f32 %v1821_v61, %v1619_v46  ;;  %v1616_v61 = vadd.f32 %v3815_v17, %v1434_v36  ;;  %v1862_v46 = vadd.f32 %v2715_v2, %v1617_v28  ;;  %v4054_v2 = vld [vmem:[#allocation7_spill] sm:$0xff] }
 0x187   : > { %v2720_v27 = vpop.f32.mrf.mxu1  ;;  %v1997_v56 = vpop.f32.mrf.mxu0 }
 0x188   : > { %v1867_v16 = vadd.f32 %v2720_v27, %v1622_v10  ;;  %v1861_v0 = vadd.f32 %v1808_v52, %v1616_v61  ;;  %v2051_v7 = vadd.f32 %v2737_v21, %v1862_v46  ;;  %v2152_v10 = vmul.f32 %v2048_v6, %v2048_v6  ;;  %v4057_v52 = vld [vmem:[#allocation6_spill] sm:$0xff]  ;;  %v4058_v21 = vld [vmem:[#allocation13_spill] sm:$0xff] }
 0x189   : > { %v2741_v48 = vpop.f32.mrf.mxu0  ;;  %v1824_v53 = vpop.f32.mrf.mxu1  ;;  %v1852_v14 = vadd.f32 %v4058_v21, %v4057_v52 }
 0x18a   : > { %v1865_v62 = vadd.f32 %v1824_v53, %v1620_v59  ;;  %v2055_v42 = vadd.f32 %v2741_v48, %v1866_v33  ;;  %v1863_v53 = vadd.f32 %v2716_v32, %v1618_v39  ;;  %v2050_v17 = vadd.f32 %v1997_v56, %v1861_v0 }
 0x18b   : > { %v2010_v11 = vpop.f32.mrf.mxu0  ;;  %v2155_v13 = vmul.f32 %v2051_v7, %v2051_v7  ;;  %v2049_v33 = vadd.f32 %v3863_v25, %v1860_v47  ;;  %v1857_v25 = vadd.f32 %v3851_v55, %v3805_v60  ;;  %v1855_v60 = vadd.f32 %v3831_v4, %v3787_v26  ;;  %v4052_v55 = vld [vmem:[#allocation5_spill] sm:$0xff] }
 0x18c   : > { %v2159_v48 = vmul.f32 %v2055_v42, %v2055_v42  ;;  %v2052_v38 = vadd.f32 %v2738_v57, %v1863_v53  ;;  %v2154_v27 = vmul.f32 %v2050_v17, %v2050_v17  ;;  %v2723_v57 = vpop.f32.mrf.mxu1  ;;  %v4053_v26 = vld [vmem:[#allocation9_spill] sm:$0xff]  ;;  %v2043_v32 = vadd.f32 %v4056_v63, %v1854_v37  ;;  %v4063_v53 = vld [vmem:[#allocation18_spill] sm:$0xff] }
 0x18d   : > { %v2742_v58 = vpop.f32.mrf.mxu0  ;;  %v2046_v22 = vadd.f32 %v3861_v3, %v1857_v25  ;;  %v2044_v23 = vadd.f32 %v4051_v20, %v1855_v60  ;;  %v1444_v4 = vadd.f32 %v4053_v26, %v4052_v55 }
 0x18e   : > { %v2056_v41 = vadd.f32 %v2742_v58, %v1867_v16  ;;  %v2053_v16 = vadd.f32 %v2010_v11, %v1864_v43  ;;  %v2156_v8 = vmul.f32 %v2052_v38, %v2052_v38  ;;  %v2153_v58 = vmul.f32 %v2049_v33, %v2049_v33  ;;  %v1837_v54 = vpop.f32.mrf.mxu1  ;;  %v4061_v43 = vld [vmem:[#allocation3_spill] sm:$0xff] }
 0x18f   : > { %v2013_v12 = vpop.f32.mrf.mxu0  ;;  %v2045_v11 = vadd.f32 %v3855_v9, %v1856_v35  ;;  %v2150_v44 = vmul.f32 %v2046_v22, %v2046_v22  ;;  %v4055_v9 = vld [vmem:[#allocation16_spill] sm:$0xff]  ;;  %v2148_v40 = vmul.f32 %v2044_v23, %v2044_v23  ;;  %v2147_v28 = vmul.f32 %v2043_v32, %v2043_v32 }
 0x190   : > { %v2160_v34 = vmul.f32 %v2056_v41, %v2056_v41  ;;  %v2054_v19 = vadd.f32 %v2013_v12, %v1865_v62  ;;  %2076 = vmatpush1.msra.mxu1 %v2056_v41  ;;  %v2157_v18 = vmul.f32 %v2053_v16, %v2053_v16  ;;  %v1853_v49 = vadd.f32 %v4055_v9, %v4054_v2  ;;  %v2724_v62 = vpop.f32.mrf.mxu1  ;;  %v4060_v12 = vld [vmem:[#allocation20_spill] sm:$0xff] }
 0x191   : > { %2077 = vmatprep.subr.mxu1 %v4048_v29  ;;  %v2745_v56 = vpop.f32.mrf.mxu0  ;;  %v2149_v3 = vmul.f32 %v2045_v11, %v2045_v11 }
 0x192   : > { %2078 = vmatpush1.msra.mxu1 %v2055_v42  ;;  %2166 = vmatpush1.msra.mxu0 %v2160_v34  ;;  %v2158_v59 = vmul.f32 %v2054_v19, %v2054_v19  ;;  %v4059_v42 = vld [vmem:[#allocation15_spill] sm:$0xff]  ;;  %v2042_v39 = vadd.f32 %v4060_v12, %v1853_v49  ;;  %v4062_v34 = vld [vmem:[#allocation10_spill] sm:$0xff]  ;;  %v1840_v46 = vpop.f32.mrf.mxu1 }
 0x193   : > { %2079 = vmatprep.subr.mxu1 %v4048_v29  ;;  %2167 = vmatprep.subr.mxu0 %v4048_v29  ;;  %v2026_v30 = vpop.f32.mrf.mxu0  ;;  %v1626_v41 = vadd.f32 %v4059_v42, %v1444_v4 }
 0x194   : > { %2080 = vmatpush1.msra.mxu1 %v2054_v19  ;;  %2168 = vmatpush1.msra.mxu0 %v2159_v48  ;;  %v1442_v19 = vadd.f32 %v4062_v34, %v4061_v43  ;;  %v2041_v48 = vadd.f32 %v4063_v53, %v1852_v14 }
 0x195   : > { %2081 = vmatprep.subr.mxu1 %v4048_v29  ;;  %2169 = vmatprep.subr.mxu0 %v4048_v29  ;;  %v2746_v36 = vpop.f32.mrf.mxu0 }
 0x196   : > { %2082 = vmatpush1.msra.mxu1 %v2053_v16  ;;  %2170 = vmatpush1.msra.mxu0 %v2158_v59  ;;  %v1871_v16 = vadd.f32 %v2724_v62, %v1626_v41  ;;  %v1624_v61 = vadd.f32 %v4064_v24, %v1442_v19  ;;  %v4065_v59 = vld [vmem:[#allocation8_spill] sm:$0xff] }
 0x197   : > { %2083 = vmatprep.subr.mxu1 %v4048_v29  ;;  %2171 = vmatprep.subr.mxu0 %v4048_v29  ;;  %v1870_v5 = vadd.f32 %v2723_v57, %v4065_v59 }
 0x198   : > { %2084 = vmatpush1.msra.mxu1 %v2052_v38  ;;  %2172 = vmatpush1.msra.mxu0 %v2157_v18  ;;  %v2146_v38 = vmul.f32 %v2042_v39, %v2042_v39  ;;  %v2060_v0 = vadd.f32 %v2746_v36, %v1871_v16  ;;  %v2145_v18 = vmul.f32 %v2041_v48, %v2041_v48 }
 0x199   : > { %2085 = vmatprep.subr.mxu1 %v4048_v29  ;;  %2173 = vmatprep.subr.mxu0 %v4048_v29  ;;  %v1869_v47 = vadd.f32 %v1840_v46, %v1624_v61 }
 0x19a   : > { %2086 = vmatpush1.msra.mxu1 %v2051_v7  ;;  %2174 = vmatpush1.msra.mxu0 %v2156_v8  ;;  %v2029_v7 = vpop.f32.mrf.mxu0  ;;  %v2059_v8 = vadd.f32 %v2745_v56, %v1870_v5 }
 0x19b   : > { %2087 = vmatprep.subr.mxu1 %v4048_v29  ;;  %2175 = vmatprep.subr.mxu0 %v4048_v29 }
 0x19c   : > { %2088 = vmatpush1.msra.mxu1 %v2050_v17  ;;  %2176 = vmatpush1.msra.mxu0 %v2155_v13  ;;  %v4066_v17 = vld [vmem:[#allocation11_spill] sm:$0xff]  ;;  %v2164_v13 = vmul.f32 %v2060_v0, %v2060_v0  ;;  %v2163_v45 = vmul.f32 %v2059_v8, %v2059_v8 }
 0x19d   : > { %2089 = vmatprep.subr.mxu1 %v4048_v29  ;;  %2177 = vmatprep.subr.mxu0 %v4048_v29  ;;  %v1868_v15 = vadd.f32 %v1837_v54, %v4066_v17 }
 0x19e   : > { %2090 = vmatpush1.msra.mxu1 %v2049_v33  ;;  %2178 = vmatpush1.msra.mxu0 %v2154_v27  ;;  %v2058_v33 = vadd.f32 %v2029_v7, %v1869_v47 }
 0x19f   : > { %2091 = vmatprep.subr.mxu1 %v4048_v29  ;;  %2179 = vmatprep.subr.mxu0 %v4048_v29 }
 0x1a0   : > { %2092 = vmatpush1.msra.mxu1 %v2048_v6  ;;  %2180 = vmatpush1.msra.mxu0 %v2153_v58  ;;  %v2057_v6 = vadd.f32 %v2026_v30, %v1868_v15  ;;  %v2162_v27 = vmul.f32 %v2058_v33, %v2058_v33 }
 0x1a1   : > { %2093 = vmatprep.subr.mxu1 %v4048_v29  ;;  %2181 = vmatprep.subr.mxu0 %v4048_v29 }
 0x1a2   : > { %2094 = vmatpush1.msra.mxu1 %v2047_v50  ;;  %2182 = vmatpush1.msra.mxu0 %v2152_v10  ;;  %v2161_v25 = vmul.f32 %v2057_v6, %v2057_v6  ;;  %v4067_v50 = vld [vmem:[#allocation2_spill] sm:$0xff] }
 0x1a3   : > { %2095 = vmatprep.subr.mxu1 %v4048_v29  ;;  %2183 = vmatprep.subr.mxu0 %v4048_v29 }
 0x1a4   : > { %2096 = vmatpush1.msra.mxu1 %v2046_v22  ;;  %2184 = vmatpush1.msra.mxu0 %v2151_v31 }
 0x1a5   : > { %2097 = vmatprep.subr.mxu1 %v4048_v29  ;;  %2185 = vmatprep.subr.mxu0 %v4048_v29 }
 0x1a6   : > { %2098 = vmatpush1.msra.mxu1 %v2045_v11  ;;  %2186 = vmatpush1.msra.mxu0 %v2150_v44 }
 0x1a7   : > { %2099 = vmatprep.subr.mxu1 %v4048_v29  ;;  %2187 = vmatprep.subr.mxu0 %v4048_v29 }
 0x1a8   : > { %2100 = vmatpush1.msra.mxu1 %v2044_v23  ;;  %2188 = vmatpush1.msra.mxu0 %v2149_v3 }
 0x1a9   : > { %2101 = vmatprep.subr.mxu1 %v4048_v29  ;;  %2189 = vmatprep.subr.mxu0 %v4048_v29 }
 0x1aa   : > { %2102 = vmatpush1.msra.mxu1 %v2043_v32  ;;  %2190 = vmatpush1.msra.mxu0 %v2148_v40 }
 0x1ab   : > { %2103 = vmatprep.subr.mxu1 %v4048_v29  ;;  %2191 = vmatprep.subr.mxu0 %v4048_v29 }
 0x1ac   : > { %2104 = vmatpush1.msra.mxu1 %v2042_v39  ;;  %2192 = vmatpush1.msra.mxu0 %v2147_v28 }
 0x1ad   : > { %2105 = vmatprep.subr.mxu1 %v4048_v29  ;;  %2193 = vmatprep.subr.mxu0 %v4048_v29 }
 0x1ae   : > { %2106 = vmatpush1.msra.mxu1 %v2041_v48  ;;  %2194 = vmatpush1.msra.mxu0 %v2146_v38 }
 0x1af   : > { %2131 = vmatprep.subr.mxu1 %v4048_v29  ;;  %2195 = vmatprep.subr.mxu0 %v4048_v29 }
 0x1b0   : > { %2132 = vmatpush2.msra.mxu1 %v2060_v0  ;;  %2196 = vmatpush1.msra.mxu0 %v2145_v18 }
 0x1b1   : > { %2133 = vmatprep.subr.mxu1 %v4048_v29  ;;  %2221 = vmatprep.subr.mxu0 %v4048_v29 }
 0x1b2   : > { %2134 = vmatpush2.msra.mxu1 %v2059_v8  ;;  %2222 = vmatpush2.msra.mxu0 %v2164_v13 }
 0x1b3   : > { %2135 = vmatprep.subr.mxu1 %v4048_v29  ;;  %2223 = vmatprep.subr.mxu0 %v4048_v29 }
 0x1b4   : > { %2136 = vmatpush2.msra.mxu1 %v2058_v33  ;;  %2224 = vmatpush2.msra.mxu0 %v2163_v45 }
 0x1b5   : > { %2137 = vmatprep.subr.mxu1 %v4048_v29  ;;  %2225 = vmatprep.subr.mxu0 %v4048_v29 }
 0x1b6   : > { %2138 = vmatpush2.msra.mxu1 %v2057_v6  ;;  %2226 = vmatpush2.msra.mxu0 %v2162_v27 }
 0x1b7   : > { %2227 = vmatprep.subr.mxu0 %v4048_v29  ;;  %2140 = vmatmul.mubr.f32.vlgmr.msra.gmra.mxu1 %v4067_v50 }
 0x1b8   : > { %2228 = vmatpush2.msra.mxu0 %v2161_v25 }
 0x1b9   : > { %2230 = vmatmul.mubr.f32.vlgmr.msra.gmra.mxu0 %v4067_v50 }
 0x277   : > { %v2141_v58 = vpop.f32.mrf.mxu1 }
 0x279   : > { %v2231_v57 = vpop.f32.mrf.mxu0  ;;  %v2143_v35 = vpop.f32.mrf.mxu1  ;;  %2244 = sbr.rel (%p2447_p7) target bundleno = 640 (0x280), region = 36 }
 0x27a   : > { %v2236_v10 = vrot.slane %v2231_v57, 7 }
 0x27b   : > { %v2233_v22 = vpop.f32.mrf.mxu0 }
 0x27c   : > { %v2239_v56 = vsel %vm2238_vm8, %v2141_v58, %v2236_v10 }
 0x27d   : > { %v2240_v60 = vsel %vm394_vm0, %v2239_v56, 0.0 }
 0x27e   : > { %v2867_v31 = vmov 0.0  }
 0x27f   : > { %2245 = vst [vmem:[%s2938_s30] sm:$0xff] %v2867_v31 }
 0x280 PF:  {}
 0x286   : > { %v2246_v29 = vld [vmem:[%s2938_s30] sm:$0xff] }
 0x287   : > { %v2247_v11 = vadd.f32 %v2246_v29, %v2240_v60 }
 0x289   : > { %2248 = vst [vmem:[%s2938_s30] sm:$0xff] %v2247_v11 }
 0x28a PF: > { %s13_s16 = sadd.s32 1, %s2864_s16   ;;  %s4068_s12 = smov %s2856_s14 }
 0x28b   : > { %p10_p8 = scmp.ge.s32.totalorder %s13_s16, 6   ;;  %s4069_s13 = smov %s2860_s15 }
 0x28c   : > { %s4070_s14 = smov %s4073_s17  ;;  %s4071_s15 = smov %s4077_s18 }
 0x28d   :  { %12 = sbr.rel (!%p10_p8) target bundleno = 3 (0x3), region = 74 }

</bundles_post_ra>
